<compile_context>
chip_gen: v6e
topology: v6e:2x2x1
jax: 0.10.0
libtpu: 0.0.40
codegen_flags: <defaults>
</compile_context>

<pallas_src>
import math

import numpy as np
import jax
import jax.numpy as jnp
from jax.experimental import pallas as pl
from jax.experimental.pallas import tpu as pltpu


# ----------------------------------------------------------------------------
# Model hyper-parameters (small config, consistent with the module arithmetic).
# ----------------------------------------------------------------------------
INPUT_LENGTH = 1300
SR = 4000
N_CLASS = 10
BATCH = 2
STRIDE1, STRIDE2 = 2, 2
CH = [4, 16, 8, 8, 8, 8, 8, 8, 8, 8, 8, N_CLASS]

N_FRAMES = SR / 1000 * 10                           # 40.0
SFEB_POOL = int(N_FRAMES / (STRIDE1 * STRIDE2))     # 10
TFEB_WIDTH = int(INPUT_LENGTH / SR * 1000 / 10)     # 32

# SFEB geometry.
W1_OUT = (INPUT_LENGTH - 9) // STRIDE1 + 1          # 646
W2_OUT = (W1_OUT - 5) // STRIDE2 + 1                # 321
NPH = (W1_OUT + 1) // 2                             # 323 (even/odd phase length)
POOL_OUT = W2_OUT // SFEB_POOL                      # 32
WTOT = BATCH * W2_OUT                               # 642 (batch-stacked width)
SLW = WTOT - SFEB_POOL + 1                          # 633 (sliding-max width)

# TFEB layer table: (conv_idx, H, W, Cin, Cout, pool_h, pool_w)  -- pools that
# follow each conv (1 == no pooling on that axis).
TFEB_CFG = [
    (3, 16, 32, 1, 8, 2, 2),
    (4, 8, 16, 8, 8, 1, 1),
    (5, 8, 16, 8, 8, 2, 2),
    (6, 4, 8, 8, 8, 1, 1),
    (7, 4, 8, 8, 8, 2, 2),
    (8, 2, 4, 8, 8, 1, 1),
    (9, 2, 4, 8, 8, 2, 2),
    (10, 1, 2, 8, 8, 1, 1),
    (11, 1, 2, 8, 8, 1, 2),
]
N_TFEB = len(TFEB_CFG)
R0 = BATCH * (CH[1] + 2)            # rows of the first TFEB slab (36)
N_PACKED = 6 + sum(4 if c[5] == 2 else 3 for c in TFEB_CFG) + 4


# ----------------------------------------------------------------------------
# The fused Pallas kernel (single invocation, everything resident in VMEM).
# ----------------------------------------------------------------------------
def acdnet_kernel(*refs):
    it = iter(refs)
    taps_ref = next(it)
    w1m_ref, b1_ref, w2_ref, b2_ref, sel_ref, lmat_ref = [next(it) for _ in range(6)]
    layer_refs = []
    for li in range(N_TFEB):
        n_aux = 4 if TFEB_CFG[li][5] == 2 else 3
        layer_refs.append([next(it) for _ in range(n_aux)])
    w12_ref, b12_ref, wfc_ref, bfc_ref = [next(it) for _ in range(4)]
    out_ref = next(it)
    a2_ref = next(it)                # (20, WTOT) VMEM scratch: conv2 input slab

    f32 = jnp.float32

    def mm(a, b):
        return jnp.dot(a, b, preferred_element_type=f32)

    # --------------------------- SFEB ---------------------------------------
    # conv1 (k=9, stride 2) + BN + ReLU for both batches & both phases at once.
    y1 = jnp.maximum(mm(w1m_ref[...], taps_ref[...]) + b1_ref[...], 0.0)  # (4,1292)

    # conv2 (k=5, stride 2): assemble the K=20 batch-stacked slab, one matmul.
    # Tap k -> (phase k % 2, shift k // 2); rows 4k..4k+3 hold that tap's chans.
    for n in range(BATCH):
        e0 = (2 * n) * NPH
        o0 = (2 * n + 1) * NPH
        c0 = n * W2_OUT
        a2_ref[0:4, c0:c0 + W2_OUT] = y1[:, e0:e0 + W2_OUT]
        a2_ref[4:8, c0:c0 + W2_OUT] = y1[:, o0:o0 + W2_OUT]
        a2_ref[8:12, c0:c0 + W2_OUT] = y1[:, e0 + 1:e0 + 1 + W2_OUT]
        a2_ref[12:16, c0:c0 + W2_OUT] = y1[:, o0 + 1:o0 + 1 + W2_OUT]
        a2_ref[16:20, c0:c0 + W2_OUT] = y1[:, e0 + 2:e0 + 2 + W2_OUT]
    y2 = jnp.maximum(mm(w2_ref[...], a2_ref[...]) + b2_ref[...], 0.0)     # (16,642)

    # MaxPool2d(1, 10): log-doubling sliding max then host-built selection.
    m2 = jnp.maximum(y2[:, 0:WTOT - 1], y2[:, 1:WTOT])          # window 2
    m4 = jnp.maximum(m2[:, 0:WTOT - 3], m2[:, 2:WTOT - 1])      # window 4
    m8 = jnp.maximum(m4[:, 0:WTOT - 7], m4[:, 4:WTOT - 3])      # window 8
    m10 = jnp.maximum(m8[:, 0:SLW], m2[:, 8:8 + SLW])           # window 10
    pooled = mm(m10, sel_ref[...])                              # (16, 2*32)

    # permute(0,2,1,3): conv2 channels become TFEB rows.  Build the first padded
    # slab (36, 32) with per-batch placement matmuls (zero border rows for free).
    a = mm(lmat_ref[0], pooled[:, 0:POOL_OUT])
    for n in range(1, BATCH):
        a = a + mm(lmat_ref[n], pooled[:, n * POOL_OUT:(n + 1) * POOL_OUT])

    # --------------------------- TFEB ---------------------------------------
    head = None
    for li, (idx, H, W, Ci, Co, ph, pw) in enumerate(TFEB_CFG):
        aux = layer_refs[li]
        bd_ref, brow_ref = aux[0], aux[1]
        R = BATCH * (H + 2)
        # 3x3 conv + folded BN as three banded matmuls over the stacked slab.
        y = mm(a[0:R - 2, :], bd_ref[0])
        y = y + mm(a[1:R - 1, :], bd_ref[1])
        y = y + mm(a[2:R, :], bd_ref[2])
        y = jnp.maximum(y + brow_ref[...], 0.0)                  # (R-2, W*Co)
        if pw == 2:
            # W-MaxPool: output columns are pre-permuted [even w | odd w].
            half = (W // 2) * Co
            y = jnp.maximum(y[:, 0:half], y[:, half:2 * half])
        if li + 1 < N_TFEB:
            if ph == 2:
                # H-MaxPool fused with placement into the next padded slab.
                a = jnp.maximum(mm(aux[2][...], y), mm(aux[3][...], y))
            else:
                a = mm(aux[2][...], y)
        else:
            head = mm(aux[2][...], y)                            # (BATCH, 8)

    # Dropout(0.2) is identity at inference.
    # conv12 (1x1) + BN + ReLU, then the final Linear; one batched store.
    z = jnp.maximum(mm(head, w12_ref[...]) + b12_ref[...], 0.0)  # (BATCH, 10)
    out_ref[...] = mm(z, wfc_ref[...]) + bfc_ref[...]


# ----------------------------------------------------------------------------
# Wrapper: polyphase tap extraction for conv1 + the single pallas_call.
# ----------------------------------------------------------------------------
def forward_pallas(x, packed):
    x2 = x.reshape(BATCH, INPUT_LENGTH)
    # taps[k, (2n+q)*NPH + j] = x[n, 4j + 2q + k]  (conv1 output position 2j+q).
    cols = []
    for n in range(BATCH):
        for q in range(2):
            cols.append(jnp.stack(
                [x2[n, 2 * q + k::4][:NPH] for k in range(9)], axis=0))   # (9,323)
    taps = jnp.concatenate(cols, axis=1)                                  # (9,1292)

    return pl.pallas_call(
        acdnet_kernel,
        out_shape=jax.ShapeDtypeStruct((BATCH, N_CLASS), jnp.float32),
        scratch_shapes=[pltpu.VMEM((5 * CH[0], WTOT), jnp.float32)],
    )(taps, *packed)


# ----------------------------------------------------------------------------
# One-time parameter packing (numpy, outside jit): fold BN into the weights,
# build the banded (Toeplitz) conv matrices and all 0/1 selection/placement
# matrices (so the kernel never constructs constants with iota/compare).
# ----------------------------------------------------------------------------
def pack_params(params):
    def npa(a):
        return np.asarray(a, dtype=np.float32)

    packed = []
    # conv1 + bn1 (scale folded into weights).
    w1 = npa(params["conv1_w"])[:, 0, 0, :]                       # (4, 9)
    s1, bb1 = npa(params["bn1_scale"]), npa(params["bn1_bias"])
    packed.append(np.ascontiguousarray(w1 * s1[:, None]))
    packed.append(np.ascontiguousarray(bb1[:, None]))             # (4, 1)

    # conv2 + bn2 as one (16, 20) matrix; K columns ordered (tap major, cin minor).
    w2 = npa(params["conv2_w"])[:, :, 0, :]                       # (16, 4, 5)
    s2, bb2 = npa(params["bn2_scale"]), npa(params["bn2_bias"])
    w2k = np.transpose(w2, (0, 2, 1)).reshape(CH[1], 5 * CH[0])   # (16, 20)
    packed.append(np.ascontiguousarray(w2k * s2[:, None]))
    packed.append(np.ascontiguousarray(bb2[:, None]))             # (16, 1)

    # SFEB MaxPool(1,10) column-selection matrix over the batch-stacked width.
    sel = np.zeros((SLW, BATCH * POOL_OUT), np.float32)
    for n in range(BATCH):
        for g in range(POOL_OUT):
            sel[n * W2_OUT + SFEB_POOL * g, n * POOL_OUT + g] = 1.0
    packed.append(sel)                                            # (633, 64)

    # Placement of the pooled (16, 32) blocks into the first padded TFEB slab.
    lmat = np.zeros((BATCH, R0, CH[1]), np.float32)
    for n in range(BATCH):
        for c in range(CH[1]):
            lmat[n, n * (CH[1] + 2) + 1 + c, c] = 1.0
    packed.append(lmat)                                           # (2, 36, 16)

    # TFEB 3x3 convs: banded matrices (W padding + BN scale folded in, output
    # columns permuted [even w | odd w] when a (?,2) W-pool follows) plus 0/1
    # row-placement matrices fusing the H-pool with the next-slab placement.
    for li, (idx, H, W, Ci, Co, ph, pw) in enumerate(TFEB_CFG):
        w = npa(params[f"conv{idx}_w"])                           # (Co, Ci, 3, 3)
        s, bb = npa(params[f"bn{idx}_scale"]), npa(params[f"bn{idx}_bias"])
        ws = w * s[:, None, None, None]
        bd = np.zeros((3, W * Ci, W * Co), np.float32)
        for wout in range(W):
            if pw == 2:
                pos = wout // 2 if wout % 2 == 0 else W // 2 + wout // 2
            else:
                pos = wout
            for dh in range(3):
                for dw in range(3):
                    win = wout + dw - 1
                    if 0 <= win < W:
                        for ci in range(Ci):
                            bd[dh, win * Ci + ci,
                               pos * Co:(pos + 1) * Co] = ws[:, ci, dh, dw]
        packed.append(bd)
        packed.append(np.ascontiguousarray(np.tile(bb, W)[None, :]))   # (1, W*Co)

        R = BATCH * (H + 2)
        if li + 1 < N_TFEB:
            Hn = TFEB_CFG[li + 1][1]
            Rn = BATCH * (Hn + 2)
            if ph == 2:
                pe = np.zeros((Rn, R - 2), np.float32)
                po = np.zeros((Rn, R - 2), np.float32)
                for n in range(BATCH):
                    for r in range(Hn):
                        pe[n * (Hn + 2) + 1 + r, n * (H + 2) + 2 * r] = 1.0
                        po[n * (Hn + 2) + 1 + r, n * (H + 2) + 2 * r + 1] = 1.0
                packed.append(pe)
                packed.append(po)
            else:
                p1 = np.zeros((Rn, R - 2), np.float32)
                for n in range(BATCH):
                    for r in range(Hn):
                        p1[n * (Hn + 2) + 1 + r, n * (H + 2) + r] = 1.0
                packed.append(p1)
        else:
            pf = np.zeros((BATCH, R - 2), np.float32)
            for n in range(BATCH):
                pf[n, n * (H + 2)] = 1.0
            packed.append(pf)

    # conv12 (1x1) + bn12.
    w12 = npa(params["conv12_w"])[:, :, 0, 0]                     # (10, 8)
    s12, bb12 = npa(params["bn12_scale"]), npa(params["bn12_bias"])
    packed.append(np.ascontiguousarray((w12 * s12[:, None]).T))   # (8, 10)
    packed.append(np.ascontiguousarray(bb12[None, :]))            # (1, 10)
    # fcn (Linear).
    packed.append(np.ascontiguousarray(npa(params["fcn_w"]).T))   # (10, 10)
    packed.append(np.ascontiguousarray(npa(params["fcn_b"])[None, :]))  # (1, 10)
    assert len(packed) == N_PACKED, len(packed)
    return [jnp.asarray(a) for a in packed]


# ----------------------------------------------------------------------------
# Pure-JAX reference of the same math (for validation only).
# ----------------------------------------------------------------------------
CONV_CFG = {
    1: ((1, 9), (1, STRIDE1), (0, 0)),
    2: ((1, 5), (1, STRIDE2), (0, 0)),
    12: ((1, 1), (1, 1), (0, 0)),
}
for _i in range(3, 12):
    CONV_CFG[_i] = ((3, 3), (1, 1), (1, 1))


def im2col(x, kh, kw, sh, sw, ph, pw):
    N, C, H, W = x.shape
    x = jnp.pad(x, ((0, 0), (0, 0), (ph, ph), (pw, pw)))
    Hp, Wp = H + 2 * ph, W + 2 * pw
    Ho = (Hp - kh) // sh + 1
    Wo = (Wp - kw) // sw + 1
    cols = []
    for i in range(kh):
        for j in range(kw):
            cols.append(x[:, :, i:i + sh * Ho:sh, j:j + sw * Wo:sw])
    patches = jnp.stack(cols, axis=2)
    patches = patches.transpose(0, 3, 4, 1, 2)
    return patches.reshape(N * Ho * Wo, C * kh * kw), Ho, Wo


def conv_bn_relu_ref(x, params, idx):
    (kh, kw), (sh, sw), (ph, pw) = CONV_CFG[idx]
    w = params[f"conv{idx}_w"]
    scale = params[f"bn{idx}_scale"]
    bias = params[f"bn{idx}_bias"]
    N = x.shape[0]
    patches, Ho, Wo = im2col(x, kh, kw, sh, sw, ph, pw)
    OC = w.shape[0]
    wmat = w.reshape(OC, -1).T
    y = jnp.maximum((patches @ wmat) * scale[None, :] + bias[None, :], 0.0)
    return y.reshape(N, Ho, Wo, OC).transpose(0, 3, 1, 2)


def pool2d_ref(x, kh, kw, op):
    N, C, H, W = x.shape
    Ho, Wo = H // kh, W // kw
    xc = x[:, :, :Ho * kh, :Wo * kw].reshape(N, C, Ho, kh, Wo, kw)
    return xc.max(axis=(3, 5)) if op == "max" else xc.mean(axis=(3, 5))


def get_tfeb_pool_size_component(length):
    c, index = [], 1
    while index <= 6:
        if length >= 2:
            if index == 6:
                c.append(length)
            else:
                c.append(2)
                length = length // 2
        else:
            c.append(1)
        index += 1
    return c


def get_tfeb_pool_sizes(con2_ch, width):
    return list(zip(get_tfeb_pool_size_component(con2_ch),
                    get_tfeb_pool_size_component(width)))


def forward_reference(x, params):
    x = conv_bn_relu_ref(x, params, 1)
    x = conv_bn_relu_ref(x, params, 2)
    x = pool2d_ref(x, 1, SFEB_POOL, "max")
    x = jnp.transpose(x, (0, 2, 1, 3))
    pool_sizes = get_tfeb_pool_sizes(CH[1], TFEB_WIDTH)
    p_index = 0
    for i in [3, 4, 6, 8, 10]:
        x = conv_bn_relu_ref(x, params, i)
        if i != 3:
            x = conv_bn_relu_ref(x, params, i + 1)
        h, w = pool_sizes[p_index]
        if h > 1 or w > 1:
            x = pool2d_ref(x, h, w, "max")
        p_index += 1
    x = conv_bn_relu_ref(x, params, 12)
    h, w = pool_sizes[-1]
    if h > 1 or w > 1:
        x = pool2d_ref(x, h, w, "avg")
    x = x.reshape(x.shape[0], -1)
    return x @ params["fcn_w"].T + params["fcn_b"][None, :]


# ----------------------------------------------------------------------------
# Deterministic parameter construction (synthetic, mirrors __init__ shapes).
# ----------------------------------------------------------------------------
def make_params(key):
    conv_defs = {
        1: (1, CH[0], 1, 9), 2: (CH[0], CH[1], 1, 5), 3: (1, CH[2], 3, 3),
        4: (CH[2], CH[3], 3, 3), 5: (CH[3], CH[4], 3, 3), 6: (CH[4], CH[5], 3, 3),
        7: (CH[5], CH[6], 3, 3), 8: (CH[6], CH[7], 3, 3), 9: (CH[7], CH[8], 3, 3),
        10: (CH[8], CH[9], 3, 3), 11: (CH[9], CH[10], 3, 3), 12: (CH[10], CH[11], 1, 1),
    }
    keys = iter(jax.random.split(key, 5 * len(conv_defs) + 2))
    params = {}
    for idx, (ic, oc, kh, kw) in conv_defs.items():
        fan_in = ic * kh * kw
        std = math.sqrt(2.0 / fan_in)
        params[f"conv{idx}_w"] = std * jax.random.normal(
            next(keys), (oc, ic, kh, kw), jnp.float32)
        gamma = 0.5 + jax.random.uniform(next(keys), (oc,), jnp.float32)
        beta = 0.1 * jax.random.normal(next(keys), (oc,), jnp.float32)
        rmean = 0.1 * jax.random.normal(next(keys), (oc,), jnp.float32)
        rvar = 0.5 + jax.random.uniform(next(keys), (oc,), jnp.float32)
        scale = gamma / jnp.sqrt(rvar + 1e-5)
        params[f"bn{idx}_scale"] = scale
        params[f"bn{idx}_bias"] = beta - rmean * scale
    fan_in = CH[11]
    params["fcn_w"] = (1.0 / math.sqrt(fan_in)) * jax.random.normal(
        next(keys), (N_CLASS, CH[11]), jnp.float32)
    bound = 1.0 / math.sqrt(fan_in)
    params["fcn_b"] = jax.random.uniform(
        next(keys), (N_CLASS,), jnp.float32, -bound, bound)
    return params


# ----------------------------------------------------------------------------
if __name__ == "__main__":
    root = jax.random.PRNGKey(0)
    kp, kx = jax.random.split(root)
    params = make_params(kp)
    x = jax.random.normal(kx, (BATCH, 1, 1, INPUT_LENGTH), jnp.float32)

    packed = pack_params(params)
    fwd = jax.jit(forward_pallas)
    y = jax.block_until_ready(fwd(x, packed))

    y_ref = jax.block_until_ready(forward_reference(x, params))

    assert y.shape == (BATCH, N_CLASS), y.shape
    max_diff = float(jnp.max(jnp.abs(y - y_ref)))
    assert jnp.allclose(y, y_ref, rtol=2e-2, atol=2e-2), f"max diff={max_diff}"
    print("KERNEL_OK")
</pallas_src>

<mosaic_0001>
module attributes {stable_mosaic.version = 11 : i64} {
  func.func @acdnet_kernel(%arg0: memref<9x1292xf32, #tpu.memory_space<vmem>>, %arg1: memref<4x9xf32, #tpu.memory_space<vmem>>, %arg2: memref<4x1xf32, #tpu.memory_space<vmem>>, %arg3: memref<16x20xf32, #tpu.memory_space<vmem>>, %arg4: memref<16x1xf32, #tpu.memory_space<vmem>>, %arg5: memref<633x64xf32, #tpu.memory_space<vmem>>, %arg6: memref<2x36x16xf32, #tpu.memory_space<vmem>>, %arg7: memref<3x32x256xf32, #tpu.memory_space<vmem>>, %arg8: memref<1x256xf32, #tpu.memory_space<vmem>>, %arg9: memref<20x34xf32, #tpu.memory_space<vmem>>, %arg10: memref<20x34xf32, #tpu.memory_space<vmem>>, %arg11: memref<3x128x128xf32, #tpu.memory_space<vmem>>, %arg12: memref<1x128xf32, #tpu.memory_space<vmem>>, %arg13: memref<20x18xf32, #tpu.memory_space<vmem>>, %arg14: memref<3x128x128xf32, #tpu.memory_space<vmem>>, %arg15: memref<1x128xf32, #tpu.memory_space<vmem>>, %arg16: memref<12x18xf32, #tpu.memory_space<vmem>>, %arg17: memref<12x18xf32, #tpu.memory_space<vmem>>, %arg18: memref<3x64x64xf32, #tpu.memory_space<vmem>>, %arg19: memref<1x64xf32, #tpu.memory_space<vmem>>, %arg20: memref<12x10xf32, #tpu.memory_space<vmem>>, %arg21: memref<3x64x64xf32, #tpu.memory_space<vmem>>, %arg22: memref<1x64xf32, #tpu.memory_space<vmem>>, %arg23: memref<8x10xf32, #tpu.memory_space<vmem>>, %arg24: memref<8x10xf32, #tpu.memory_space<vmem>>, %arg25: memref<3x32x32xf32, #tpu.memory_space<vmem>>, %arg26: memref<1x32xf32, #tpu.memory_space<vmem>>, %arg27: memref<8x6xf32, #tpu.memory_space<vmem>>, %arg28: memref<3x32x32xf32, #tpu.memory_space<vmem>>, %arg29: memref<1x32xf32, #tpu.memory_space<vmem>>, %arg30: memref<6x6xf32, #tpu.memory_space<vmem>>, %arg31: memref<6x6xf32, #tpu.memory_space<vmem>>, %arg32: memref<3x16x16xf32, #tpu.memory_space<vmem>>, %arg33: memref<1x16xf32, #tpu.memory_space<vmem>>, %arg34: memref<6x4xf32, #tpu.memory_space<vmem>>, %arg35: memref<3x16x16xf32, #tpu.memory_space<vmem>>, %arg36: memref<1x16xf32, #tpu.memory_space<vmem>>, %arg37: memref<2x4xf32, #tpu.memory_space<vmem>>, %arg38: memref<8x10xf32, #tpu.memory_space<vmem>>, %arg39: memref<1x10xf32, #tpu.memory_space<vmem>>, %arg40: memref<10x10xf32, #tpu.memory_space<vmem>>, %arg41: memref<1x10xf32, #tpu.memory_space<vmem>>, %arg42: memref<2x10xf32, #tpu.memory_space<vmem>>, %arg43: memref<20x642xf32, #tpu.memory_space<vmem>>) attributes {dimension_semantics = [], scalar_prefetch = 0 : i64, scratch_operands = 1 : i64, tpu.core_type = #tpu.core_type<tc>} {
    %c0 = arith.constant 0 : index
    %c0_0 = arith.constant 0 : index
    %0 = vector.load %arg1[%c0, %c0_0] : memref<4x9xf32, #tpu.memory_space<vmem>>, vector<4x9xf32>
    %c0_1 = arith.constant 0 : index
    %c0_2 = arith.constant 0 : index
    %1 = vector.load %arg0[%c0_1, %c0_2] : memref<9x1292xf32, #tpu.memory_space<vmem>>, vector<9x1292xf32>
    %cst = arith.constant dense<0.000000e+00> : vector<4x1292xf32>
    %2 = tpu.matmul %0, %1, %cst {dimension_numbers = #tpu.dot_dimension_numbers<[1], [0], [0], [1], [0, 0, 1, 1], [], []>} : vector<4x9xf32>, vector<9x1292xf32>, vector<4x1292xf32> -> vector<4x1292xf32>
    %c0_3 = arith.constant 0 : index
    %c0_4 = arith.constant 0 : index
    %3 = vector.load %arg2[%c0_3, %c0_4] : memref<4x1xf32, #tpu.memory_space<vmem>>, vector<4x1xf32>
    %4 = vector.broadcast %3 : vector<4x1xf32> to vector<4x1292xf32>
    %5 = arith.addf %2, %4 : vector<4x1292xf32>
    %cst_5 = arith.constant 0.000000e+00 : f32
    %6 = vector.broadcast %cst_5 : f32 to vector<4x1292xf32>
    %7 = arith.maximumf %5, %6 : vector<4x1292xf32>
    %8 = vector.extract_strided_slice %7 {offsets = [0, 0], sizes = [4, 321], strides = [1, 1]} : vector<4x1292xf32> to vector<4x321xf32>
    %c0_6 = arith.constant 0 : index
    %c0_7 = arith.constant 0 : index
    %9 = vector.load %arg43[%c0_6, %c0_7] : memref<20x642xf32, #tpu.memory_space<vmem>>, vector<4x321xf32>
    tpu.vector_store %arg43[%c0_6, %c0_7], %8 {strides = array<i32>} : memref<20x642xf32, #tpu.memory_space<vmem>>, vector<4x321xf32>,
    %10 = vector.extract_strided_slice %7 {offsets = [0, 323], sizes = [4, 321], strides = [1, 1]} : vector<4x1292xf32> to vector<4x321xf32>
    %c4 = arith.constant 4 : index
    %c0_8 = arith.constant 0 : index
    %11 = vector.load %arg43[%c4, %c0_8] : memref<20x642xf32, #tpu.memory_space<vmem>>, vector<4x321xf32>
    tpu.vector_store %arg43[%c4, %c0_8], %10 {strides = array<i32>} : memref<20x642xf32, #tpu.memory_space<vmem>>, vector<4x321xf32>,
    %12 = vector.extract_strided_slice %7 {offsets = [0, 1], sizes = [4, 321], strides = [1, 1]} : vector<4x1292xf32> to vector<4x321xf32>
    %c8 = arith.constant 8 : index
    %c0_9 = arith.constant 0 : index
    %13 = vector.load %arg43[%c8, %c0_9] : memref<20x642xf32, #tpu.memory_space<vmem>>, vector<4x321xf32>
    tpu.vector_store %arg43[%c8, %c0_9], %12 {strides = array<i32>} : memref<20x642xf32, #tpu.memory_space<vmem>>, vector<4x321xf32>,
    %14 = vector.extract_strided_slice %7 {offsets = [0, 324], sizes = [4, 321], strides = [1, 1]} : vector<4x1292xf32> to vector<4x321xf32>
    %c12 = arith.constant 12 : index
    %c0_10 = arith.constant 0 : index
    %15 = vector.load %arg43[%c12, %c0_10] : memref<20x642xf32, #tpu.memory_space<vmem>>, vector<4x321xf32>
    tpu.vector_store %arg43[%c12, %c0_10], %14 {strides = array<i32>} : memref<20x642xf32, #tpu.memory_space<vmem>>, vector<4x321xf32>,
    %16 = vector.extract_strided_slice %7 {offsets = [0, 2], sizes = [4, 321], strides = [1, 1]} : vector<4x1292xf32> to vector<4x321xf32>
    %c16 = arith.constant 16 : index
    %c0_11 = arith.constant 0 : index
    %17 = vector.load %arg43[%c16, %c0_11] : memref<20x642xf32, #tpu.memory_space<vmem>>, vector<4x321xf32>
    tpu.vector_store %arg43[%c16, %c0_11], %16 {strides = array<i32>} : memref<20x642xf32, #tpu.memory_space<vmem>>, vector<4x321xf32>,
    %18 = vector.extract_strided_slice %7 {offsets = [0, 646], sizes = [4, 321], strides = [1, 1]} : vector<4x1292xf32> to vector<4x321xf32>
    %c0_12 = arith.constant 0 : index
    %c321 = arith.constant 321 : index
    %19 = vector.load %arg43[%c0_12, %c321] : memref<20x642xf32, #tpu.memory_space<vmem>>, vector<4x321xf32>
    tpu.vector_store %arg43[%c0_12, %c321], %18 {strides = array<i32>} : memref<20x642xf32, #tpu.memory_space<vmem>>, vector<4x321xf32>,
    %20 = vector.extract_strided_slice %7 {offsets = [0, 969], sizes = [4, 321], strides = [1, 1]} : vector<4x1292xf32> to vector<4x321xf32>
    %c4_13 = arith.constant 4 : index
    %c321_14 = arith.constant 321 : index
    %21 = vector.load %arg43[%c4_13, %c321_14] : memref<20x642xf32, #tpu.memory_space<vmem>>, vector<4x321xf32>
    tpu.vector_store %arg43[%c4_13, %c321_14], %20 {strides = array<i32>} : memref<20x642xf32, #tpu.memory_space<vmem>>, vector<4x321xf32>,
    %22 = vector.extract_strided_slice %7 {offsets = [0, 647], sizes = [4, 321], strides = [1, 1]} : vector<4x1292xf32> to vector<4x321xf32>
    %c8_15 = arith.constant 8 : index
    %c321_16 = arith.constant 321 : index
    %23 = vector.load %arg43[%c8_15, %c321_16] : memref<20x642xf32, #tpu.memory_space<vmem>>, vector<4x321xf32>
    tpu.vector_store %arg43[%c8_15, %c321_16], %22 {strides = array<i32>} : memref<20x642xf32, #tpu.memory_space<vmem>>, vector<4x321xf32>,
    %24 = vector.extract_strided_slice %7 {offsets = [0, 970], sizes = [4, 321], strides = [1, 1]} : vector<4x1292xf32> to vector<4x321xf32>
    %c12_17 = arith.constant 12 : index
    %c321_18 = arith.constant 321 : index
    %25 = vector.load %arg43[%c12_17, %c321_18] : memref<20x642xf32, #tpu.memory_space<vmem>>, vector<4x321xf32>
    tpu.vector_store %arg43[%c12_17, %c321_18], %24 {strides = array<i32>} : memref<20x642xf32, #tpu.memory_space<vmem>>, vector<4x321xf32>,
    %26 = vector.extract_strided_slice %7 {offsets = [0, 648], sizes = [4, 321], strides = [1, 1]} : vector<4x1292xf32> to vector<4x321xf32>
    %c16_19 = arith.constant 16 : index
    %c321_20 = arith.constant 321 : index
    %27 = vector.load %arg43[%c16_19, %c321_20] : memref<20x642xf32, #tpu.memory_space<vmem>>, vector<4x321xf32>
    tpu.vector_store %arg43[%c16_19, %c321_20], %26 {strides = array<i32>} : memref<20x642xf32, #tpu.memory_space<vmem>>, vector<4x321xf32>,
    %c0_21 = arith.constant 0 : index
    %c0_22 = arith.constant 0 : index
    %28 = vector.load %arg3[%c0_21, %c0_22] : memref<16x20xf32, #tpu.memory_space<vmem>>, vector<16x20xf32>
    %c0_23 = arith.constant 0 : index
    %c0_24 = arith.constant 0 : index
    %29 = vector.load %arg43[%c0_23, %c0_24] : memref<20x642xf32, #tpu.memory_space<vmem>>, vector<20x642xf32>
    %cst_25 = arith.constant dense<0.000000e+00> : vector<16x642xf32>
    %30 = tpu.matmul %28, %29, %cst_25 {dimension_numbers = #tpu.dot_dimension_numbers<[1], [0], [0], [1], [0, 0, 1, 1], [], []>} : vector<16x20xf32>, vector<20x642xf32>, vector<16x642xf32> -> vector<16x642xf32>
    %c0_26 = arith.constant 0 : index
    %c0_27 = arith.constant 0 : index
    %31 = vector.load %arg4[%c0_26, %c0_27] : memref<16x1xf32, #tpu.memory_space<vmem>>, vector<16x1xf32>
    %32 = vector.broadcast %31 : vector<16x1xf32> to vector<16x642xf32>
    %33 = arith.addf %30, %32 : vector<16x642xf32>
    %cst_28 = arith.constant 0.000000e+00 : f32
    %34 = vector.broadcast %cst_28 : f32 to vector<16x642xf32>
    %35 = arith.maximumf %33, %34 : vector<16x642xf32>
    %36 = vector.extract_strided_slice %35 {offsets = [0, 0], sizes = [16, 641], strides = [1, 1]} : vector<16x642xf32> to vector<16x641xf32>
    %37 = vector.extract_strided_slice %35 {offsets = [0, 1], sizes = [16, 641], strides = [1, 1]} : vector<16x642xf32> to vector<16x641xf32>
    %38 = arith.maximumf %36, %37 : vector<16x641xf32>
    %39 = vector.extract_strided_slice %38 {offsets = [0, 0], sizes = [16, 639], strides = [1, 1]} : vector<16x641xf32> to vector<16x639xf32>
    %40 = vector.extract_strided_slice %38 {offsets = [0, 2], sizes = [16, 639], strides = [1, 1]} : vector<16x641xf32> to vector<16x639xf32>
    %41 = arith.maximumf %39, %40 : vector<16x639xf32>
    %42 = vector.extract_strided_slice %41 {offsets = [0, 0], sizes = [16, 635], strides = [1, 1]} : vector<16x639xf32> to vector<16x635xf32>
    %43 = vector.extract_strided_slice %41 {offsets = [0, 4], sizes = [16, 635], strides = [1, 1]} : vector<16x639xf32> to vector<16x635xf32>
    %44 = arith.maximumf %42, %43 : vector<16x635xf32>
    %45 = vector.extract_strided_slice %44 {offsets = [0, 0], sizes = [16, 633], strides = [1, 1]} : vector<16x635xf32> to vector<16x633xf32>
    %46 = vector.extract_strided_slice %38 {offsets = [0, 8], sizes = [16, 633], strides = [1, 1]} : vector<16x641xf32> to vector<16x633xf32>
    %47 = arith.maximumf %45, %46 : vector<16x633xf32>
    %c0_29 = arith.constant 0 : index
    %c0_30 = arith.constant 0 : index
    %48 = vector.load %arg5[%c0_29, %c0_30] : memref<633x64xf32, #tpu.memory_space<vmem>>, vector<633x64xf32>
    %cst_31 = arith.constant dense<0.000000e+00> : vector<16x64xf32>
    %49 = tpu.matmul %47, %48, %cst_31 {dimension_numbers = #tpu.dot_dimension_numbers<[1], [0], [0], [1], [0, 0, 1, 1], [], []>} : vector<16x633xf32>, vector<633x64xf32>, vector<16x64xf32> -> vector<16x64xf32>
    %c0_32 = arith.constant 0 : index
    %c0_33 = arith.constant 0 : index
    %c0_34 = arith.constant 0 : index
    %50 = vector.load %arg6[%c0_32, %c0_33, %c0_34] : memref<2x36x16xf32, #tpu.memory_space<vmem>>, vector<1x36x16xf32>
    %51 = vector.shape_cast %50 : vector<1x36x16xf32> to vector<36x16xf32>
    %52 = vector.extract_strided_slice %49 {offsets = [0, 0], sizes = [16, 32], strides = [1, 1]} : vector<16x64xf32> to vector<16x32xf32>
    %cst_35 = arith.constant dense<0.000000e+00> : vector<36x32xf32>
    %53 = tpu.matmul %51, %52, %cst_35 {dimension_numbers = #tpu.dot_dimension_numbers<[1], [0], [0], [1], [0, 0, 1, 1], [], []>} : vector<36x16xf32>, vector<16x32xf32>, vector<36x32xf32> -> vector<36x32xf32>
    %c1 = arith.constant 1 : index
    %c0_36 = arith.constant 0 : index
    %c0_37 = arith.constant 0 : index
    %54 = vector.load %arg6[%c1, %c0_36, %c0_37] : memref<2x36x16xf32, #tpu.memory_space<vmem>>, vector<1x36x16xf32>
    %55 = vector.shape_cast %54 : vector<1x36x16xf32> to vector<36x16xf32>
    %56 = vector.extract_strided_slice %49 {offsets = [0, 32], sizes = [16, 32], strides = [1, 1]} : vector<16x64xf32> to vector<16x32xf32>
    %cst_38 = arith.constant dense<0.000000e+00> : vector<36x32xf32>
    %57 = tpu.matmul %55, %56, %cst_38 {dimension_numbers = #tpu.dot_dimension_numbers<[1], [0], [0], [1], [0, 0, 1, 1], [], []>} : vector<36x16xf32>, vector<16x32xf32>, vector<36x32xf32> -> vector<36x32xf32>
    %58 = arith.addf %53, %57 : vector<36x32xf32>
    %59 = vector.extract_strided_slice %58 {offsets = [0, 0], sizes = [34, 32], strides = [1, 1]} : vector<36x32xf32> to vector<34x32xf32>
    %c0_39 = arith.constant 0 : index
    %c0_40 = arith.constant 0 : index
    %c0_41 = arith.constant 0 : index
    %60 = vector.load %arg7[%c0_39, %c0_40, %c0_41] : memref<3x32x256xf32, #tpu.memory_space<vmem>>, vector<1x32x256xf32>
    %61 = vector.shape_cast %60 : vector<1x32x256xf32> to vector<32x256xf32>
    %cst_42 = arith.constant dense<0.000000e+00> : vector<34x256xf32>
    %62 = tpu.matmul %59, %61, %cst_42 {dimension_numbers = #tpu.dot_dimension_numbers<[1], [0], [0], [1], [0, 0, 1, 1], [], []>} : vector<34x32xf32>, vector<32x256xf32>, vector<34x256xf32> -> vector<34x256xf32>
    %63 = vector.extract_strided_slice %58 {offsets = [1, 0], sizes = [34, 32], strides = [1, 1]} : vector<36x32xf32> to vector<34x32xf32>
    %c1_43 = arith.constant 1 : index
    %c0_44 = arith.constant 0 : index
    %c0_45 = arith.constant 0 : index
    %64 = vector.load %arg7[%c1_43, %c0_44, %c0_45] : memref<3x32x256xf32, #tpu.memory_space<vmem>>, vector<1x32x256xf32>
    %65 = vector.shape_cast %64 : vector<1x32x256xf32> to vector<32x256xf32>
    %cst_46 = arith.constant dense<0.000000e+00> : vector<34x256xf32>
    %66 = tpu.matmul %63, %65, %cst_46 {dimension_numbers = #tpu.dot_dimension_numbers<[1], [0], [0], [1], [0, 0, 1, 1], [], []>} : vector<34x32xf32>, vector<32x256xf32>, vector<34x256xf32> -> vector<34x256xf32>
    %67 = arith.addf %62, %66 : vector<34x256xf32>
    %68 = vector.extract_strided_slice %58 {offsets = [2, 0], sizes = [34, 32], strides = [1, 1]} : vector<36x32xf32> to vector<34x32xf32>
    %c2 = arith.constant 2 : index
    %c0_47 = arith.constant 0 : index
    %c0_48 = arith.constant 0 : index
    %69 = vector.load %arg7[%c2, %c0_47, %c0_48] : memref<3x32x256xf32, #tpu.memory_space<vmem>>, vector<1x32x256xf32>
    %70 = vector.shape_cast %69 : vector<1x32x256xf32> to vector<32x256xf32>
    %cst_49 = arith.constant dense<0.000000e+00> : vector<34x256xf32>
    %71 = tpu.matmul %68, %70, %cst_49 {dimension_numbers = #tpu.dot_dimension_numbers<[1], [0], [0], [1], [0, 0, 1, 1], [], []>} : vector<34x32xf32>, vector<32x256xf32>, vector<34x256xf32> -> vector<34x256xf32>
    %72 = arith.addf %67, %71 : vector<34x256xf32>
    %c0_50 = arith.constant 0 : index
    %c0_51 = arith.constant 0 : index
    %73 = vector.load %arg8[%c0_50, %c0_51] : memref<1x256xf32, #tpu.memory_space<vmem>>, vector<1x256xf32>
    %74 = vector.broadcast %73 : vector<1x256xf32> to vector<34x256xf32>
    %75 = arith.addf %72, %74 : vector<34x256xf32>
    %cst_52 = arith.constant 0.000000e+00 : f32
    %76 = vector.broadcast %cst_52 : f32 to vector<34x256xf32>
    %77 = arith.maximumf %75, %76 : vector<34x256xf32>
    %78 = vector.extract_strided_slice %77 {offsets = [0, 0], sizes = [34, 128], strides = [1, 1]} : vector<34x256xf32> to vector<34x128xf32>
    %79 = vector.extract_strided_slice %77 {offsets = [0, 128], sizes = [34, 128], strides = [1, 1]} : vector<34x256xf32> to vector<34x128xf32>
    %80 = arith.maximumf %78, %79 : vector<34x128xf32>
    %c0_53 = arith.constant 0 : index
    %c0_54 = arith.constant 0 : index
    %81 = vector.load %arg9[%c0_53, %c0_54] : memref<20x34xf32, #tpu.memory_space<vmem>>, vector<20x34xf32>
    %cst_55 = arith.constant dense<0.000000e+00> : vector<20x128xf32>
    %82 = tpu.matmul %81, %80, %cst_55 {dimension_numbers = #tpu.dot_dimension_numbers<[1], [0], [0], [1], [0, 0, 1, 1], [], []>} : vector<20x34xf32>, vector<34x128xf32>, vector<20x128xf32> -> vector<20x128xf32>
    %c0_56 = arith.constant 0 : index
    %c0_57 = arith.constant 0 : index
    %83 = vector.load %arg10[%c0_56, %c0_57] : memref<20x34xf32, #tpu.memory_space<vmem>>, vector<20x34xf32>
    %cst_58 = arith.constant dense<0.000000e+00> : vector<20x128xf32>
    %84 = tpu.matmul %83, %80, %cst_58 {dimension_numbers = #tpu.dot_dimension_numbers<[1], [0], [0], [1], [0, 0, 1, 1], [], []>} : vector<20x34xf32>, vector<34x128xf32>, vector<20x128xf32> -> vector<20x128xf32>
    %85 = arith.maximumf %82, %84 : vector<20x128xf32>
    %86 = vector.extract_strided_slice %85 {offsets = [0, 0], sizes = [18, 128], strides = [1, 1]} : vector<20x128xf32> to vector<18x128xf32>
    %c0_59 = arith.constant 0 : index
    %c0_60 = arith.constant 0 : index
    %c0_61 = arith.constant 0 : index
    %87 = vector.load %arg11[%c0_59, %c0_60, %c0_61] : memref<3x128x128xf32, #tpu.memory_space<vmem>>, vector<1x128x128xf32>
    %88 = vector.shape_cast %87 : vector<1x128x128xf32> to vector<128x128xf32>
    %cst_62 = arith.constant dense<0.000000e+00> : vector<18x128xf32>
    %89 = tpu.matmul %86, %88, %cst_62 {dimension_numbers = #tpu.dot_dimension_numbers<[1], [0], [0], [1], [0, 0, 1, 1], [], []>} : vector<18x128xf32>, vector<128x128xf32>, vector<18x128xf32> -> vector<18x128xf32>
    %90 = vector.extract_strided_slice %85 {offsets = [1, 0], sizes = [18, 128], strides = [1, 1]} : vector<20x128xf32> to vector<18x128xf32>
    %c1_63 = arith.constant 1 : index
    %c0_64 = arith.constant 0 : index
    %c0_65 = arith.constant 0 : index
    %91 = vector.load %arg11[%c1_63, %c0_64, %c0_65] : memref<3x128x128xf32, #tpu.memory_space<vmem>>, vector<1x128x128xf32>
    %92 = vector.shape_cast %91 : vector<1x128x128xf32> to vector<128x128xf32>
    %cst_66 = arith.constant dense<0.000000e+00> : vector<18x128xf32>
    %93 = tpu.matmul %90, %92, %cst_66 {dimension_numbers = #tpu.dot_dimension_numbers<[1], [0], [0], [1], [0, 0, 1, 1], [], []>} : vector<18x128xf32>, vector<128x128xf32>, vector<18x128xf32> -> vector<18x128xf32>
    %94 = arith.addf %89, %93 : vector<18x128xf32>
    %95 = vector.extract_strided_slice %85 {offsets = [2, 0], sizes = [18, 128], strides = [1, 1]} : vector<20x128xf32> to vector<18x128xf32>
    %c2_67 = arith.constant 2 : index
    %c0_68 = arith.constant 0 : index
    %c0_69 = arith.constant 0 : index
    %96 = vector.load %arg11[%c2_67, %c0_68, %c0_69] : memref<3x128x128xf32, #tpu.memory_space<vmem>>, vector<1x128x128xf32>
    %97 = vector.shape_cast %96 : vector<1x128x128xf32> to vector<128x128xf32>
    %cst_70 = arith.constant dense<0.000000e+00> : vector<18x128xf32>
    %98 = tpu.matmul %95, %97, %cst_70 {dimension_numbers = #tpu.dot_dimension_numbers<[1], [0], [0], [1], [0, 0, 1, 1], [], []>} : vector<18x128xf32>, vector<128x128xf32>, vector<18x128xf32> -> vector<18x128xf32>
    %99 = arith.addf %94, %98 : vector<18x128xf32>
    %c0_71 = arith.constant 0 : index
    %c0_72 = arith.constant 0 : index
    %100 = vector.load %arg12[%c0_71, %c0_72] : memref<1x128xf32, #tpu.memory_space<vmem>>, vector<1x128xf32>
    %101 = vector.broadcast %100 : vector<1x128xf32> to vector<18x128xf32>
    %102 = arith.addf %99, %101 : vector<18x128xf32>
    %cst_73 = arith.constant 0.000000e+00 : f32
    %103 = vector.broadcast %cst_73 : f32 to vector<18x128xf32>
    %104 = arith.maximumf %102, %103 : vector<18x128xf32>
    %c0_74 = arith.constant 0 : index
    %c0_75 = arith.constant 0 : index
    %105 = vector.load %arg13[%c0_74, %c0_75] : memref<20x18xf32, #tpu.memory_space<vmem>>, vector<20x18xf32>
    %cst_76 = arith.constant dense<0.000000e+00> : vector<20x128xf32>
    %106 = tpu.matmul %105, %104, %cst_76 {dimension_numbers = #tpu.dot_dimension_numbers<[1], [0], [0], [1], [0, 0, 1, 1], [], []>} : vector<20x18xf32>, vector<18x128xf32>, vector<20x128xf32> -> vector<20x128xf32>
    %107 = vector.extract_strided_slice %106 {offsets = [0, 0], sizes = [18, 128], strides = [1, 1]} : vector<20x128xf32> to vector<18x128xf32>
    %c0_77 = arith.constant 0 : index
    %c0_78 = arith.constant 0 : index
    %c0_79 = arith.constant 0 : index
    %108 = vector.load %arg14[%c0_77, %c0_78, %c0_79] : memref<3x128x128xf32, #tpu.memory_space<vmem>>, vector<1x128x128xf32>
    %109 = vector.shape_cast %108 : vector<1x128x128xf32> to vector<128x128xf32>
    %cst_80 = arith.constant dense<0.000000e+00> : vector<18x128xf32>
    %110 = tpu.matmul %107, %109, %cst_80 {dimension_numbers = #tpu.dot_dimension_numbers<[1], [0], [0], [1], [0, 0, 1, 1], [], []>} : vector<18x128xf32>, vector<128x128xf32>, vector<18x128xf32> -> vector<18x128xf32>
    %111 = vector.extract_strided_slice %106 {offsets = [1, 0], sizes = [18, 128], strides = [1, 1]} : vector<20x128xf32> to vector<18x128xf32>
    %c1_81 = arith.constant 1 : index
    %c0_82 = arith.constant 0 : index
    %c0_83 = arith.constant 0 : index
    %112 = vector.load %arg14[%c1_81, %c0_82, %c0_83] : memref<3x128x128xf32, #tpu.memory_space<vmem>>, vector<1x128x128xf32>
    %113 = vector.shape_cast %112 : vector<1x128x128xf32> to vector<128x128xf32>
    %cst_84 = arith.constant dense<0.000000e+00> : vector<18x128xf32>
    %114 = tpu.matmul %111, %113, %cst_84 {dimension_numbers = #tpu.dot_dimension_numbers<[1], [0], [0], [1], [0, 0, 1, 1], [], []>} : vector<18x128xf32>, vector<128x128xf32>, vector<18x128xf32> -> vector<18x128xf32>
    %115 = arith.addf %110, %114 : vector<18x128xf32>
    %116 = vector.extract_strided_slice %106 {offsets = [2, 0], sizes = [18, 128], strides = [1, 1]} : vector<20x128xf32> to vector<18x128xf32>
    %c2_85 = arith.constant 2 : index
    %c0_86 = arith.constant 0 : index
    %c0_87 = arith.constant 0 : index
    %117 = vector.load %arg14[%c2_85, %c0_86, %c0_87] : memref<3x128x128xf32, #tpu.memory_space<vmem>>, vector<1x128x128xf32>
    %118 = vector.shape_cast %117 : vector<1x128x128xf32> to vector<128x128xf32>
    %cst_88 = arith.constant dense<0.000000e+00> : vector<18x128xf32>
    %119 = tpu.matmul %116, %118, %cst_88 {dimension_numbers = #tpu.dot_dimension_numbers<[1], [0], [0], [1], [0, 0, 1, 1], [], []>} : vector<18x128xf32>, vector<128x128xf32>, vector<18x128xf32> -> vector<18x128xf32>
    %120 = arith.addf %115, %119 : vector<18x128xf32>
    %c0_89 = arith.constant 0 : index
    %c0_90 = arith.constant 0 : index
    %121 = vector.load %arg15[%c0_89, %c0_90] : memref<1x128xf32, #tpu.memory_space<vmem>>, vector<1x128xf32>
    %122 = vector.broadcast %121 : vector<1x128xf32> to vector<18x128xf32>
    %123 = arith.addf %120, %122 : vector<18x128xf32>
    %cst_91 = arith.constant 0.000000e+00 : f32
    %124 = vector.broadcast %cst_91 : f32 to vector<18x128xf32>
    %125 = arith.maximumf %123, %124 : vector<18x128xf32>
    %126 = vector.extract_strided_slice %125 {offsets = [0, 0], sizes = [18, 64], strides = [1, 1]} : vector<18x128xf32> to vector<18x64xf32>
    %127 = vector.extract_strided_slice %125 {offsets = [0, 64], sizes = [18, 64], strides = [1, 1]} : vector<18x128xf32> to vector<18x64xf32>
    %128 = arith.maximumf %126, %127 : vector<18x64xf32>
    %c0_92 = arith.constant 0 : index
    %c0_93 = arith.constant 0 : index
    %129 = vector.load %arg16[%c0_92, %c0_93] : memref<12x18xf32, #tpu.memory_space<vmem>>, vector<12x18xf32>
    %cst_94 = arith.constant dense<0.000000e+00> : vector<12x64xf32>
    %130 = tpu.matmul %129, %128, %cst_94 {dimension_numbers = #tpu.dot_dimension_numbers<[1], [0], [0], [1], [0, 0, 1, 1], [], []>} : vector<12x18xf32>, vector<18x64xf32>, vector<12x64xf32> -> vector<12x64xf32>
    %c0_95 = arith.constant 0 : index
    %c0_96 = arith.constant 0 : index
    %131 = vector.load %arg17[%c0_95, %c0_96] : memref<12x18xf32, #tpu.memory_space<vmem>>, vector<12x18xf32>
    %cst_97 = arith.constant dense<0.000000e+00> : vector<12x64xf32>
    %132 = tpu.matmul %131, %128, %cst_97 {dimension_numbers = #tpu.dot_dimension_numbers<[1], [0], [0], [1], [0, 0, 1, 1], [], []>} : vector<12x18xf32>, vector<18x64xf32>, vector<12x64xf32> -> vector<12x64xf32>
    %133 = arith.maximumf %130, %132 : vector<12x64xf32>
    %134 = vector.extract_strided_slice %133 {offsets = [0, 0], sizes = [10, 64], strides = [1, 1]} : vector<12x64xf32> to vector<10x64xf32>
    %c0_98 = arith.constant 0 : index
    %c0_99 = arith.constant 0 : index
    %c0_100 = arith.constant 0 : index
    %135 = vector.load %arg18[%c0_98, %c0_99, %c0_100] : memref<3x64x64xf32, #tpu.memory_space<vmem>>, vector<1x64x64xf32>
    %136 = vector.shape_cast %135 : vector<1x64x64xf32> to vector<64x64xf32>
    %cst_101 = arith.constant dense<0.000000e+00> : vector<10x64xf32>
    %137 = tpu.matmul %134, %136, %cst_101 {dimension_numbers = #tpu.dot_dimension_numbers<[1], [0], [0], [1], [0, 0, 1, 1], [], []>} : vector<10x64xf32>, vector<64x64xf32>, vector<10x64xf32> -> vector<10x64xf32>
    %138 = vector.extract_strided_slice %133 {offsets = [1, 0], sizes = [10, 64], strides = [1, 1]} : vector<12x64xf32> to vector<10x64xf32>
    %c1_102 = arith.constant 1 : index
    %c0_103 = arith.constant 0 : index
    %c0_104 = arith.constant 0 : index
    %139 = vector.load %arg18[%c1_102, %c0_103, %c0_104] : memref<3x64x64xf32, #tpu.memory_space<vmem>>, vector<1x64x64xf32>
    %140 = vector.shape_cast %139 : vector<1x64x64xf32> to vector<64x64xf32>
    %cst_105 = arith.constant dense<0.000000e+00> : vector<10x64xf32>
    %141 = tpu.matmul %138, %140, %cst_105 {dimension_numbers = #tpu.dot_dimension_numbers<[1], [0], [0], [1], [0, 0, 1, 1], [], []>} : vector<10x64xf32>, vector<64x64xf32>, vector<10x64xf32> -> vector<10x64xf32>
    %142 = arith.addf %137, %141 : vector<10x64xf32>
    %143 = vector.extract_strided_slice %133 {offsets = [2, 0], sizes = [10, 64], strides = [1, 1]} : vector<12x64xf32> to vector<10x64xf32>
    %c2_106 = arith.constant 2 : index
    %c0_107 = arith.constant 0 : index
    %c0_108 = arith.constant 0 : index
    %144 = vector.load %arg18[%c2_106, %c0_107, %c0_108] : memref<3x64x64xf32, #tpu.memory_space<vmem>>, vector<1x64x64xf32>
    %145 = vector.shape_cast %144 : vector<1x64x64xf32> to vector<64x64xf32>
    %cst_109 = arith.constant dense<0.000000e+00> : vector<10x64xf32>
    %146 = tpu.matmul %143, %145, %cst_109 {dimension_numbers = #tpu.dot_dimension_numbers<[1], [0], [0], [1], [0, 0, 1, 1], [], []>} : vector<10x64xf32>, vector<64x64xf32>, vector<10x64xf32> -> vector<10x64xf32>
    %147 = arith.addf %142, %146 : vector<10x64xf32>
    %c0_110 = arith.constant 0 : index
    %c0_111 = arith.constant 0 : index
    %148 = vector.load %arg19[%c0_110, %c0_111] : memref<1x64xf32, #tpu.memory_space<vmem>>, vector<1x64xf32>
    %149 = vector.broadcast %148 : vector<1x64xf32> to vector<10x64xf32>
    %150 = arith.addf %147, %149 : vector<10x64xf32>
    %cst_112 = arith.constant 0.000000e+00 : f32
    %151 = vector.broadcast %cst_112 : f32 to vector<10x64xf32>
    %152 = arith.maximumf %150, %151 : vector<10x64xf32>
    %c0_113 = arith.constant 0 : index
    %c0_114 = arith.constant 0 : index
    %153 = vector.load %arg20[%c0_113, %c0_114] : memref<12x10xf32, #tpu.memory_space<vmem>>, vector<12x10xf32>
    %cst_115 = arith.constant dense<0.000000e+00> : vector<12x64xf32>
    %154 = tpu.matmul %153, %152, %cst_115 {dimension_numbers = #tpu.dot_dimension_numbers<[1], [0], [0], [1], [0, 0, 1, 1], [], []>} : vector<12x10xf32>, vector<10x64xf32>, vector<12x64xf32> -> vector<12x64xf32>
    %155 = vector.extract_strided_slice %154 {offsets = [0, 0], sizes = [10, 64], strides = [1, 1]} : vector<12x64xf32> to vector<10x64xf32>
    %c0_116 = arith.constant 0 : index
    %c0_117 = arith.constant 0 : index
    %c0_118 = arith.constant 0 : index
    %156 = vector.load %arg21[%c0_116, %c0_117, %c0_118] : memref<3x64x64xf32, #tpu.memory_space<vmem>>, vector<1x64x64xf32>
    %157 = vector.shape_cast %156 : vector<1x64x64xf32> to vector<64x64xf32>
    %cst_119 = arith.constant dense<0.000000e+00> : vector<10x64xf32>
    %158 = tpu.matmul %155, %157, %cst_119 {dimension_numbers = #tpu.dot_dimension_numbers<[1], [0], [0], [1], [0, 0, 1, 1], [], []>} : vector<10x64xf32>, vector<64x64xf32>, vector<10x64xf32> -> vector<10x64xf32>
    %159 = vector.extract_strided_slice %154 {offsets = [1, 0], sizes = [10, 64], strides = [1, 1]} : vector<12x64xf32> to vector<10x64xf32>
    %c1_120 = arith.constant 1 : index
    %c0_121 = arith.constant 0 : index
    %c0_122 = arith.constant 0 : index
    %160 = vector.load %arg21[%c1_120, %c0_121, %c0_122] : memref<3x64x64xf32, #tpu.memory_space<vmem>>, vector<1x64x64xf32>
    %161 = vector.shape_cast %160 : vector<1x64x64xf32> to vector<64x64xf32>
    %cst_123 = arith.constant dense<0.000000e+00> : vector<10x64xf32>
    %162 = tpu.matmul %159, %161, %cst_123 {dimension_numbers = #tpu.dot_dimension_numbers<[1], [0], [0], [1], [0, 0, 1, 1], [], []>} : vector<10x64xf32>, vector<64x64xf32>, vector<10x64xf32> -> vector<10x64xf32>
    %163 = arith.addf %158, %162 : vector<10x64xf32>
    %164 = vector.extract_strided_slice %154 {offsets = [2, 0], sizes = [10, 64], strides = [1, 1]} : vector<12x64xf32> to vector<10x64xf32>
    %c2_124 = arith.constant 2 : index
    %c0_125 = arith.constant 0 : index
    %c0_126 = arith.constant 0 : index
    %165 = vector.load %arg21[%c2_124, %c0_125, %c0_126] : memref<3x64x64xf32, #tpu.memory_space<vmem>>, vector<1x64x64xf32>
    %166 = vector.shape_cast %165 : vector<1x64x64xf32> to vector<64x64xf32>
    %cst_127 = arith.constant dense<0.000000e+00> : vector<10x64xf32>
    %167 = tpu.matmul %164, %166, %cst_127 {dimension_numbers = #tpu.dot_dimension_numbers<[1], [0], [0], [1], [0, 0, 1, 1], [], []>} : vector<10x64xf32>, vector<64x64xf32>, vector<10x64xf32> -> vector<10x64xf32>
    %168 = arith.addf %163, %167 : vector<10x64xf32>
    %c0_128 = arith.constant 0 : index
    %c0_129 = arith.constant 0 : index
    %169 = vector.load %arg22[%c0_128, %c0_129] : memref<1x64xf32, #tpu.memory_space<vmem>>, vector<1x64xf32>
    %170 = vector.broadcast %169 : vector<1x64xf32> to vector<10x64xf32>
    %171 = arith.addf %168, %170 : vector<10x64xf32>
    %cst_130 = arith.constant 0.000000e+00 : f32
    %172 = vector.broadcast %cst_130 : f32 to vector<10x64xf32>
    %173 = arith.maximumf %171, %172 : vector<10x64xf32>
    %174 = vector.extract_strided_slice %173 {offsets = [0, 0], sizes = [10, 32], strides = [1, 1]} : vector<10x64xf32> to vector<10x32xf32>
    %175 = vector.extract_strided_slice %173 {offsets = [0, 32], sizes = [10, 32], strides = [1, 1]} : vector<10x64xf32> to vector<10x32xf32>
    %176 = arith.maximumf %174, %175 : vector<10x32xf32>
    %c0_131 = arith.constant 0 : index
    %c0_132 = arith.constant 0 : index
    %177 = vector.load %arg23[%c0_131, %c0_132] : memref<8x10xf32, #tpu.memory_space<vmem>>, vector<8x10xf32>
    %cst_133 = arith.constant dense<0.000000e+00> : vector<8x32xf32>
    %178 = tpu.matmul %177, %176, %cst_133 {dimension_numbers = #tpu.dot_dimension_numbers<[1], [0], [0], [1], [0, 0, 1, 1], [], []>} : vector<8x10xf32>, vector<10x32xf32>, vector<8x32xf32> -> vector<8x32xf32>
    %c0_134 = arith.constant 0 : index
    %c0_135 = arith.constant 0 : index
    %179 = vector.load %arg24[%c0_134, %c0_135] : memref<8x10xf32, #tpu.memory_space<vmem>>, vector<8x10xf32>
    %cst_136 = arith.constant dense<0.000000e+00> : vector<8x32xf32>
    %180 = tpu.matmul %179, %176, %cst_136 {dimension_numbers = #tpu.dot_dimension_numbers<[1], [0], [0], [1], [0, 0, 1, 1], [], []>} : vector<8x10xf32>, vector<10x32xf32>, vector<8x32xf32> -> vector<8x32xf32>
    %181 = arith.maximumf %178, %180 : vector<8x32xf32>
    %182 = vector.extract_strided_slice %181 {offsets = [0, 0], sizes = [6, 32], strides = [1, 1]} : vector<8x32xf32> to vector<6x32xf32>
    %c0_137 = arith.constant 0 : index
    %c0_138 = arith.constant 0 : index
    %c0_139 = arith.constant 0 : index
    %183 = vector.load %arg25[%c0_137, %c0_138, %c0_139] : memref<3x32x32xf32, #tpu.memory_space<vmem>>, vector<1x32x32xf32>
    %184 = vector.shape_cast %183 : vector<1x32x32xf32> to vector<32x32xf32>
    %cst_140 = arith.constant dense<0.000000e+00> : vector<6x32xf32>
    %185 = tpu.matmul %182, %184, %cst_140 {dimension_numbers = #tpu.dot_dimension_numbers<[1], [0], [0], [1], [0, 0, 1, 1], [], []>} : vector<6x32xf32>, vector<32x32xf32>, vector<6x32xf32> -> vector<6x32xf32>
    %186 = vector.extract_strided_slice %181 {offsets = [1, 0], sizes = [6, 32], strides = [1, 1]} : vector<8x32xf32> to vector<6x32xf32>
    %c1_141 = arith.constant 1 : index
    %c0_142 = arith.constant 0 : index
    %c0_143 = arith.constant 0 : index
    %187 = vector.load %arg25[%c1_141, %c0_142, %c0_143] : memref<3x32x32xf32, #tpu.memory_space<vmem>>, vector<1x32x32xf32>
    %188 = vector.shape_cast %187 : vector<1x32x32xf32> to vector<32x32xf32>
    %cst_144 = arith.constant dense<0.000000e+00> : vector<6x32xf32>
    %189 = tpu.matmul %186, %188, %cst_144 {dimension_numbers = #tpu.dot_dimension_numbers<[1], [0], [0], [1], [0, 0, 1, 1], [], []>} : vector<6x32xf32>, vector<32x32xf32>, vector<6x32xf32> -> vector<6x32xf32>
    %190 = arith.addf %185, %189 : vector<6x32xf32>
    %191 = vector.extract_strided_slice %181 {offsets = [2, 0], sizes = [6, 32], strides = [1, 1]} : vector<8x32xf32> to vector<6x32xf32>
    %c2_145 = arith.constant 2 : index
    %c0_146 = arith.constant 0 : index
    %c0_147 = arith.constant 0 : index
    %192 = vector.load %arg25[%c2_145, %c0_146, %c0_147] : memref<3x32x32xf32, #tpu.memory_space<vmem>>, vector<1x32x32xf32>
    %193 = vector.shape_cast %192 : vector<1x32x32xf32> to vector<32x32xf32>
    %cst_148 = arith.constant dense<0.000000e+00> : vector<6x32xf32>
    %194 = tpu.matmul %191, %193, %cst_148 {dimension_numbers = #tpu.dot_dimension_numbers<[1], [0], [0], [1], [0, 0, 1, 1], [], []>} : vector<6x32xf32>, vector<32x32xf32>, vector<6x32xf32> -> vector<6x32xf32>
    %195 = arith.addf %190, %194 : vector<6x32xf32>
    %c0_149 = arith.constant 0 : index
    %c0_150 = arith.constant 0 : index
    %196 = vector.load %arg26[%c0_149, %c0_150] : memref<1x32xf32, #tpu.memory_space<vmem>>, vector<1x32xf32>
    %197 = vector.broadcast %196 : vector<1x32xf32> to vector<6x32xf32>
    %198 = arith.addf %195, %197 : vector<6x32xf32>
    %cst_151 = arith.constant 0.000000e+00 : f32
    %199 = vector.broadcast %cst_151 : f32 to vector<6x32xf32>
    %200 = arith.maximumf %198, %199 : vector<6x32xf32>
    %c0_152 = arith.constant 0 : index
    %c0_153 = arith.constant 0 : index
    %201 = vector.load %arg27[%c0_152, %c0_153] : memref<8x6xf32, #tpu.memory_space<vmem>>, vector<8x6xf32>
    %cst_154 = arith.constant dense<0.000000e+00> : vector<8x32xf32>
    %202 = tpu.matmul %201, %200, %cst_154 {dimension_numbers = #tpu.dot_dimension_numbers<[1], [0], [0], [1], [0, 0, 1, 1], [], []>} : vector<8x6xf32>, vector<6x32xf32>, vector<8x32xf32> -> vector<8x32xf32>
    %203 = vector.extract_strided_slice %202 {offsets = [0, 0], sizes = [6, 32], strides = [1, 1]} : vector<8x32xf32> to vector<6x32xf32>
    %c0_155 = arith.constant 0 : index
    %c0_156 = arith.constant 0 : index
    %c0_157 = arith.constant 0 : index
    %204 = vector.load %arg28[%c0_155, %c0_156, %c0_157] : memref<3x32x32xf32, #tpu.memory_space<vmem>>, vector<1x32x32xf32>
    %205 = vector.shape_cast %204 : vector<1x32x32xf32> to vector<32x32xf32>
    %cst_158 = arith.constant dense<0.000000e+00> : vector<6x32xf32>
    %206 = tpu.matmul %203, %205, %cst_158 {dimension_numbers = #tpu.dot_dimension_numbers<[1], [0], [0], [1], [0, 0, 1, 1], [], []>} : vector<6x32xf32>, vector<32x32xf32>, vector<6x32xf32> -> vector<6x32xf32>
    %207 = vector.extract_strided_slice %202 {offsets = [1, 0], sizes = [6, 32], strides = [1, 1]} : vector<8x32xf32> to vector<6x32xf32>
    %c1_159 = arith.constant 1 : index
    %c0_160 = arith.constant 0 : index
    %c0_161 = arith.constant 0 : index
    %208 = vector.load %arg28[%c1_159, %c0_160, %c0_161] : memref<3x32x32xf32, #tpu.memory_space<vmem>>, vector<1x32x32xf32>
    %209 = vector.shape_cast %208 : vector<1x32x32xf32> to vector<32x32xf32>
    %cst_162 = arith.constant dense<0.000000e+00> : vector<6x32xf32>
    %210 = tpu.matmul %207, %209, %cst_162 {dimension_numbers = #tpu.dot_dimension_numbers<[1], [0], [0], [1], [0, 0, 1, 1], [], []>} : vector<6x32xf32>, vector<32x32xf32>, vector<6x32xf32> -> vector<6x32xf32>
    %211 = arith.addf %206, %210 : vector<6x32xf32>
    %212 = vector.extract_strided_slice %202 {offsets = [2, 0], sizes = [6, 32], strides = [1, 1]} : vector<8x32xf32> to vector<6x32xf32>
    %c2_163 = arith.constant 2 : index
    %c0_164 = arith.constant 0 : index
    %c0_165 = arith.constant 0 : index
    %213 = vector.load %arg28[%c2_163, %c0_164, %c0_165] : memref<3x32x32xf32, #tpu.memory_space<vmem>>, vector<1x32x32xf32>
    %214 = vector.shape_cast %213 : vector<1x32x32xf32> to vector<32x32xf32>
    %cst_166 = arith.constant dense<0.000000e+00> : vector<6x32xf32>
    %215 = tpu.matmul %212, %214, %cst_166 {dimension_numbers = #tpu.dot_dimension_numbers<[1], [0], [0], [1], [0, 0, 1, 1], [], []>} : vector<6x32xf32>, vector<32x32xf32>, vector<6x32xf32> -> vector<6x32xf32>
    %216 = arith.addf %211, %215 : vector<6x32xf32>
    %c0_167 = arith.constant 0 : index
    %c0_168 = arith.constant 0 : index
    %217 = vector.load %arg29[%c0_167, %c0_168] : memref<1x32xf32, #tpu.memory_space<vmem>>, vector<1x32xf32>
    %218 = vector.broadcast %217 : vector<1x32xf32> to vector<6x32xf32>
    %219 = arith.addf %216, %218 : vector<6x32xf32>
    %cst_169 = arith.constant 0.000000e+00 : f32
    %220 = vector.broadcast %cst_169 : f32 to vector<6x32xf32>
    %221 = arith.maximumf %219, %220 : vector<6x32xf32>
    %222 = vector.extract_strided_slice %221 {offsets = [0, 0], sizes = [6, 16], strides = [1, 1]} : vector<6x32xf32> to vector<6x16xf32>
    %223 = vector.extract_strided_slice %221 {offsets = [0, 16], sizes = [6, 16], strides = [1, 1]} : vector<6x32xf32> to vector<6x16xf32>
    %224 = arith.maximumf %222, %223 : vector<6x16xf32>
    %c0_170 = arith.constant 0 : index
    %c0_171 = arith.constant 0 : index
    %225 = vector.load %arg30[%c0_170, %c0_171] : memref<6x6xf32, #tpu.memory_space<vmem>>, vector<6x6xf32>
    %cst_172 = arith.constant dense<0.000000e+00> : vector<6x16xf32>
    %226 = tpu.matmul %225, %224, %cst_172 {dimension_numbers = #tpu.dot_dimension_numbers<[1], [0], [0], [1], [0, 0, 1, 1], [], []>} : vector<6x6xf32>, vector<6x16xf32>, vector<6x16xf32> -> vector<6x16xf32>
    %c0_173 = arith.constant 0 : index
    %c0_174 = arith.constant 0 : index
    %227 = vector.load %arg31[%c0_173, %c0_174] : memref<6x6xf32, #tpu.memory_space<vmem>>, vector<6x6xf32>
    %cst_175 = arith.constant dense<0.000000e+00> : vector<6x16xf32>
    %228 = tpu.matmul %227, %224, %cst_175 {dimension_numbers = #tpu.dot_dimension_numbers<[1], [0], [0], [1], [0, 0, 1, 1], [], []>} : vector<6x6xf32>, vector<6x16xf32>, vector<6x16xf32> -> vector<6x16xf32>
    %229 = arith.maximumf %226, %228 : vector<6x16xf32>
    %230 = vector.extract_strided_slice %229 {offsets = [0, 0], sizes = [4, 16], strides = [1, 1]} : vector<6x16xf32> to vector<4x16xf32>
    %c0_176 = arith.constant 0 : index
    %c0_177 = arith.constant 0 : index
    %c0_178 = arith.constant 0 : index
    %231 = vector.load %arg32[%c0_176, %c0_177, %c0_178] : memref<3x16x16xf32, #tpu.memory_space<vmem>>, vector<1x16x16xf32>
    %232 = vector.shape_cast %231 : vector<1x16x16xf32> to vector<16x16xf32>
    %cst_179 = arith.constant dense<0.000000e+00> : vector<4x16xf32>
    %233 = tpu.matmul %230, %232, %cst_179 {dimension_numbers = #tpu.dot_dimension_numbers<[1], [0], [0], [1], [0, 0, 1, 1], [], []>} : vector<4x16xf32>, vector<16x16xf32>, vector<4x16xf32> -> vector<4x16xf32>
    %234 = vector.extract_strided_slice %229 {offsets = [1, 0], sizes = [4, 16], strides = [1, 1]} : vector<6x16xf32> to vector<4x16xf32>
    %c1_180 = arith.constant 1 : index
    %c0_181 = arith.constant 0 : index
    %c0_182 = arith.constant 0 : index
    %235 = vector.load %arg32[%c1_180, %c0_181, %c0_182] : memref<3x16x16xf32, #tpu.memory_space<vmem>>, vector<1x16x16xf32>
    %236 = vector.shape_cast %235 : vector<1x16x16xf32> to vector<16x16xf32>
    %cst_183 = arith.constant dense<0.000000e+00> : vector<4x16xf32>
    %237 = tpu.matmul %234, %236, %cst_183 {dimension_numbers = #tpu.dot_dimension_numbers<[1], [0], [0], [1], [0, 0, 1, 1], [], []>} : vector<4x16xf32>, vector<16x16xf32>, vector<4x16xf32> -> vector<4x16xf32>
    %238 = arith.addf %233, %237 : vector<4x16xf32>
    %239 = vector.extract_strided_slice %229 {offsets = [2, 0], sizes = [4, 16], strides = [1, 1]} : vector<6x16xf32> to vector<4x16xf32>
    %c2_184 = arith.constant 2 : index
    %c0_185 = arith.constant 0 : index
    %c0_186 = arith.constant 0 : index
    %240 = vector.load %arg32[%c2_184, %c0_185, %c0_186] : memref<3x16x16xf32, #tpu.memory_space<vmem>>, vector<1x16x16xf32>
    %241 = vector.shape_cast %240 : vector<1x16x16xf32> to vector<16x16xf32>
    %cst_187 = arith.constant dense<0.000000e+00> : vector<4x16xf32>
    %242 = tpu.matmul %239, %241, %cst_187 {dimension_numbers = #tpu.dot_dimension_numbers<[1], [0], [0], [1], [0, 0, 1, 1], [], []>} : vector<4x16xf32>, vector<16x16xf32>, vector<4x16xf32> -> vector<4x16xf32>
    %243 = arith.addf %238, %242 : vector<4x16xf32>
    %c0_188 = arith.constant 0 : index
    %c0_189 = arith.constant 0 : index
    %244 = vector.load %arg33[%c0_188, %c0_189] : memref<1x16xf32, #tpu.memory_space<vmem>>, vector<1x16xf32>
    %245 = vector.broadcast %244 : vector<1x16xf32> to vector<4x16xf32>
    %246 = arith.addf %243, %245 : vector<4x16xf32>
    %cst_190 = arith.constant 0.000000e+00 : f32
    %247 = vector.broadcast %cst_190 : f32 to vector<4x16xf32>
    %248 = arith.maximumf %246, %247 : vector<4x16xf32>
    %c0_191 = arith.constant 0 : index
    %c0_192 = arith.constant 0 : index
    %249 = vector.load %arg34[%c0_191, %c0_192] : memref<6x4xf32, #tpu.memory_space<vmem>>, vector<6x4xf32>
    %cst_193 = arith.constant dense<0.000000e+00> : vector<6x16xf32>
    %250 = tpu.matmul %249, %248, %cst_193 {dimension_numbers = #tpu.dot_dimension_numbers<[1], [0], [0], [1], [0, 0, 1, 1], [], []>} : vector<6x4xf32>, vector<4x16xf32>, vector<6x16xf32> -> vector<6x16xf32>
    %251 = vector.extract_strided_slice %250 {offsets = [0, 0], sizes = [4, 16], strides = [1, 1]} : vector<6x16xf32> to vector<4x16xf32>
    %c0_194 = arith.constant 0 : index
    %c0_195 = arith.constant 0 : index
    %c0_196 = arith.constant 0 : index
    %252 = vector.load %arg35[%c0_194, %c0_195, %c0_196] : memref<3x16x16xf32, #tpu.memory_space<vmem>>, vector<1x16x16xf32>
    %253 = vector.shape_cast %252 : vector<1x16x16xf32> to vector<16x16xf32>
    %cst_197 = arith.constant dense<0.000000e+00> : vector<4x16xf32>
    %254 = tpu.matmul %251, %253, %cst_197 {dimension_numbers = #tpu.dot_dimension_numbers<[1], [0], [0], [1], [0, 0, 1, 1], [], []>} : vector<4x16xf32>, vector<16x16xf32>, vector<4x16xf32> -> vector<4x16xf32>
    %255 = vector.extract_strided_slice %250 {offsets = [1, 0], sizes = [4, 16], strides = [1, 1]} : vector<6x16xf32> to vector<4x16xf32>
    %c1_198 = arith.constant 1 : index
    %c0_199 = arith.constant 0 : index
    %c0_200 = arith.constant 0 : index
    %256 = vector.load %arg35[%c1_198, %c0_199, %c0_200] : memref<3x16x16xf32, #tpu.memory_space<vmem>>, vector<1x16x16xf32>
    %257 = vector.shape_cast %256 : vector<1x16x16xf32> to vector<16x16xf32>
    %cst_201 = arith.constant dense<0.000000e+00> : vector<4x16xf32>
    %258 = tpu.matmul %255, %257, %cst_201 {dimension_numbers = #tpu.dot_dimension_numbers<[1], [0], [0], [1], [0, 0, 1, 1], [], []>} : vector<4x16xf32>, vector<16x16xf32>, vector<4x16xf32> -> vector<4x16xf32>
    %259 = arith.addf %254, %258 : vector<4x16xf32>
    %260 = vector.extract_strided_slice %250 {offsets = [2, 0], sizes = [4, 16], strides = [1, 1]} : vector<6x16xf32> to vector<4x16xf32>
    %c2_202 = arith.constant 2 : index
    %c0_203 = arith.constant 0 : index
    %c0_204 = arith.constant 0 : index
    %261 = vector.load %arg35[%c2_202, %c0_203, %c0_204] : memref<3x16x16xf32, #tpu.memory_space<vmem>>, vector<1x16x16xf32>
    %262 = vector.shape_cast %261 : vector<1x16x16xf32> to vector<16x16xf32>
    %cst_205 = arith.constant dense<0.000000e+00> : vector<4x16xf32>
    %263 = tpu.matmul %260, %262, %cst_205 {dimension_numbers = #tpu.dot_dimension_numbers<[1], [0], [0], [1], [0, 0, 1, 1], [], []>} : vector<4x16xf32>, vector<16x16xf32>, vector<4x16xf32> -> vector<4x16xf32>
    %264 = arith.addf %259, %263 : vector<4x16xf32>
    %c0_206 = arith.constant 0 : index
    %c0_207 = arith.constant 0 : index
    %265 = vector.load %arg36[%c0_206, %c0_207] : memref<1x16xf32, #tpu.memory_space<vmem>>, vector<1x16xf32>
    %266 = vector.broadcast %265 : vector<1x16xf32> to vector<4x16xf32>
    %267 = arith.addf %264, %266 : vector<4x16xf32>
    %cst_208 = arith.constant 0.000000e+00 : f32
    %268 = vector.broadcast %cst_208 : f32 to vector<4x16xf32>
    %269 = arith.maximumf %267, %268 : vector<4x16xf32>
    %270 = vector.extract_strided_slice %269 {offsets = [0, 0], sizes = [4, 8], strides = [1, 1]} : vector<4x16xf32> to vector<4x8xf32>
    %271 = vector.extract_strided_slice %269 {offsets = [0, 8], sizes = [4, 8], strides = [1, 1]} : vector<4x16xf32> to vector<4x8xf32>
    %272 = arith.maximumf %270, %271 : vector<4x8xf32>
    %c0_209 = arith.constant 0 : index
    %c0_210 = arith.constant 0 : index
    %273 = vector.load %arg37[%c0_209, %c0_210] : memref<2x4xf32, #tpu.memory_space<vmem>>, vector<2x4xf32>
    %cst_211 = arith.constant dense<0.000000e+00> : vector<2x8xf32>
    %274 = tpu.matmul %273, %272, %cst_211 {dimension_numbers = #tpu.dot_dimension_numbers<[1], [0], [0], [1], [0, 0, 1, 1], [], []>} : vector<2x4xf32>, vector<4x8xf32>, vector<2x8xf32> -> vector<2x8xf32>
    %c0_212 = arith.constant 0 : index
    %c0_213 = arith.constant 0 : index
    %275 = vector.load %arg38[%c0_212, %c0_213] : memref<8x10xf32, #tpu.memory_space<vmem>>, vector<8x10xf32>
    %cst_214 = arith.constant dense<0.000000e+00> : vector<2x10xf32>
    %276 = tpu.matmul %274, %275, %cst_214 {dimension_numbers = #tpu.dot_dimension_numbers<[1], [0], [0], [1], [0, 0, 1, 1], [], []>} : vector<2x8xf32>, vector<8x10xf32>, vector<2x10xf32> -> vector<2x10xf32>
    %c0_215 = arith.constant 0 : index
    %c0_216 = arith.constant 0 : index
    %277 = vector.load %arg39[%c0_215, %c0_216] : memref<1x10xf32, #tpu.memory_space<vmem>>, vector<1x10xf32>
    %278 = vector.broadcast %277 : vector<1x10xf32> to vector<2x10xf32>
    %279 = arith.addf %276, %278 : vector<2x10xf32>
    %cst_217 = arith.constant 0.000000e+00 : f32
    %280 = vector.broadcast %cst_217 : f32 to vector<2x10xf32>
    %281 = arith.maximumf %279, %280 : vector<2x10xf32>
    %c0_218 = arith.constant 0 : index
    %c0_219 = arith.constant 0 : index
    %282 = vector.load %arg40[%c0_218, %c0_219] : memref<10x10xf32, #tpu.memory_space<vmem>>, vector<10x10xf32>
    %cst_220 = arith.constant dense<0.000000e+00> : vector<2x10xf32>
    %283 = tpu.matmul %281, %282, %cst_220 {dimension_numbers = #tpu.dot_dimension_numbers<[1], [0], [0], [1], [0, 0, 1, 1], [], []>} : vector<2x10xf32>, vector<10x10xf32>, vector<2x10xf32> -> vector<2x10xf32>
    %c0_221 = arith.constant 0 : index
    %c0_222 = arith.constant 0 : index
    %284 = vector.load %arg41[%c0_221, %c0_222] : memref<1x10xf32, #tpu.memory_space<vmem>>, vector<1x10xf32>
    %285 = vector.broadcast %284 : vector<1x10xf32> to vector<2x10xf32>
    %286 = arith.addf %283, %285 : vector<2x10xf32>
    %c0_223 = arith.constant 0 : index
    %c0_224 = arith.constant 0 : index
    %287 = vector.load %arg42[%c0_223, %c0_224] : memref<2x10xf32, #tpu.memory_space<vmem>>, vector<2x10xf32>
    tpu.vector_store %arg42[%c0_223, %c0_224], %286 {strides = array<i32>} : memref<2x10xf32, #tpu.memory_space<vmem>>, vector<2x10xf32>,
    return
  }
}

</mosaic_0001>

<bundles_post_ra>
// kernel: forward_pallas.1
= control target key start
LH: loop header
LB: loop body
LE: loop exit
PB: predicated region body
PF: predicated region fallthrough
CT: control target
= control target key end

     0   :  { %s7986_s6 = smov 1   ;;  %s7987_s10 = smov 2   ;;  %s9425_s0 = inlined_call_operand.smem [shape: u32[43], index: -1, kind: input, shape index: {}] }
   0x1   :  { %s8072_s5 = sld [smem:[%s9425_s0]]   ;;  %s7988_s14 = smov 3  }
   0x2   :  { %s8077_s9 = sld [smem:[%s9425_s0 + %s7986_s6]]   ;;  %s7989_s18 = smov 4  }
   0x3   :  { %s8082_s13 = sld [smem:[%s9425_s0 + %s7987_s10]]   ;;  %s7990_s22 = smov 5  }
   0x4   :  { %s8087_s17 = sld [smem:[%s9425_s0 + %s7988_s14]]   ;;  %s7991_s26 = smov 6  }
   0x5   :  { %s8092_s21 = sld [smem:[%s9425_s0 + %s7989_s18]]   ;;  %s7992_s30 = smov 7  }
   0x6   :  { %s8097_s25 = sld [smem:[%s9425_s0 + %s7990_s22]]   ;;  %s7993_s4 = smov 8  }
   0x7   :  { %9439 = sst [smem:[#allocation41_spill]] %s8072_s5  ;;  %s7994_s10 = smov 9  }
   0x8   :  { %s8102_s29 = sld [smem:[%s9425_s0 + %s7991_s26]]   ;;  %s7995_s15 = smov 10  }
   0x9   :  { %9440 = sst [smem:[#allocation42_spill]] %s8082_s13  ;;  %s7996_s20 = smov 11  }
   0xa   :  { %s8107_s3 = sld [smem:[%s9425_s0 + %s7992_s30]]   ;;  %s7997_s26 = smov 12  }
   0xb   :  { %9441 = sst [smem:[#allocation43_spill]] %s8092_s21  ;;  %s7998_s1 = smov 13  }
   0xc   :  { %9442 = sst [smem:[#allocation44_spill]] %s8097_s25  ;;  %s7999_s7 = smov 14  }
   0xd   :  { %s8112_s8 = sld [smem:[%s9425_s0 + %s7993_s4]]   ;;  %s8001_s22 = smov 16  }
   0xe   :  { %9443 = sst [smem:[#allocation45_spill]] %s8102_s29  ;;  %s8002_s28 = smov 17  }
   0xf   :  { %s8117_s14 = sld [smem:[%s9425_s0 + %s7994_s10]]  }
  0x10   :  { %9444 = sst [smem:[#allocation46_spill]] %s8107_s3 }
  0x11   :  { %s8122_s19 = sld [smem:[%s9425_s0 + %s7995_s15]]   ;;  %s8000_s15 = smov 15  }
  0x12   :  { %s8127_s24 = sld [smem:[%s9425_s0 + %s7996_s20]]  }
  0x13   :  { %s8132_s30 = sld [smem:[%s9425_s0 + %s7997_s26]]  }
  0x14   :  { %s8137_s6 = sld [smem:[%s9425_s0 + %s7998_s1]]  }
  0x15   :  { %s8142_s12 = sld [smem:[%s9425_s0 + %s7999_s7]]   ;;  %s8003_s7 = smov 18  }
  0x16   :  { %s8147_s20 = sld [smem:[%s9425_s0 + %s8000_s15]]   ;;  %s8004_s15 = smov 19  }
  0x17   :  { %s8152_s27 = sld [smem:[%s9425_s0 + %s8001_s22]]   ;;  %s8005_s22 = smov 20  }
  0x18   :  { %9445 = sst [smem:[#allocation47_spill]] %s8127_s24 }
  0x19   :  { %9446 = sst [smem:[#allocation48_spill]] %s8132_s30 }
  0x1a   :  { %s8157_s4 = sld [smem:[%s9425_s0 + %s8002_s28]]   ;;  %s8006_s28 = smov 21  }
  0x1b   :  { %9447 = sst [smem:[#allocation49_spill]] %s8142_s12 }
  0x1c   :  { %s8162_s30 = sld [smem:[%s9425_s0 + %s8003_s7]]   ;;  %s8007_s7 = smov 22  }
  0x1d   :  { %s8167_s12 = sld [smem:[%s9425_s0 + %s8004_s15]]   ;;  %s8008_s15 = smov 23  }
  0x1e   :  { %s8172_s24 = sld [smem:[%s9425_s0 + %s8005_s22]]   ;;  %s8009_s22 = smov 24  }
  0x1f   :  { %s8177_s3 = sld [smem:[%s9425_s0 + %s8006_s28]]   ;;  %s8010_s28 = smov 25  }
  0x20   :  { %s8187_s29 = sld [smem:[%s9425_s0 + %s8008_s15]]   ;;  %s8012_s15 = smov 27  }
  0x21   :  { %s8192_s25 = sld [smem:[%s9425_s0 + %s8009_s22]]   ;;  %s8013_s22 = smov 28  }
  0x22   :  { %9448 = sst [smem:[#allocation50_spill]] %s8162_s30 }
  0x23   :  { %s8182_s30 = sld [smem:[%s9425_s0 + %s8007_s7]]   ;;  %s8011_s7 = smov 26  }
  0x24   :  { %s8202_s21 = sld [smem:[%s9425_s0 + %s8011_s7]]   ;;  %s8015_s7 = smov 30  }
  0x25   :  { %9449 = sst [smem:[#allocation51_spill]] %s8177_s3 }
  0x26   :  { %9450 = sst [smem:[#allocation52_spill]] %s8187_s29 }
  0x27   :  { %9451 = sst [smem:[#allocation53_spill]] %s8192_s25 }
  0x28   :  { %s8197_s3 = sld [smem:[%s9425_s0 + %s8010_s28]]   ;;  %s8014_s28 = smov 29  }
  0x29   :  { %s8207_s29 = sld [smem:[%s9425_s0 + %s8012_s15]]   ;;  %s8016_s15 = smov 31  }
  0x2a   :  { %9453 = sst [smem:[#allocation55_spill]] %s8202_s21 }
  0x2b   :  { %s8212_s25 = sld [smem:[%s9425_s0 + %s8013_s22]]   ;;  %s8017_s22 = smov 32  }
  0x2c   :  { %s8222_s13 = sld [smem:[%s9425_s0 + %s8015_s7]]   ;;  %s8019_s7 = smov 34  }
  0x2d   :  { %s8227_s5 = sld [smem:[%s9425_s0 + %s8016_s15]]   ;;  %s8020_s15 = smov 35  }
  0x2e   :  { %9452 = sst [smem:[#allocation54_spill]] %s8197_s3 }
  0x2f   :  { %s8217_s3 = sld [smem:[%s9425_s0 + %s8014_s28]]   ;;  %s8018_s28 = smov 33  }
  0x30   :  { %s8242_s21 = sld [smem:[%s9425_s0 + %s8019_s7]]   ;;  %s8023_s7 = smov 38  }
  0x31   :  { %9454 = sst [smem:[#allocation56_spill]] %s8212_s25 }
  0x32   :  { %s8232_s25 = sld [smem:[%s9425_s0 + %s8017_s22]]   ;;  %s8021_s22 = smov 36  }
  0x33   :  { %9456 = sst [smem:[#allocation58_spill]] %s8227_s5 }
  0x34   :  { %s8247_s5 = sld [smem:[%s9425_s0 + %s8020_s15]]   ;;  %s8024_s15 = smov 39  }
  0x35   :  { %9455 = sst [smem:[#allocation57_spill]] %s8217_s3 }
  0x36   :  { %s8237_s3 = sld [smem:[%s9425_s0 + %s8018_s28]]   ;;  %s8022_s28 = smov 37  }
  0x37   :  { %9459 = sst [smem:[#allocation61_spill]] %s8242_s21 }
  0x38   :  { %9457 = sst [smem:[#allocation59_spill]] %s8232_s25 }
  0x39   :  { %s8252_s25 = sld [smem:[%s9425_s0 + %s8021_s22]]   ;;  %s8025_s22 = smov 40  }
  0x3a   :  { %9460 = sst [smem:[#allocation62_spill]] %s8247_s5 }
  0x3b   :  { %s8262_s21 = sld [smem:[%s9425_s0 + %s8023_s7]]   ;;  %s8027_s7 = smov 42  }
  0x3c   :  { %9458 = sst [smem:[#allocation60_spill]] %s8237_s3 }
  0x3d   :  { %s8257_s3 = sld [smem:[%s9425_s0 + %s8022_s28]]   ;;  %s8026_s28 = smov 41  }
  0x3e   :  { %s8267_s5 = sld [smem:[%s9425_s0 + %s8024_s15]]  }
  0x3f   :  { %9461 = sst [smem:[#allocation63_spill]] %s8252_s25 }
  0x40   :  { %s8272_s25 = sld [smem:[%s9425_s0 + %s8025_s22]]  }
  0x41   :  { %9463 = sst [smem:[#allocation65_spill]] %s8262_s21 }
  0x42   :  { %s8282_s21 = sld [smem:[%s9425_s0 + %s8027_s7]]  }
  0x43   :  { %9462 = sst [smem:[#allocation64_spill]] %s8257_s3 }
  0x44   :  { %s8277_s3 = sld [smem:[%s9425_s0 + %s8026_s28]]  }
  0x45   :  { %90 = vsyncpa [#allocation4], 0 }
  0x46   :  { %91 = vsyncpa [#allocation7], 0 }
  0x47   :  { %92 = vsyncpa [#allocation10], 0 }
  0x48   :  { %93 = vsyncpa [#allocation13], 0 }
  0x49   :  { %94 = vsyncpa [#allocation16], 0 }
  0x4a   :  { %95 = vsyncpa [#allocation19], 0 }
  0x4b   :  { %96 = vsyncpa [#allocation22], 0 }
  0x4c   :  { %97 = vsyncpa [#allocation25], 0 }
  0x4d   :  { %98 = vsyncpa [#allocation28], 0 }
  0x4e   :  { %99 = vsyncpa [#allocation5], 0  ;;  %s8028_s15 = smov [#allocation6]  }
  0x4f   :  { %s119_s16 = sshll.u32 %s8028_s15, 4  ;;  %s120_s16 = int_to_ptr.vmem [resolvable:$true] %s119_s16 }
  0x50   :  { %s7614_s18 = scalar_lea.vmem %s120_s16, 256  ;;  %p7619_p1 = scmp.lt.s32.totalorder %s120_s16, %s120_s16 }
  0x51   :  { %p7615_p0 = scmp.ne.s32.totalorder %s120_s16, %s7614_s18  ;;  %p7620_p2 = scmp.lt.s32.totalorder %s7614_s18, %s7614_s18 }
  0x53   :  { %p7621_p3 = por %p7620_p2, %p7619_p1 }
  0x55   :  { %p7622_p4 = pnand %p7621_p3, %p7615_p0 }
  0x57   :  { %7625 = shalt.err (!%p7622_p4)
}
  0x58   :  { %s8029_s0 = smov 128   ;;  %s8030_s22 = smov 8  }
  0x59   :  { %125 = dma.hbm_to_vmem [thread:$0]  %s8087_s17, 256, %s120_s16, [#allocation7], %s8029_s0, %s8029_s0, %s8030_s22  }
  0x5a   :  { %s8031_s23 = smov [#allocation9]   ;;  %s8032_s28 = smov [#allocation12]  }
  0x5b   :  { %s149_s26 = sshll.u32 %s8031_s23, 4  ;;  %s177_s1 = sshll.u32 %s8032_s28, 4  ;;  %s150_s26 = int_to_ptr.vmem [resolvable:$true] %s149_s26  ;;  %s178_s1 = int_to_ptr.vmem [resolvable:$true] %s177_s1 }
  0x5c   :  { %s7634_s2 = scalar_lea.vmem %s150_s26, 384  ;;  %p7639_p6 = scmp.lt.s32.totalorder %s150_s26, %s150_s26 }
  0x5d   :  { %p7635_p5 = scmp.ne.s32.totalorder %s150_s26, %s7634_s2  ;;  %p7640_p7 = scmp.lt.s32.totalorder %s7634_s2, %s7634_s2 }
  0x5f   :  { %p7641_p8 = por %p7640_p7, %p7639_p6 }
  0x61   :  { %p7642_p9 = pnand %p7641_p8, %p7635_p5 }
  0x63   :  { %7645 = shalt.err (!%p7642_p9)
}
  0x64   :  { %155 = dma.hbm_to_vmem [thread:$0]  %s8117_s14, 384, %s150_s26, [#allocation10], %s8029_s0, %s8029_s0, %s8030_s22  }
  0x65   :  { %s7654_s7 = scalar_lea.vmem %s178_s1, 384  ;;  %p7659_p11 = scmp.lt.s32.totalorder %s178_s1, %s178_s1 }
  0x66   :  { %p7655_p10 = scmp.ne.s32.totalorder %s178_s1, %s7654_s7  ;;  %p7660_p12 = scmp.lt.s32.totalorder %s7654_s7, %s7654_s7 }
  0x68   :  { %p7661_p13 = por %p7660_p12, %p7659_p11 }
  0x6a   :  { %p7662_p0 = pnand %p7661_p13, %p7655_p10 }
  0x6c   :  { %7665 = shalt.err (!%p7662_p0)
}
  0x6d   :  { %183 = dma.hbm_to_vmem [thread:$0]  %s8137_s6, 384, %s178_s1, [#allocation13], %s8029_s0, %s8029_s0, %s8030_s22  }
  0x6e   :  { %s8033_s17 = smov [#allocation15]   ;;  %s8034_s11 = smov [#allocation18]  }
  0x6f   :  { %s201_s10 = sshll.u32 %s8033_s17, 4  ;;  %s228_s15 = sshll.u32 %s8034_s11, 4  ;;  %s202_s10 = int_to_ptr.vmem [resolvable:$true] %s201_s10  ;;  %s229_s15 = int_to_ptr.vmem [resolvable:$true] %s228_s15 }
  0x70   :  { %s7674_s16 = scalar_lea.vmem %s202_s10, 256  ;;  %p7679_p2 = scmp.lt.s32.totalorder %s202_s10, %s202_s10 }
  0x71   :  { %p7675_p1 = scmp.ne.s32.totalorder %s202_s10, %s7674_s16  ;;  %p7680_p3 = scmp.lt.s32.totalorder %s7674_s16, %s7674_s16 }
  0x73   :  { %p7681_p4 = por %p7680_p3, %p7679_p2 }
  0x75   :  { %p7682_p5 = pnand %p7681_p4, %p7675_p1 }
  0x77   :  { %7685 = shalt.err (!%p7682_p5)
}
  0x78   :  { %207 = dma.hbm_to_vmem [thread:$0]  %s8152_s27, 256, %s202_s10, [#allocation16], %s8029_s0, %s8029_s0, %s8030_s22  }
  0x79   :  { %s7694_s14 = scalar_lea.vmem %s229_s15, 16  ;;  %s7698_s6 = scalar_lea.vmem %s229_s15, 32 }
  0x7a   :  { %p7695_p6 = scmp.ne.s32.totalorder %s229_s15, %s7694_s14  ;;  %p7699_p7 = scmp.lt.s32.totalorder %s229_s15, %s229_s15 }
  0x7b   :  { %p7700_p8 = scmp.lt.s32.totalorder %s7698_s6, %s7694_s14 }
  0x7d   :  { %p7701_p9 = por %p7700_p8, %p7699_p7 }
  0x7f   :  { %p7702_p10 = pnand %p7701_p9, %p7695_p6 }
  0x81   :  { %7705 = shalt.err (!%p7702_p10)
}
  0x82   :  { %231 = dma.hbm_to_vmem [thread:$0]  %s8167_s12, 16, %s229_s15, [#allocation19]  }
  0x83   :  { %s8035_s18 = smov [#allocation21]   ;;  %s8036_s26 = smov [#allocation24]  }
  0x84   :  { %s252_s23 = sshll.u32 %s8035_s18, 4  ;;  %s278_s28 = sshll.u32 %s8036_s26, 4  ;;  %s253_s23 = int_to_ptr.vmem [resolvable:$true] %s252_s23  ;;  %s279_s28 = int_to_ptr.vmem [resolvable:$true] %s278_s28 }
  0x85   :  { %s7714_s1 = scalar_lea.vmem %s253_s23, 16  ;;  %s7718_s2 = scalar_lea.vmem %s253_s23, 32 }
  0x86   :  { %p7715_p11 = scmp.ne.s32.totalorder %s253_s23, %s7714_s1  ;;  %p7719_p12 = scmp.lt.s32.totalorder %s253_s23, %s253_s23 }
  0x87   :  { %p7720_p13 = scmp.lt.s32.totalorder %s7718_s2, %s7714_s1 }
  0x89   :  { %p7721_p0 = por %p7720_p13, %p7719_p12 }
  0x8b   :  { %p7722_p1 = pnand %p7721_p0, %p7715_p11 }
  0x8d   :  { %7725 = shalt.err (!%p7722_p1)
}
  0x8e   :  { %255 = dma.hbm_to_vmem [thread:$0]  %s8182_s30, 16, %s253_s23, [#allocation22]  }
  0x8f   :  { %s7734_s27 = scalar_lea.vmem %s279_s28, 128  ;;  %p7739_p3 = scmp.lt.s32.totalorder %s279_s28, %s279_s28 }
  0x90   :  { %p7735_p2 = scmp.ne.s32.totalorder %s279_s28, %s7734_s27  ;;  %p7740_p4 = scmp.lt.s32.totalorder %s7734_s27, %s7734_s27 }
  0x92   :  { %p7741_p5 = por %p7740_p4, %p7739_p3 }
  0x94   :  { %p7742_p6 = pnand %p7741_p5, %p7735_p2 }
  0x96   :  { %7745 = shalt.err (!%p7742_p6)
}
  0x97   :  { %281 = dma.hbm_to_vmem [thread:$0]  %s8207_s29, 128, %s279_s28, [#allocation25]  }
  0x98   :  { %s8037_s12 = smov [#allocation27]   ;;  %s8038_s17 = smov [#allocation3]  }
  0x99   :  { %s300_s7 = sshll.u32 %s8037_s12, 4  ;;  %s108_s10 = sshll.u32 %s8038_s17, 4  ;;  %s301_s7 = int_to_ptr.vmem [resolvable:$true] %s300_s7  ;;  %s109_s10 = int_to_ptr.vmem [resolvable:$true] %s108_s10 }
  0x9a   :  { %s7754_s11 = scalar_lea.vmem %s301_s7, 128  ;;  %p7759_p8 = scmp.lt.s32.totalorder %s301_s7, %s301_s7 }
  0x9b   :  { %p7755_p7 = scmp.ne.s32.totalorder %s301_s7, %s7754_s11  ;;  %p7760_p9 = scmp.lt.s32.totalorder %s7754_s11, %s7754_s11 }
  0x9d   :  { %p7761_p10 = por %p7760_p9, %p7759_p8 }
  0x9f   :  { %p7762_p11 = pnand %p7761_p10, %p7755_p7 }
  0xa1   :  { %7765 = shalt.err (!%p7762_p11)
}
  0xa2   :  { %303 = dma.hbm_to_vmem [thread:$0]  %s8222_s13, 128, %s301_s7, [#allocation28]  }
  0xa3   :  { %s7774_s30 = scalar_lea.vmem %s109_s10, 64  ;;  %p7779_p13 = scmp.lt.s32.totalorder %s109_s10, %s109_s10 }
  0xa4   :  { %p7775_p12 = scmp.ne.s32.totalorder %s109_s10, %s7774_s30  ;;  %p7780_p0 = scmp.lt.s32.totalorder %s7774_s30, %s7774_s30 }
  0xa6   :  { %p7781_p1 = por %p7780_p0, %p7779_p13 }
  0xa8   :  { %p7782_p2 = pnand %p7781_p1, %p7775_p12 }
  0xaa   :  { %7785 = shalt.err (!%p7782_p2)
}
  0xab   :  { %111 = dma.hbm_to_vmem [thread:$0]  %s8077_s9, 64, %s109_s10, [#allocation4]  }
  0xac   :  { %s8039_s29 = smov [#allocation8]   ;;  %s8040_s16 = smov [#allocation11]  }
  0xad   :  { %s140_s15 = sshll.u32 %s8039_s29, 4  ;;  %s161_s14 = sshll.u32 %s8040_s16, 4  ;;  %s141_s15 = int_to_ptr.vmem [resolvable:$true] %s140_s15  ;;  %s162_s14 = int_to_ptr.vmem [resolvable:$true] %s161_s14 }
  0xae   :  { %s7794_s6 = scalar_lea.vmem %s141_s15, 32  ;;  %p7799_p4 = scmp.lt.s32.totalorder %s141_s15, %s141_s15 }
  0xaf   :  { %p7795_p3 = scmp.ne.s32.totalorder %s141_s15, %s7794_s6  ;;  %p7800_p5 = scmp.lt.s32.totalorder %s7794_s6, %s7794_s6 }
  0xb1   :  { %p7801_p6 = por %p7800_p5, %p7799_p4 }
  0xb3   :  { %p7802_p7 = pnand %p7801_p6, %p7795_p3 }
  0xb5   :  { %7805 = shalt.err (!%p7802_p7)
}
  0xb6   :  { %143 = dma.hbm_to_vmem [thread:$0]  %s8112_s8, 32, %s141_s15, [#allocation7]  }
  0xb7   :  { %s7814_s13 = scalar_lea.vmem %s162_s14, 384  ;;  %p7819_p9 = scmp.lt.s32.totalorder %s162_s14, %s162_s14 }
  0xb8   :  { %p7815_p8 = scmp.ne.s32.totalorder %s162_s14, %s7814_s13  ;;  %p7820_p10 = scmp.lt.s32.totalorder %s7814_s13, %s7814_s13 }
  0xba   :  { %p7821_p11 = por %p7820_p10, %p7819_p9 }
  0xbc   :  { %p7822_p12 = pnand %p7821_p11, %p7815_p8 }
  0xbe   :  { %7825 = shalt.err (!%p7822_p12)
}
  0xbf   :  { %167 = dma.hbm_to_vmem [thread:$0]  %s8122_s19, 384, %s162_s14, [#allocation10], %s8029_s0, %s8029_s0, %s8030_s22  }
  0xc0   :  { %s8041_s9 = smov [#allocation14]   ;;  %s8042_s23 = smov [#allocation17]  }
  0xc1   :  { %s192_s18 = sshll.u32 %s8041_s9, 4  ;;  %s213_s26 = sshll.u32 %s8042_s23, 4  ;;  %s193_s18 = int_to_ptr.vmem [resolvable:$true] %s192_s18  ;;  %s214_s26 = int_to_ptr.vmem [resolvable:$true] %s213_s26 }
  0xc2   :  { %s7834_s28 = scalar_lea.vmem %s193_s18, 16  ;;  %s7838_s8 = scalar_lea.vmem %s193_s18, 32 }
  0xc3   :  { %p7835_p13 = scmp.ne.s32.totalorder %s193_s18, %s7834_s28  ;;  %p7839_p0 = scmp.lt.s32.totalorder %s193_s18, %s193_s18 }
  0xc4   :  { %p7840_p1 = scmp.lt.s32.totalorder %s7838_s8, %s7834_s28 }
  0xc6   :  { %p7841_p2 = por %p7840_p1, %p7839_p0 }
  0xc8   :  { %p7842_p3 = pnand %p7841_p2, %p7835_p13 }
  0xca   :  { %7845 = shalt.err (!%p7842_p3)
}
  0xcb   :  { %195 = dma.hbm_to_vmem [thread:$0]  %s8147_s20, 16, %s193_s18, [#allocation13]  }
  0xcc   :  { %s7854_s1 = scalar_lea.vmem %s214_s26, 256  ;;  %p7859_p5 = scmp.lt.s32.totalorder %s214_s26, %s214_s26 }
  0xcd   :  { %p7855_p4 = scmp.ne.s32.totalorder %s214_s26, %s7854_s1  ;;  %p7860_p6 = scmp.lt.s32.totalorder %s7854_s1, %s7854_s1 }
  0xcf   :  { %p7861_p7 = por %p7860_p6, %p7859_p5 }
  0xd1   :  { %p7862_p8 = pnand %p7861_p7, %p7855_p4 }
  0xd3   :  { %7865 = shalt.err (!%p7862_p8)
}
  0xd4   :  { %219 = dma.hbm_to_vmem [thread:$0]  %s8157_s4, 256, %s214_s26, [#allocation16], %s8029_s0, %s8029_s0, %s8030_s22  }
  0xd5   :  { %s8043_s19 = smov [#allocation20]   ;;  %s8044_s27 = smov [#allocation23]  }
  0xd6   :  { %s237_s2 = sshll.u32 %s8043_s19, 4  ;;  %s268_s12 = sshll.u32 %s8044_s27, 4  ;;  %s238_s2 = int_to_ptr.vmem [resolvable:$true] %s237_s2  ;;  %s269_s12 = int_to_ptr.vmem [resolvable:$true] %s268_s12 }
  0xd7   :  { %s7874_s7 = scalar_lea.vmem %s238_s2, 256  ;;  %p7879_p10 = scmp.lt.s32.totalorder %s238_s2, %s238_s2 }
  0xd8   :  { %p7875_p9 = scmp.ne.s32.totalorder %s238_s2, %s7874_s7  ;;  %p7880_p11 = scmp.lt.s32.totalorder %s7874_s7, %s7874_s7 }
  0xda   :  { %p7881_p12 = por %p7880_p11, %p7879_p10 }
  0xdc   :  { %p7882_p13 = pnand %p7881_p12, %p7875_p9 }
  0xde   :  { %7885 = shalt.err (!%p7882_p13)
}
  0xdf   :  { %243 = dma.hbm_to_vmem [thread:$0]  %s8172_s24, 256, %s238_s2, [#allocation19], %s8029_s0, %s8029_s0, %s8030_s22  }
  0xe0   :  { %s7894_s20 = scalar_lea.vmem %s269_s12, 16  ;;  %s7898_s4 = scalar_lea.vmem %s269_s12, 32 }
  0xe1   :  { %p7895_p0 = scmp.ne.s32.totalorder %s269_s12, %s7894_s20  ;;  %p7899_p1 = scmp.lt.s32.totalorder %s269_s12, %s269_s12 }
  0xe2   :  { %p7900_p2 = scmp.lt.s32.totalorder %s7898_s4, %s7894_s20 }
  0xe4   :  { %p7901_p3 = por %p7900_p2, %p7899_p1 }
  0xe6   :  { %p7902_p4 = pnand %p7901_p3, %p7895_p0 }
  0xe8   :  { %7905 = shalt.err (!%p7902_p4)
}
  0xe9   :  { %s9464_s17 = sld [smem:[#allocation55_spill]]  ;;  %s8045_s10 = smov [#allocation26]  }
  0xea   :  { %s290_s11 = sshll.u32 %s8045_s10, 4  ;;  %s8046_s30 = smov [#allocation29]   ;;  %s291_s11 = int_to_ptr.vmem [resolvable:$true] %s290_s11 }
  0xeb   :  { %s310_s29 = sshll.u32 %s8046_s30, 4  ;;  %s7914_s15 = scalar_lea.vmem %s291_s11, 16  ;;  %s311_s29 = int_to_ptr.vmem [resolvable:$true] %s310_s29 }
  0xec   :  { %p7915_p5 = scmp.ne.s32.totalorder %s291_s11, %s7914_s15  ;;  %s7918_s16 = scalar_lea.vmem %s291_s11, 32 }
  0xed   :  { %p7919_p6 = scmp.lt.s32.totalorder %s291_s11, %s291_s11  ;;  %p7920_p7 = scmp.lt.s32.totalorder %s7918_s16, %s7914_s15 }
  0xef   :  { %271 = dma.hbm_to_vmem [thread:$0]  %s9464_s17, 16, %s269_s12, [#allocation22]  }
  0xf0   :  { %p7921_p8 = por %p7920_p7, %p7919_p6 }
  0xf2   :  { %p7922_p9 = pnand %p7921_p8, %p7915_p5 }
  0xf4   :  { %7925 = shalt.err (!%p7922_p9)
}
  0xf5   :  { %s9465_s24 = sld [smem:[#allocation57_spill]]  ;;  %s7934_s0 = scalar_lea.vmem %s311_s29, 128 }
  0xf6   :  { %p7935_p10 = scmp.ne.s32.totalorder %s311_s29, %s7934_s0  ;;  %p7939_p11 = scmp.lt.s32.totalorder %s311_s29, %s311_s29 }
  0xf7   :  { %p7940_p12 = scmp.lt.s32.totalorder %s7934_s0, %s7934_s0 }
  0xf9   :  { %p7941_p13 = por %p7940_p12, %p7939_p11 }
  0xfb   :  { %293 = dma.hbm_to_vmem [thread:$0]  %s9465_s24, 16, %s291_s11, [#allocation25]  }
  0xfc   :  { %p7942_p0 = pnand %p7941_p13, %p7935_p10 }
  0xfe   :  { %7945 = shalt.err (!%p7942_p0)
}
  0xff   :  { %s9466_s22 = sld [smem:[#allocation58_spill]] }
 0x105   :  { %313 = dma.hbm_to_vmem [thread:$0]  %s9466_s22, 128, %s311_s29, [#allocation28]  }
 0x106   :  { %7966 = dma.done.wait [#allocation4], 64  }
 0x107   :  { %7967 = vsyncadd [#allocation4], 4294967232 }
 0x108   :  { %7968 = dma.done.wait [#allocation7], 288  }
 0x109   :  { %7969 = vsyncadd [#allocation7], 4294967008 }
 0x10a   :  { %7970 = dma.done.wait [#allocation10], 768  }
 0x10b   :  { %7971 = vsyncadd [#allocation10], 4294966528 }
 0x10c   :  { %7972 = dma.done.wait [#allocation13], 400  }
 0x10d   :  { %7973 = vsyncadd [#allocation13], 4294966896 }
 0x10e   :  { %7974 = dma.done.wait [#allocation16], 512  }
 0x10f   :  { %7975 = vsyncadd [#allocation16], 4294966784 }
 0x110   :  { %7976 = dma.done.wait [#allocation19], 272  }
 0x111   :  { %7977 = vsyncadd [#allocation19], 4294967024 }
 0x112   :  { %7978 = dma.done.wait [#allocation22], 32  }
 0x113   :  { %7979 = vsyncadd [#allocation22], 4294967264 }
 0x114   :  { %7980 = dma.done.wait [#allocation25], 144  }
 0x115   :  { %7981 = vsyncadd [#allocation25], 4294967152 }
 0x116   :  { %7982 = dma.done.wait [#allocation28], 256  }
 0x117   :  { %7983 = vsyncadd [#allocation28], 4294967040  ;;  %s9467_s14 = sld [smem:[#allocation41_spill]]  ;;  %v8047_v0 = vmov 0.0   ;;  %v8048_v1 = vmov 0   ;;  %vm418_vm0 = vcmask 1040384  }
 0x118   :  { %516 = vmatprep.mubr.f32.mxu0 %v8047_v0  ;;  %587 = vmatprep.mubr.f32.mxu1 %v8047_v0  ;;  %v385_v10 = vld [vmem:[#allocation3] sm:$0xf]  ;;  %vm414_vm1 = vcmask 72704   ;;  %s9468_s6 = sld [smem:[#allocation42_spill]]  ;;  %vm8049_vm2 = vmmov 0   ;;  %vm890_vm3 = vcmask 527360  }
 0x119   :  { %7529 = vset.pattern.permute.xlu0 %v8048_v1  ;;  %7530 = vset.pattern.permute.xlu1 %v8048_v1  ;;  %s8050_s13 = smov 126   ;;  %s8051_s9 = smov 127   ;;  %vm960_vm4 = vcmask 1031168   ;;  %vm927_vm5 = vcmask 1039360   ;;  %vm1112_vm6 = vcmask 1043456   ;;  %vm944_vm7 = vcmask 490496  }
 0x11a   :  { %s8052_s18 = smov 61   ;;  %s8053_s23 = smov 60   ;;  %vm908_vm8 = vcmask 498688   ;;  %vm984_vm9 = vcmask 1043976   ;;  %vm1062_vm10 = vcmask 465920   ;;  %vm1025_vm11 = vcmask 474112  }
 0x11b   :  { %s8054_s26 = smov 58   ;;  %s8055_s28 = smov 57   ;;  %vm988_vm12 = vcmask 11264   ;;  %vm1105_vm13 = vcmask 162816   ;;  %vm977_vm14 = vcmask 482304   ;;  %vm917_vm15 = vcmask 531460  }
 0x11c   :  { %s8056_s8 = smov 59   ;;  %s8057_s1 = smov 119  }
 0x11d   :  { %v398_v2 = vld [vmem:[%s9467_s14 + $0x60] sm:$0x1]  ;;  %v400_v3 = vld [vmem:[%s9467_s14 + $0x70] sm:$0x1]  ;;  %v397_v4 = vld [vmem:[%s9467_s14 + $0x58] sm:$0x1] }
 0x11e   :  { %6114 = vmatprep.subr.msk.mxu0 %vm418_vm0, %v398_v2  ;;  %6117 = vmatprep.subr.msk.mxu1 %vm418_vm0, %v400_v3  ;;  %v399_v5 = vld [vmem:[%s9467_s14 + $0x68] sm:$0x1]  ;;  %v389_v7 = vld [vmem:[%s9467_s14 + $0x18] sm:$0xff]  ;;  %v386_v8 = vld [vmem:[%s9467_s14] sm:$0xff]  ;;  %s9469_s19 = sld [smem:[#allocation43_spill]]  ;;  %s8058_s2 = smov 120  }
 0x11f   :  { %v387_v6 = vld [vmem:[%s9467_s14 + $0x8] sm:$0xff]  ;;  %6115 = vmatpush1.msk.msra.mxu0 %vm418_vm0, %v397_v4  ;;  %6118 = vmatpush1.msk.msra.mxu1 %vm418_vm0, %v399_v5  ;;  %v388_v9 = vld [vmem:[%s9467_s14 + $0x10] sm:$0xff]  ;;  %v402_v11 = vld [vmem:[%s9467_s14 + $0x80] sm:$0x1]  ;;  %s9470_s27 = sld [smem:[#allocation44_spill]]  ;;  %s8059_s12 = smov 124  }
 0x120   :  { %482 = vmatprep.subr.mxu0 %v387_v6  ;;  %553 = vmatprep.subr.mxu1 %v389_v7  ;;  %v404_v12 = vld [vmem:[%s9467_s14 + $0x90] sm:$0x1]  ;;  %v401_v13 = vld [vmem:[%s9467_s14 + $0x78] sm:$0x1]  ;;  %v403_v14 = vld [vmem:[%s9467_s14 + $0x88] sm:$0x1] }
 0x121   :  { %483 = vmatpush1.msra.mxu0 %v386_v8  ;;  %554 = vmatpush1.msra.mxu1 %v388_v9  ;;  %v391_v15 = vld [vmem:[%s9467_s14 + $0x28] sm:$0xff]  ;;  %v393_v16 = vld [vmem:[%s9467_s14 + $0x38] sm:$0xff]  ;;  %v390_v17 = vld [vmem:[%s9467_s14 + $0x20] sm:$0xff]  ;;  %s9471_s7 = sld [smem:[#allocation45_spill]]  ;;  %s8060_s20 = smov 96  }
 0x122   :  { %6116 = vmatmul.mubr.msk.f32.vlgmr.msra.gmra.mxu0 %vm414_vm1, %v385_v10  ;;  %6119 = vmatmul.mubr.msk.f32.vlgmr.msra.gmra.mxu1 %vm414_vm1, %v385_v10  ;;  %v392_v18 = vld [vmem:[%s9467_s14 + $0x30] sm:$0xff]  ;;  %v406_v19 = vld [vmem:[%s9467_s14 + $0xa0] sm:$0x1]  ;;  %v405_v20 = vld [vmem:[%s9467_s14 + $0x98] sm:$0x1]  ;;  %s9472_s4 = sld [smem:[#allocation46_spill]] }
 0x123   :  { %6120 = vmatprep.subr.msk.mxu0 %vm418_vm0, %v402_v11  ;;  %6123 = vmatprep.subr.msk.mxu1 %vm418_vm0, %v404_v12  ;;  %v407_v21 = vld [vmem:[%s9467_s14 + $0xa8] sm:$0x1]  ;;  %v394_v23 = vld [vmem:[%s9467_s14 + $0x40] sm:$0xff]  ;;  %v396_v24 = vld [vmem:[%s9467_s14 + $0x50] sm:$0xff]  ;;  %s9473_s17 = sld [smem:[#allocation47_spill]]  ;;  %s8061_s29 = smov 64  }
 0x124   :  { %6121 = vmatpush1.msk.msra.mxu0 %vm418_vm0, %v401_v13  ;;  %6124 = vmatpush1.msk.msra.mxu1 %vm418_vm0, %v403_v14  ;;  %v395_v22 = vld [vmem:[%s9467_s14 + $0x48] sm:$0xff]  ;;  %v408_v25 = vld [vmem:[%s9468_s6] sm:$0xf]  ;;  %s9474_s10 = sld [smem:[#allocation49_spill]]  ;;  %s8062_s6 = smov 112  }
 0x125   :  { %624 = vmatprep.subr.mxu0 %v391_v15  ;;  %695 = vmatprep.subr.mxu1 %v393_v16  ;;  %v1093_v6 = vld [vmem:[%s9469_s19] sm:$0xff]  ;;  %v1094_v7 = vld [vmem:[%s9469_s19 + $0x8] sm:$0xff]  ;;  %s9475_s11 = sld [smem:[#allocation48_spill]] }
 0x126   :  { %625 = vmatpush1.msra.mxu0 %v390_v17  ;;  %658 = vmatprep.mubr.f32.mxu0 %v8047_v0  ;;  %s9476_s30 = sld [smem:[#allocation50_spill]] }
 0x127   :  { %696 = vmatpush1.msra.mxu1 %v392_v18  ;;  %729 = vmatprep.mubr.f32.mxu1 %v8047_v0  ;;  %s9477_s15 = sld [smem:[#allocation51_spill]] }
 0x128   :  { %6122 = vmatmul.mubr.msk.f32.vlgmr.msra.gmra.mxu0 %vm414_vm1, %v385_v10  ;;  %6125 = vmatmul.mubr.msk.f32.vlgmr.msra.gmra.mxu1 %vm414_vm1, %v385_v10  ;;  %s9478_s16 = sld [smem:[#allocation52_spill]] }
 0x129   :  { %6126 = vmatprep.subr.msk.mxu0 %vm418_vm0, %v406_v19  ;;  %6774 = vmatprep.subr.mxu1 %v8047_v0  ;;  %s9479_s24 = sld [smem:[#allocation53_spill]] }
 0x12a   :  { %6127 = vmatpush1.msk.msra.mxu0 %vm418_vm0, %v405_v20  ;;  %6775 = vmatpush3.msk.msra.mxu1 %vm418_vm0, %v407_v21  ;;  %s9480_s0 = sld [smem:[#allocation54_spill]] }
 0x12b   :  { %766 = vmatprep.subr.mxu0 %v395_v22  ;;  %6776 = vmatprep.subr.mxu1 %v8047_v0  ;;  %s9481_s22 = sld [smem:[#allocation56_spill]] }
 0x12c   :  { %767 = vmatpush1.msra.mxu0 %v394_v23  ;;  %800 = vmatprep.mubr.f32.mxu0 %v8047_v0  ;;  %s9482_s14 = sld [smem:[#allocation59_spill]] }
 0x12d   :  { %6777 = vmatpush3.msra.mxu1 %v396_v24  ;;  %6778 = vmatprep.mubr.msk.f32.mxu1 %vm8049_vm2, %v8047_v0 }
 0x12e   :  { %6128 = vmatmul.mubr.msk.f32.vlgmr.msra.gmra.mxu0 %vm414_vm1, %v385_v10  ;;  %6779 = vmatmul.mubr.msk.f32.vlgmr.msra.gmra.mxu1 %vm414_vm1, %v385_v10  ;;  %vm1044_vm1 = vcmask 973824  }
 0x12f   :  { %411 = vperm.xlu0 %7529, %v408_v25   ;;  %1195 = vmatprep.mubr.f32.mxu0 %v8047_v0 }
 0x130   :  { %1272 = vmatprep.mubr.f32.mxu1 %v8047_v0 }
 0x1aa   :  { %v8373_v26 = vpop.permute.xlu0 %411 }
 0x1e2   :  { %v518_v27 = vpop.f32.mrf.mxu0  ;;  %v589_v28 = vpop.f32.mrf.mxu1 }
 0x1e3   :  { %v519_v29 = vadd.f32 %v518_v27, %v8373_v26  ;;  %v590_v30 = vadd.f32 %v589_v28, %v8373_v26 }
 0x1e4   :  { %v520_v31 = vpop.f32.mrf.mxu0  ;;  %v591_v32 = vpop.f32.mrf.mxu1 }
 0x1e5   :  { %v877_v33 = vmax.f32 %v519_v29, 0.0  ;;  %v879_v34 = vmax.f32 %v590_v30, 0.0  ;;  %v521_v35 = vadd.f32 %v520_v31, %v8373_v26  ;;  %v592_v39 = vadd.f32 %v591_v32, %v8373_v26 }
 0x1e7   :  { %888 = vst [vmem:[#allocation2] sm:$0xf] %v877_v33  ;;  %v878_v36 = vmax.f32 %v521_v35, 0.0  ;;  %958 = vrot.lane.b32.xlu1 %v879_v34, %s8050_s13  ;;  %921 = vrot.lane.b32.xlu0 %v877_v33, %s8051_s9  ;;  %891 = vst.msk [vmem:[#allocation2 + $0x10] sm:$0xf] %vm890_vm3, %v879_v34  ;;  %v880_v43 = vmax.f32 %v592_v39, 0.0 }
 0x1e8   :  { %v731_v37 = vpop.f32.mrf.mxu1  ;;  %v660_v40 = vpop.f32.mrf.mxu0  ;;  %v896_v46 = vrot.slane %v879_v34, 4 }
 0x1e9   :  { %889 = vst [vmem:[#allocation2 + $0x8] sm:$0xf] %v878_v36  ;;  %v661_v44 = vadd.f32 %v660_v40, %v8373_v26  ;;  %v732_v45 = vadd.f32 %v731_v37, %v8373_v26  ;;  %v897_v47 = vrot.slane %v880_v43, 4 }
 0x1ea   :  { %v733_v38 = vpop.f32.mrf.mxu1  ;;  %v662_v51 = vpop.f32.mrf.mxu0 }
 0x1eb   :  { %956 = vrot.lane.b32.xlu0 %v878_v36, %s8050_s13  ;;  %954 = vrot.lane.b32.xlu1 %v877_v33, %s8050_s13  ;;  %v881_v48 = vmax.f32 %v661_v44, 0.0  ;;  %v883_v49 = vmax.f32 %v732_v45, 0.0  ;;  %v663_v52 = vadd.f32 %v662_v51, %v8373_v26  ;;  %v734_v54 = vadd.f32 %v733_v38, %v8373_v26 }
 0x1ed   :  { %v898_v50 = vrot.slane %v881_v48, 4  ;;  %v882_v53 = vmax.f32 %v663_v52, 0.0  ;;  %v884_v55 = vmax.f32 %v734_v54, 0.0 }
 0x1ee   :  { %v873_v41 = vpop.f32.mrf.mxu1  ;;  %v802_v56 = vpop.f32.mrf.mxu0 }
 0x1ef   :  { %923 = vrot.lane.b32.xlu0 %v878_v36, %s8051_s9  ;;  %925 = vrot.lane.b32.xlu1 %v879_v34, %s8051_s9  ;;  %v803_v57 = vadd.f32 %v802_v56, %v8373_v26  ;;  %v993_v58 = vrot.slane %v884_v55, 4  ;;  %v899_v59 = vrot.slane %v882_v53, 4  ;;  %v874_v1 = vadd.f32 %v873_v41, %v8373_v26 }
 0x1f0   :  { %v6780_v42 = vpop.f32.mrf.mxu1  ;;  %v804_v60 = vpop.f32.mrf.mxu0 }
 0x1f1   :  { %v885_v61 = vmax.f32 %v803_v57, 0.0  ;;  %v805_v62 = vadd.f32 %v804_v60, %v8373_v26  ;;  %v887_v3 = vmax.f32 %v874_v1, 0.0  ;;  %v8430_v42 = vld [vmem:[#allocation6] sm:$0xff] }
 0x1f3   :  { %900 = vrot.lane.b32.xlu0 %v896_v46, %s8052_s18  ;;  %936 = vrot.lane.b32.xlu1 %v896_v46, %s8053_s23  ;;  %v994_v63 = vrot.slane %v885_v61, 4  ;;  %v886_v2 = vmax.f32 %v805_v62, 0.0  ;;  %v996_v5 = vrot.slane %v887_v3, 4 }
 0x1f5   :  { %v995_v4 = vrot.slane %v886_v2, 4 }
 0x1f7   :  { %938 = vrot.lane.b32.xlu0 %v897_v47, %s8053_s23  ;;  %1021 = vrot.lane.b32.xlu1 %v883_v49, %s8054_s26 }
 0x1fb   :  { %902 = vrot.lane.b32.xlu0 %v897_v47, %s8052_s18  ;;  %940 = vrot.lane.b32.xlu1 %v898_v50, %s8053_s23 }
 0x1ff   :  { %1058 = vrot.lane.b32.xlu0 %v883_v49, %s8055_s28  ;;  %904 = vrot.lane.b32.xlu1 %v898_v50, %s8052_s18 }
 0x203   :  { %973 = vrot.lane.b32.xlu0 %v883_v49, %s8056_s8  ;;  %1056 = vrot.lane.b32.xlu1 %v882_v53, %s8055_s28  ;;  %v8440_v49 = vld [vmem:[#allocation6 + $0x8] sm:$0xff] }
 0x207   :  { %1019 = vrot.lane.b32.xlu0 %v882_v53, %s8054_s26  ;;  %1060 = vrot.lane.b32.xlu1 %v884_v55, %s8055_s28  ;;  %s9488_s28 = sld [smem:[#allocation64_spill]] }
 0x20b   :  { %1023 = vrot.lane.b32.xlu0 %v884_v55, %s8054_s26  ;;  %971 = vrot.lane.b32.xlu1 %v882_v53, %s8056_s8  ;;  %s9487_s26 = sld [smem:[#allocation63_spill]] }
 0x20f   :  { %1036 = vrot.lane.b32.xlu0 %v993_v58, %s8057_s1  ;;  %942 = vrot.lane.b32.xlu1 %v899_v59, %s8053_s23  ;;  %s9486_s23 = sld [smem:[#allocation65_spill]] }
 0x213   :  { %906 = vrot.lane.b32.xlu0 %v899_v59, %s8052_s18  ;;  %997 = vrot.lane.b32.xlu1 %v993_v58, %s8058_s2  ;;  %s9485_s18 = sld [smem:[#allocation62_spill]] }
 0x217   :  { %1038 = vrot.lane.b32.xlu0 %v994_v63, %s8057_s1  ;;  %999 = vrot.lane.b32.xlu1 %v994_v63, %s8058_s2 }
 0x21b   :  { %1001 = vrot.lane.b32.xlu0 %v995_v4, %s8058_s2  ;;  %1040 = vrot.lane.b32.xlu1 %v995_v4, %s8057_s1 }
 0x21f   :  { %975 = vrot.lane.b32.xlu0 %v884_v55, %s8056_s8  ;;  %1042 = vrot.lane.b32.xlu1 %v996_v5, %s8057_s1  ;;  %s8063_s8 = smov [#allocation30]  }
 0x220   :  { %s6055_s1 = sshll.u32 %s8063_s8, 4  ;;  %s6056_s1 = int_to_ptr.vmem [resolvable:$true] %s6055_s1 }
 0x221   :  { %s7946_s19 = scalar_lea.vmem %s6056_s1, 32  ;;  %p7951_p2 = scmp.lt.s32.totalorder %s6056_s1, %s6056_s1 }
 0x222   :  { %p7947_p1 = scmp.ne.s32.totalorder %s6056_s1, %s7946_s19  ;;  %p7952_p3 = scmp.lt.s32.totalorder %s7946_s19, %s7946_s19 }
 0x223   :  { %1097 = vperm.xlu0 %7529, %v1093_v6   ;;  %1003 = vrot.lane.b32.xlu1 %v996_v5, %s8058_s2 }
 0x224   :  { %p7953_p4 = por %p7952_p3, %p7951_p2 }
 0x226   :  { %p7954_p5 = pnand %p7953_p4, %p7947_p1 }
 0x227   :  { %1102 = vperm.xlu1 %7530, %v1094_v7  }
 0x259   :  { %v959_v8 = vpop.permute.xlu1 %958  ;;  %v922_v9 = vpop.permute.xlu0 %921 }
 0x25a   :  { %968 = vst.msk [vmem:[#allocation2 + $0x70] sm:$0xf] %vm890_vm3, %v959_v8 }
 0x25d   :  { %v957_v10 = vpop.permute.xlu0 %956  ;;  %v955_v11 = vpop.permute.xlu1 %954 }
 0x25e   :  { %v962_v12 = vsel %vm960_vm4, %v957_v10, %v959_v8  ;;  %v961_v13 = vsel %vm960_vm4, %v955_v11, %v957_v10 }
 0x25f   :  { %967 = vst [vmem:[#allocation2 + $0x68] sm:$0xf] %v962_v12  ;;  %966 = vst [vmem:[#allocation2 + $0x60] sm:$0xf] %v961_v13 }
 0x261   :  { %v924_v14 = vpop.permute.xlu0 %923  ;;  %v926_v15 = vpop.permute.xlu1 %925 }
 0x262   :  { %v928_v16 = vsel %vm927_vm5, %v922_v9, %v924_v14  ;;  %v929_v17 = vsel %vm927_vm5, %v924_v14, %v926_v15  ;;  %935 = vst.msk [vmem:[#allocation2 + $0x40] sm:$0xf] %vm890_vm3, %v926_v15  ;;  %vm1005_vm3 = vcmask 982016  }
 0x263   :  { %933 = vst [vmem:[#allocation2 + $0x30] sm:$0xf] %v928_v16  ;;  %934 = vst [vmem:[#allocation2 + $0x38] sm:$0xf] %v929_v17 }
 0x265   :  { %v901_v18 = vpop.permute.xlu0 %900  ;;  %v937_v19 = vpop.permute.xlu1 %936 }
 0x266   :  { %v1088_v20 = vld [vmem:[#allocation2 + $0x68] sm:$0xf]  ;;  %v1087_v21 = vld [vmem:[#allocation2 + $0x60] sm:$0xf] }
 0x267   :  { %6131 = vmatprep.subr.msk.mxu0 %vm1112_vm6, %v1088_v20 }
 0x268   :  { %6132 = vmatpush1.msk.msra.mxu0 %vm1112_vm6, %v1087_v21 }
 0x269   :  { %v939_v22 = vpop.permute.xlu0 %938  ;;  %v1022_v23 = vpop.permute.xlu1 %1021 }
 0x26a   :  { %v945_v24 = vsel %vm944_vm7, %v937_v19, %v939_v22 }
 0x26b   :  { %951 = vst [vmem:[#allocation2 + $0x30] sm:$0xf0] %v945_v24 }
 0x26d   :  { %v903_v25 = vpop.permute.xlu0 %902  ;;  %v941_v26 = vpop.permute.xlu1 %940 }
 0x26e   :  { %v909_v27 = vsel %vm908_vm8, %v901_v18, %v903_v25  ;;  %v946_v28 = vsel %vm944_vm7, %v939_v22, %v941_v26 }
 0x26f   :  { %915 = vst [vmem:[#allocation2] sm:$0xf0] %v909_v27  ;;  %952 = vst [vmem:[#allocation2 + $0x38] sm:$0xf0] %v946_v28 }
 0x271   :  { %v1059_v29 = vpop.permute.xlu0 %1058  ;;  %v905_v30 = vpop.permute.xlu1 %904 }
 0x272   :  { %v910_v31 = vsel %vm908_vm8, %v903_v25, %v905_v30  ;;  %v1081_v36 = vld [vmem:[#allocation2 + $0x30] sm:$0xff] }
 0x273   :  { %916 = vst [vmem:[#allocation2 + $0x8] sm:$0xf0] %v910_v31 }
 0x275   :  { %v8422_v32 = vpop.permute.xlu0 %973  ;;  %v1057_v33 = vpop.permute.xlu1 %1056 }
 0x276   :  { %v1063_v34 = vsel %vm1062_vm10, %v1057_v33, %v1059_v29  ;;  %1069 = vst.msk [vmem:[#allocation2 + $0x70] sm:$0xf] %vm984_vm9, %v1057_v33  ;;  %v1082_v35 = vld [vmem:[#allocation2 + $0x38] sm:$0xff]  ;;  %v1075_v43 = vld [vmem:[#allocation2] sm:$0xff] }
 0x277   :  { %1070 = vst [vmem:[#allocation2 + $0x78] sm:$0xf] %v1063_v34  ;;  %1159 = vmatprep.subr.mxu0 %v1082_v35 }
 0x278   :  { %1160 = vmatpush1.msra.mxu0 %v1081_v36 }
 0x279   :  { %v1020_v37 = vpop.permute.xlu0 %1019  ;;  %v1061_v38 = vpop.permute.xlu1 %1060 }
 0x27a   :  { %v1026_v39 = vsel %vm1025_vm11, %v1020_v37, %v1022_v23  ;;  %1032 = vst.msk [vmem:[#allocation2 + $0x40] sm:$0xf] %vm984_vm9, %v1020_v37  ;;  %v1064_v40 = vsel %vm1062_vm10, %v1059_v29, %v1061_v38  ;;  %v1076_v41 = vld [vmem:[#allocation2 + $0x8] sm:$0xff]  ;;  %vm2190_vm10 = vcmask 1046528  }
 0x27b   :  { %1072 = vst.msk [vmem:[#allocation2 + $0x88] sm:$0xf] %vm988_vm12, %v1061_v38  ;;  %1033 = vst [vmem:[#allocation2 + $0x48] sm:$0xf] %v1026_v39  ;;  %1161 = vmatprep.subr.mxu0 %v1076_v41 }
 0x27c   :  { %1071 = vst [vmem:[#allocation2 + $0x80] sm:$0xf] %v1064_v40  ;;  %1162 = vmatpush1.msra.mxu0 %v1075_v43 }
 0x27d   :  { %v1024_v44 = vpop.permute.xlu0 %1023  ;;  %v972_v45 = vpop.permute.xlu1 %971  ;;  %6133 = vmatmul.mubr.msk.f32.vlgmr.msra.gmra.mxu0 %vm1105_vm13, %v8430_v42  ;;  %v1089_v50 = vld [vmem:[#allocation2 + $0x70] sm:$0xf] }
 0x27e   :  { %v1027_v46 = vsel %vm1025_vm11, %v1022_v23, %v1024_v44  ;;  %1035 = vst.msk [vmem:[#allocation2 + $0x58] sm:$0xf] %vm988_vm12, %v1024_v44  ;;  %v978_v47 = vsel %vm977_vm14, %v972_v45, %v8422_v32  ;;  %v1090_v48 = vld [vmem:[#allocation2 + $0x78] sm:$0xf]  ;;  %1201 = vmatprep.mubr.f32.mxu0 %v8047_v0  ;;  %vm2420_vm11 = vcmask 1045504  }
 0x27f   :  { %985 = vst.msk [vmem:[#allocation2 + $0x10] sm:$0xf] %vm984_vm9, %v972_v45  ;;  %1034 = vst [vmem:[#allocation2 + $0x50] sm:$0xf] %v1027_v46  ;;  %6135 = vmatprep.subr.msk.mxu1 %vm1112_vm6, %v1090_v48  ;;  %vm1013_vm9 = vcmask 1048076  }
 0x280   :  { %986 = vst [vmem:[#allocation2 + $0x18] sm:$0xf] %v978_v47  ;;  %6136 = vmatpush1.msk.msra.mxu1 %vm1112_vm6, %v1089_v50 }
 0x281   :  { %v1037_v51 = vpop.permute.xlu0 %1036  ;;  %v943_v52 = vpop.permute.xlu1 %942  ;;  %6134 = vmatmul.mubr.msk.f32.gmra.mxu0 %vm1105_vm13, %v8440_v49 }
 0x282   :  { %v1092_v53 = vld [vmem:[#allocation2 + $0x88] sm:$0xf]  ;;  %v947_v54 = vsel %vm944_vm7, %v941_v26, %v943_v52  ;;  %1349 = vmatprep.mubr.f32.mxu0 %v8047_v0  ;;  %vm1017_vm7 = vcmask 15364  }
 0x283   :  { %6139 = vmatprep.subr.msk.mxu0 %vm1112_vm6, %v1092_v53  ;;  %v1091_v55 = vld [vmem:[#allocation2 + $0x80] sm:$0xf]  ;;  %953 = vst.msk [vmem:[#allocation2 + $0x40] sm:$0xf0] %vm917_vm15, %v947_v54 }
 0x284   :  { %6140 = vmatpush1.msk.msra.mxu0 %vm1112_vm6, %v1091_v55 }
 0x285   :  { %v907_v56 = vpop.permute.xlu0 %906  ;;  %v998_v57 = vpop.permute.xlu1 %997 }
 0x286   :  { %v911_v58 = vsel %vm908_vm8, %v905_v30, %v907_v56  ;;  %vm2200_vm8 = vcmask 261120  }
 0x287   :  { %918 = vst.msk [vmem:[#allocation2 + $0x10] sm:$0xf0] %vm917_vm15, %v911_v58  ;;  %vm3728_vm15 = vcmask 523264  }
 0x289   :  { %v1039_v59 = vpop.permute.xlu0 %1038  ;;  %v1000_v60 = vpop.permute.xlu1 %999 }
 0x28a   :  { %v1045_v61 = vsel %vm1044_vm1, %v1037_v51, %v1039_v59  ;;  %v1006_v62 = vsel %vm1005_vm3, %v998_v57, %v1000_v60 }
 0x28b   :  { %1052 = vst.msk [vmem:[#allocation2 + $0x40] sm:$0xf0] %vm1013_vm9, %v1045_v61  ;;  %1014 = vst.msk [vmem:[#allocation2 + $0x10] sm:$0xf0] %vm1013_vm9, %v1006_v62  ;;  %vm5483_vm9 = vcmask 31744  }
 0x28d   :  { %v1002_v63 = vpop.permute.xlu0 %1001  ;;  %v1041_v1 = vpop.permute.xlu1 %1040 }
 0x28e   :  { %v1007_v2 = vsel %vm1005_vm3, %v1000_v60, %v1002_v63  ;;  %v1046_v3 = vsel %vm1044_vm1, %v1039_v59, %v1041_v1 }
 0x28f   :  { %1015 = vst [vmem:[#allocation2 + $0x18] sm:$0xf0] %v1007_v2  ;;  %1053 = vst [vmem:[#allocation2 + $0x48] sm:$0xf0] %v1046_v3 }
 0x291   :  { %v976_v4 = vpop.permute.xlu0 %975  ;;  %v1043_v5 = vpop.permute.xlu1 %1042 }
 0x292   :  { %v979_v6 = vsel %vm977_vm14, %v8422_v32, %v976_v4  ;;  %989 = vst.msk [vmem:[#allocation2 + $0x28] sm:$0xf] %vm988_vm12, %v976_v4  ;;  %v1047_v7 = vsel %vm1044_vm1, %v1041_v1, %v1043_v5  ;;  %v1083_v11 = vld [vmem:[#allocation2 + $0x40] sm:$0xff]  ;;  %v1077_v13 = vld [vmem:[#allocation2 + $0x10] sm:$0xff]  ;;  %vm2595_vm12 = vcmask 1041408   ;;  %vm3102_vm14 = vcmask 146432  }
 0x293   :  { %1055 = vst.msk [vmem:[#allocation2 + $0x58] sm:$0xf0] %vm1017_vm7, %v1043_v5  ;;  %987 = vst [vmem:[#allocation2 + $0x20] sm:$0xf] %v979_v6  ;;  %vm3993_vm1 = vcmask 80896  }
 0x294   :  { %1054 = vst [vmem:[#allocation2 + $0x50] sm:$0xf0] %v1047_v7 }
 0x295   :  { %v1004_v8 = vpop.permute.xlu1 %1003 }
 0x296   :  { %v1008_v9 = vsel %vm1005_vm3, %v1002_v63, %v1004_v8  ;;  %1018 = vst.msk [vmem:[#allocation2 + $0x28] sm:$0xf0] %vm1017_vm7, %v1004_v8  ;;  %v1084_v10 = vld [vmem:[#allocation2 + $0x48] sm:$0xff]  ;;  %v1078_v12 = vld [vmem:[#allocation2 + $0x18] sm:$0xff]  ;;  %vm5887_vm7 = vcmask 64512  }
 0x297   :  { %1016 = vst [vmem:[#allocation2 + $0x20] sm:$0xf0] %v1008_v9  ;;  %1236 = vmatprep.subr.mxu1 %v1084_v10 }
 0x298   :  { %1237 = vmatpush1.msra.mxu1 %v1083_v11 }
 0x299   :  { %1238 = vmatprep.subr.mxu1 %v1078_v12 }
 0x29a   :  { %v1086_v14 = vld [vmem:[#allocation2 + $0x58] sm:$0xff]  ;;  %1239 = vmatpush1.msra.mxu1 %v1077_v13 }
 0x29b   :  { %1313 = vmatprep.subr.mxu0 %v1086_v14  ;;  %v1085_v15 = vld [vmem:[#allocation2 + $0x50] sm:$0xff]  ;;  %6137 = vmatmul.mubr.msk.f32.vlgmr.msra.gmra.mxu1 %vm1105_vm13, %v8430_v42 }
 0x29c   :  { %1314 = vmatpush1.msra.mxu0 %v1085_v15  ;;  %1278 = vmatprep.mubr.f32.mxu1 %v8047_v0 }
 0x29d   :  { %v1080_v16 = vld [vmem:[#allocation2 + $0x28] sm:$0xff] }
 0x29e   :  { %1315 = vmatprep.subr.mxu0 %v1080_v16  ;;  %v1079_v17 = vld [vmem:[#allocation2 + $0x20] sm:$0xff]  ;;  %v1098_v21 = vpop.permute.xlu0 %1097 }
 0x29f   :  { %6138 = vmatmul.mubr.msk.f32.gmra.mxu1 %vm1105_vm13, %v8440_v49  ;;  %1316 = vmatpush1.msra.mxu0 %v1079_v17 }
 0x2a0   :  { %6141 = vmatmul.mubr.msk.f32.vlgmr.msra.gmra.mxu0 %vm1105_vm13, %v8430_v42 }
 0x2a1   :  { %1355 = vmatprep.mubr.f32.mxu0 %v8047_v0 }
 0x2a2   :  { %v1103_v31 = vpop.permute.xlu1 %1102 }
 0x2a4   :  { %6142 = vmatmul.mubr.msk.f32.gmra.mxu0 %vm1105_vm13, %v8440_v49  ;;  %vm2585_vm13 = vcmask 277504  }
 0x33d   :  { %v1197_v18 = vpop.f32.mrf.mxu0 }
 0x33e   :  { %v1198_v24 = vadd.f32 %v1197_v18, %v1098_v21 }
 0x33f   :  { %v1199_v19 = vpop.f32.mrf.mxu0 }
 0x340   :  { %v1200_v22 = vadd.f32 %v1199_v19, %v1098_v21  ;;  %v1362_v33 = vmax.f32 %v1198_v24, 0.0 }
 0x341   :  { %v1203_v20 = vpop.f32.mrf.mxu0 }
 0x342   :  { %v1363_v28 = vmax.f32 %v1200_v22, 0.0  ;;  %v1204_v47 = vadd.f32 %v1203_v20, %v1103_v31 }
 0x343   :  { %v1205_v26 = vpop.f32.mrf.mxu0 }
 0x344   :  { %v1206_v41 = vadd.f32 %v1205_v26, %v1103_v31  ;;  %v1368_v55 = vmax.f32 %v1204_v47, 0.0  ;;  %v1635_v47 = vld [vmem:[%s9470_s27 + $0x60] sm:$0xff] }
 0x346   :  { %v1369_v50 = vmax.f32 %v1206_v41, 0.0  ;;  %v1653_v41 = vld [vmem:[%s9470_s27 + $0xf0] sm:$0xff] }
 0x35b   :  { %v1274_v23 = vpop.f32.mrf.mxu1 }
 0x35c   :  { %v1275_v25 = vadd.f32 %v1274_v23, %v1098_v21 }
 0x35d   :  { %v1276_v27 = vpop.f32.mrf.mxu1 }
 0x35e   :  { %v1364_v29 = vmax.f32 %v1275_v25, 0.0  ;;  %v1277_v30 = vadd.f32 %v1276_v27, %v1098_v21 }
 0x35f   :  { %v1280_v32 = vpop.f32.mrf.mxu1 }
 0x360   :  { %v7531_v34 = vpack.i.bf16 %v1364_v29, %v1363_v28  ;;  %v1365_v35 = vmax.f32 %v1277_v30, 0.0  ;;  %v8470_v36 = vadd.f32 %v1280_v32, %v1103_v31  ;;  %v1351_v37 = vpop.f32.mrf.mxu0 }
 0x361   :  { %v1352_v38 = vadd.f32 %v1351_v37, %v1098_v21  ;;  %v1282_v39 = vpop.f32.mrf.mxu1 }
 0x362   :  { %v7536_v40 = vpack.i.bf16 %v1362_v33, %v1365_v35  ;;  %v8472_v42 = vadd.f32 %v1282_v39, %v1103_v31  ;;  %v1353_v43 = vpop.f32.mrf.mxu0  ;;  %7532 = vrot.lane.b32.xlu0 %v7531_v34, %s8051_s9  ;;  %v1370_v46 = vmax.f32 %v8470_v36, 0.0  ;;  %v1654_v39 = vld [vmem:[%s9470_s27 + $0xf8] sm:$0xff] }
 0x363   :  { %v1366_v44 = vmax.f32 %v1352_v38, 0.0  ;;  %v1354_v45 = vadd.f32 %v1353_v43, %v1098_v21  ;;  %6387 = vmatprep.subr.mxu1 %v1654_v39  ;;  %v1652_v43 = vld [vmem:[%s9470_s27 + $0xe8] sm:$0xff]  ;;  %v1663_v39 = vld [vmem:[%s9470_s27 + $0x140] sm:$0xff] }
 0x364   :  { %7537 = vrot.lane.b32.xlu1 %v7536_v40, %s8051_s9  ;;  %v1357_v48 = vpop.f32.mrf.mxu0  ;;  %v1371_v51 = vmax.f32 %v8472_v42, 0.0  ;;  %v7541_v54 = vpack.i.bf16 %v1370_v46, %v1369_v50  ;;  %v1638_v40 = vld [vmem:[%s9470_s27 + $0x78] sm:$0xff]  ;;  %v1637_v42 = vld [vmem:[%s9470_s27 + $0x70] sm:$0xff] }
 0x365   :  { %v1367_v49 = vmax.f32 %v1354_v45, 0.0  ;;  %v1358_v52 = vadd.f32 %v1357_v48, %v1103_v31  ;;  %6388 = vmatpush3.msra.mxu1 %v1638_v40  ;;  %v1651_v45 = vld [vmem:[%s9470_s27 + $0xe0] sm:$0xff]  ;;  %v1670_v48 = vld [vmem:[%s9470_s27 + $0x178] sm:$0xff]  ;;  %v1624_v40 = vld [vmem:[%s9470_s27 + $0x8] sm:$0xff] }
 0x366   :  { %1394 = vrot.lane.b32.xlu0 %v1366_v44, %s8051_s9  ;;  %v1359_v53 = vpop.f32.mrf.mxu0  ;;  %v7546_v57 = vpack.i.bf16 %v1368_v55, %v1371_v51  ;;  %6389 = vmatprep.subr.mxu1 %v1653_v41 }
 0x367   :  { %v1360_v56 = vadd.f32 %v1359_v53, %v1103_v31  ;;  %v1372_v58 = vmax.f32 %v1358_v52, 0.0  ;;  %6390 = vmatpush3.msra.mxu1 %v1637_v42  ;;  %v1634_v52 = vld [vmem:[%s9470_s27 + $0x58] sm:$0xff]  ;;  %v1684_v53 = vld [vmem:[%s9470_s27 + $0x1e8] sm:$0xff] }
 0x368   :  { %1396 = vrot.lane.b32.xlu1 %v1367_v49, %s8051_s9  ;;  %6391 = vmatprep.subr.mxu1 %v1652_v43 }
 0x369   :  { %v1373_v59 = vmax.f32 %v1360_v56, 0.0  ;;  %v1683_v56 = vld [vmem:[%s9470_s27 + $0x1e0] sm:$0xff] }
 0x36a   :  { %7542 = vrot.lane.b32.xlu0 %v7541_v54, %s8051_s9  ;;  %v1649_v54 = vld [vmem:[%s9470_s27 + $0xd0] sm:$0xff] }
 0x36c   :  { %7547 = vrot.lane.b32.xlu1 %v7546_v57, %s8051_s9  ;;  %v1633_v57 = vld [vmem:[%s9470_s27 + $0x50] sm:$0xff] }
 0x36e   :  { %1406 = vrot.lane.b32.xlu0 %v1372_v58, %s8051_s9 }
 0x370   :  { %1408 = vrot.lane.b32.xlu1 %v1373_v59, %s8051_s9  ;;  %s9484_s9 = sld [smem:[#allocation61_spill]] }
 0x3d4   :  { %v7533_v60 = vpop.permute.xlu0 %7532 }
 0x3d5   :  { %v7535_v61 = vunpack.i.h.bf16 %v7533_v60  ;;  %v7534_v62 = vunpack.i.l.bf16 %v7533_v60  ;;  %v1682_v60 = vld [vmem:[%s9470_s27 + $0x1d8] sm:$0xff] }
 0x3d6   :  { %v7538_v63 = vpop.permute.xlu1 %7537 }
 0x3d7   :  { %v1411_v1 = vsel %vm927_vm5, %v7534_v62, %v7535_v61  ;;  %v7540_v2 = vunpack.i.h.bf16 %v7538_v63  ;;  %v7539_v3 = vunpack.i.l.bf16 %v7538_v63  ;;  %v1647_v63 = vld [vmem:[%s9470_s27 + $0xc0] sm:$0xff] }
 0x3d8   :  { %v1395_v4 = vpop.permute.xlu0 %1394  ;;  %v8488_v8 = vmax.f32 %v1363_v28, %v1411_v1  ;;  %v1631_v1 = vld [vmem:[%s9470_s27 + $0x40] sm:$0xff] }
 0x3d9   :  { %v1410_v5 = vsel %vm927_vm5, %v7540_v2, %v7534_v62  ;;  %v1412_v6 = vsel %vm927_vm5, %v7535_v61, %v7539_v3  ;;  %v1413_v7 = vsel %vm927_vm5, %v7539_v3, %v1395_v4  ;;  %v1632_v61 = vld [vmem:[%s9470_s27 + $0x48] sm:$0xff]  ;;  %v1666_v62 = vld [vmem:[%s9470_s27 + $0x158] sm:$0xff] }
 0x3da   :  { %v8490_v9 = vmax.f32 %v1362_v33, %v1410_v5  ;;  %v8492_v10 = vmax.f32 %v1364_v29, %v1412_v6  ;;  %v8494_v11 = vmax.f32 %v1365_v35, %v1413_v7  ;;  %v1397_v12 = vpop.permute.xlu1 %1396  ;;  %v1646_v2 = vld [vmem:[%s9470_s27 + $0xb8] sm:$0xff]  ;;  %v1629_v5 = vld [vmem:[%s9470_s27 + $0x30] sm:$0xff]  ;;  %v1644_v6 = vld [vmem:[%s9470_s27 + $0xa8] sm:$0xff] }
 0x3db   :  { %v1414_v16 = vsel %vm927_vm5, %v1395_v4, %v1397_v12  ;;  %v8509_v24 = vmax.f32 %v1367_v49, %v1397_v12  ;;  %v1650_v49 = vld [vmem:[%s9470_s27 + $0xd8] sm:$0xff]  ;;  %v1645_v4 = vld [vmem:[%s9470_s27 + $0xb0] sm:$0xff]  ;;  %v1628_v7 = vld [vmem:[%s9470_s27 + $0x28] sm:$0xff] }
 0x3dc   :  { %v7543_v13 = vpop.permute.xlu0 %7542  ;;  %v7556_v14 = vpack.i.bf16 %v8490_v9, %v8494_v11  ;;  %v8500_v15 = vpack.i.bf16 %v8492_v10, %v8488_v8  ;;  %v8507_v23 = vmax.f32 %v1366_v44, %v1414_v16  ;;  %v1636_v44 = vld [vmem:[%s9470_s27 + $0x68] sm:$0xff]  ;;  %v1630_v3 = vld [vmem:[%s9470_s27 + $0x38] sm:$0xff]  ;;  %v1643_v12 = vld [vmem:[%s9470_s27 + $0xa0] sm:$0xff] }
 0x3dd   :  { %v7545_v17 = vunpack.i.h.bf16 %v7543_v13  ;;  %v7544_v18 = vunpack.i.l.bf16 %v7543_v13  ;;  %6392 = vmatpush3.msra.mxu1 %v1636_v44  ;;  %v1627_v13 = vld [vmem:[%s9470_s27 + $0x20] sm:$0xff]  ;;  %v1642_v16 = vld [vmem:[%s9470_s27 + $0x98] sm:$0xff] }
 0x3de   :  { %v7548_v19 = vpop.permute.xlu1 %7547  ;;  %7557 = vrot.lane.b32.xlu1 %v7556_v14, %s8050_s13  ;;  %7552 = vrot.lane.b32.xlu0 %v8500_v15, %s8050_s13  ;;  %v1681_v14 = vld [vmem:[%s9470_s27 + $0x1d0] sm:$0xff]  ;;  %v1678_v44 = vld [vmem:[%s9470_s27 + $0x1b8] sm:$0xff] }
 0x3df   :  { %v1416_v20 = vsel %vm927_vm5, %v7544_v18, %v7545_v17  ;;  %v7550_v21 = vunpack.i.h.bf16 %v7548_v19  ;;  %v7549_v22 = vunpack.i.l.bf16 %v7548_v19  ;;  %6393 = vmatprep.subr.mxu1 %v1651_v45  ;;  %v1639_v45 = vld [vmem:[%s9470_s27 + $0x80] sm:$0xff] }
 0x3e0   :  { %v1407_v25 = vpop.permute.xlu0 %1406  ;;  %v8511_v26 = vmax.f32 %v1369_v50, %v1416_v20  ;;  %v1685_v50 = vld [vmem:[%s9470_s27 + $0x1f0] sm:$0xff]  ;;  %6394 = vmatpush3.msra.mxu1 %v1635_v47  ;;  %v1626_v20 = vld [vmem:[%s9470_s27 + $0x18] sm:$0xff] }
 0x3e1   :  { %v1415_v27 = vsel %vm927_vm5, %v7550_v21, %v7544_v18  ;;  %v1417_v28 = vsel %vm927_vm5, %v7545_v17, %v7549_v22  ;;  %v1418_v29 = vsel %vm927_vm5, %v7549_v22, %v1407_v25  ;;  %6395 = vmatprep.subr.mxu1 %v1650_v49  ;;  %v1665_v17 = vld [vmem:[%s9470_s27 + $0x150] sm:$0xff]  ;;  %v1680_v21 = vld [vmem:[%s9470_s27 + $0x1c8] sm:$0xff] }
 0x3e2   :  { %v8516_v30 = vmax.f32 %v1368_v55, %v1415_v27  ;;  %v8518_v31 = vmax.f32 %v1370_v46, %v1417_v28  ;;  %v8520_v32 = vmax.f32 %v1371_v51, %v1418_v29  ;;  %v1409_v33 = vpop.permute.xlu1 %1408  ;;  %1466 = vrot.lane.b32.xlu1 %v8509_v24, %s8050_s13  ;;  %1464 = vrot.lane.b32.xlu0 %v8507_v23, %s8050_s13  ;;  %v1686_v46 = vld [vmem:[%s9470_s27 + $0x1f8] sm:$0xff]  ;;  %v1669_v51 = vld [vmem:[%s9470_s27 + $0x170] sm:$0xff] }
 0x3e3   :  { %v1419_v36 = vsel %vm927_vm5, %v1407_v25, %v1409_v33  ;;  %v8535_v38 = vmax.f32 %v1373_v59, %v1409_v33  ;;  %6425 = vmatprep.subr.mxu0 %v1686_v46  ;;  %v1668_v55 = vld [vmem:[%s9470_s27 + $0x168] sm:$0xff]  ;;  %6396 = vmatpush3.msra.mxu1 %v1634_v52  ;;  %v1641_v22 = vld [vmem:[%s9470_s27 + $0x90] sm:$0xff]  ;;  %v1662_v46 = vld [vmem:[%s9470_s27 + $0x138] sm:$0xff]  ;;  %vm1957_vm5 = vcmask 130048  }
 0x3e4   :  { %v7566_v34 = vpack.i.bf16 %v8516_v30, %v8520_v32  ;;  %v7561_v35 = vpack.i.bf16 %v8518_v31, %v8511_v26  ;;  %v8533_v37 = vmax.f32 %v1372_v58, %v1419_v36  ;;  %6426 = vmatpush3.msra.mxu0 %v1670_v48  ;;  %v1667_v58 = vld [vmem:[%s9470_s27 + $0x160] sm:$0xff]  ;;  %v1648_v59 = vld [vmem:[%s9470_s27 + $0xc8] sm:$0xff]  ;;  %6397 = vmatprep.subr.mxu1 %v1649_v54  ;;  %v1677_v52 = vld [vmem:[%s9470_s27 + $0x1b0] sm:$0xff] }
 0x3e5   :  { %6427 = vmatprep.subr.mxu0 %v1685_v50  ;;  %6398 = vmatpush3.msra.mxu1 %v1633_v57  ;;  %v1664_v33 = vld [vmem:[%s9470_s27 + $0x148] sm:$0xff]  ;;  %v1661_v54 = vld [vmem:[%s9470_s27 + $0x130] sm:$0xff] }
 0x3e6   :  { %7567 = vrot.lane.b32.xlu1 %v7566_v34, %s8050_s13  ;;  %7562 = vrot.lane.b32.xlu0 %v7561_v35, %s8050_s13  ;;  %v1625_v34 = vld [vmem:[%s9470_s27 + $0x10] sm:$0xff]  ;;  %v1679_v35 = vld [vmem:[%s9470_s27 + $0x1c0] sm:$0xff] }
 0x3e7   :  { %6428 = vmatpush3.msra.mxu0 %v1669_v51  ;;  %6399 = vmatprep.subr.mxu1 %v1648_v59  ;;  %v1640_v36 = vld [vmem:[%s9470_s27 + $0x88] sm:$0xff]  ;;  %v1623_v51 = vld [vmem:[%s9470_s27] sm:$0xff] }
 0x3e8   :  { %6429 = vmatprep.subr.mxu0 %v1684_v53  ;;  %6400 = vmatpush3.msra.mxu1 %v1632_v61  ;;  %v1660_v61 = vld [vmem:[%s9470_s27 + $0x128] sm:$0xff] }
 0x3e9   :  { %6430 = vmatpush3.msra.mxu0 %v1668_v55  ;;  %6401 = vmatprep.subr.mxu1 %v1647_v63 }
 0x3ea   :  { %1478 = vrot.lane.b32.xlu1 %v8535_v38, %s8050_s13  ;;  %1476 = vrot.lane.b32.xlu0 %v8533_v37, %s8050_s13  ;;  %s9483_s13 = sld [smem:[#allocation60_spill]] }
 0x3eb   :  { %6431 = vmatprep.subr.mxu0 %v1683_v56  ;;  %6402 = vmatpush3.msra.mxu1 %v1631_v1  ;;  %v8617_v56 = vld [vmem:[%s9470_s27 + $0x278] sm:$0x1] }
 0x3ec   :  { %6432 = vmatpush3.msra.mxu0 %v1667_v58  ;;  %6403 = vmatprep.subr.mxu1 %v1646_v2  ;;  %v1675_v2 = vld [vmem:[%s9470_s27 + $0x1a0] sm:$0xff] }
 0x3ed   :  { %6433 = vmatprep.subr.mxu0 %v1682_v60  ;;  %6404 = vmatpush3.msra.mxu1 %v1630_v3  ;;  %v1676_v60 = vld [vmem:[%s9470_s27 + $0x1a8] sm:$0xff]  ;;  %v1659_v3 = vld [vmem:[%s9470_s27 + $0x120] sm:$0xff] }
 0x3ee   :  { %6434 = vmatpush3.msra.mxu0 %v1666_v62  ;;  %6405 = vmatprep.subr.mxu1 %v1645_v4  ;;  %v1674_v4 = vld [vmem:[%s9470_s27 + $0x198] sm:$0xff] }
 0x3ef   :  { %6406 = vmatpush3.msra.mxu1 %v1629_v5  ;;  %6435 = vmatprep.subr.mxu0 %v1681_v14  ;;  %v1658_v5 = vld [vmem:[%s9470_s27 + $0x118] sm:$0xff]  ;;  %v1672_v14 = vld [vmem:[%s9470_s27 + $0x188] sm:$0xff] }
 0x3f0   :  { %6407 = vmatprep.subr.mxu1 %v1644_v6  ;;  %6436 = vmatpush3.msra.mxu0 %v1665_v17  ;;  %v1673_v6 = vld [vmem:[%s9470_s27 + $0x190] sm:$0xff] }
 0x3f1   :  { %6408 = vmatpush3.msra.mxu1 %v1628_v7  ;;  %6437 = vmatprep.subr.mxu0 %v1680_v21  ;;  %v1655_v21 = vld [vmem:[%s9470_s27 + $0x100] sm:$0xff] }
 0x3f2   :  { %6409 = vmatprep.subr.mxu1 %v1643_v12  ;;  %6438 = vmatpush3.msra.mxu0 %v1664_v33 }
 0x3f3   :  { %6410 = vmatpush3.msra.mxu1 %v1627_v13  ;;  %6439 = vmatprep.subr.mxu0 %v1679_v35  ;;  %v1657_v13 = vld [vmem:[%s9470_s27 + $0x110] sm:$0xff] }
 0x3f4   :  { %6411 = vmatprep.subr.mxu1 %v1642_v16  ;;  %6440 = vmatpush3.msra.mxu0 %v1663_v39  ;;  %v1656_v16 = vld [vmem:[%s9470_s27 + $0x108] sm:$0xff] }
 0x3f5   :  { %6412 = vmatpush3.msra.mxu1 %v1626_v20  ;;  %6441 = vmatprep.subr.mxu0 %v1678_v44 }
 0x3f6   :  { %6413 = vmatprep.subr.mxu1 %v1641_v22  ;;  %6442 = vmatpush3.msra.mxu0 %v1662_v46 }
 0x3f7   :  { %6414 = vmatpush3.msra.mxu1 %v1625_v34  ;;  %6443 = vmatprep.subr.mxu0 %v1677_v52 }
 0x3f8   :  { %6415 = vmatprep.subr.mxu1 %v1640_v36  ;;  %6444 = vmatpush3.msra.mxu0 %v1661_v54  ;;  %v1701_v54 = vld [vmem:[%s9470_s27 + $0x270] sm:$0xff] }
 0x3f9   :  { %6416 = vmatpush3.msra.mxu1 %v1624_v40  ;;  %6445 = vmatprep.subr.mxu0 %v1676_v60 }
 0x3fa   :  { %6417 = vmatprep.subr.mxu1 %v1639_v45  ;;  %6446 = vmatpush3.msra.mxu0 %v1660_v61 }
 0x3fb   :  { %6418 = vmatpush3.msra.mxu1 %v1623_v51  ;;  %6447 = vmatprep.subr.mxu0 %v1675_v2 }
 0x3fc   :  { %6781 = vmatprep.subr.msk.mxu1 %vm418_vm0, %v8617_v56  ;;  %6448 = vmatpush3.msra.mxu0 %v1659_v3 }
 0x3fd   :  { %6449 = vmatprep.subr.mxu0 %v1674_v4 }
 0x3fe   :  { %6450 = vmatpush3.msra.mxu0 %v1658_v5 }
 0x3ff   :  { %6451 = vmatprep.subr.mxu0 %v1673_v6 }
 0x400   :  { %6452 = vmatpush3.msra.mxu0 %v1657_v13 }
 0x401   :  { %6453 = vmatprep.subr.mxu0 %v1672_v14 }
 0x402   :  { %6454 = vmatpush3.msra.mxu0 %v1656_v16 }
 0x450   :  { %v7558_v18 = vpop.permute.xlu1 %7557  ;;  %v7553_v19 = vpop.permute.xlu0 %7552 }
 0x451   :  { %v7560_v25 = vunpack.i.h.bf16 %v7558_v18  ;;  %v7559_v27 = vunpack.i.l.bf16 %v7558_v18  ;;  %v7555_v28 = vunpack.i.h.bf16 %v7553_v19  ;;  %v7554_v29 = vunpack.i.l.bf16 %v7553_v19 }
 0x453   :  { %v1482_v41 = vsel %vm960_vm4, %v7555_v28, %v7559_v27  ;;  %v1480_v42 = vsel %vm960_vm4, %v7560_v25, %v7554_v29  ;;  %v1481_v43 = vsel %vm960_vm4, %v7554_v29, %v7555_v28  ;;  %v7591_v25 = vpack.i.bf16 %v8520_v32, %v8518_v31 }
 0x454   :  { %v8593_v47 = vpop.permute.xlu1 %1466  ;;  %v8595_v48 = vpop.permute.xlu0 %1464  ;;  %v8598_v49 = vmax.f32 %v8488_v8, %v1481_v43  ;;  %v8601_v50 = vmax.f32 %v8492_v10, %v1482_v41  ;;  %v8614_v10 = vmax.f32 %v8490_v9, %v1480_v42 }
 0x455   :  { %v1483_v53 = vsel %vm960_vm4, %v7559_v27, %v8595_v48 }
 0x456   :  { %v8609_v55 = vmax.f32 %v8494_v11, %v1483_v53  ;;  %v7571_v8 = vpack.i.bf16 %v8601_v50, %v8598_v49 }
 0x458   :  { %v7568_v57 = vpop.permute.xlu1 %7567  ;;  %v7563_v58 = vpop.permute.xlu0 %7562  ;;  %7572 = vrot.lane.b32.xlu0 %v7571_v8, %s8059_s12  ;;  %v7581_v59 = vpack.i.bf16 %v8609_v55, %v8614_v10 }
 0x459   :  { %v7569_v62 = vunpack.i.l.bf16 %v7568_v57  ;;  %v7565_v63 = vunpack.i.h.bf16 %v7563_v58  ;;  %v7564_v1 = vunpack.i.l.bf16 %v7563_v58  ;;  %v7570_v20 = vunpack.i.h.bf16 %v7568_v57  ;;  %v1699_v58 = vld [vmem:[%s9470_s27 + $0x260] sm:$0xff] }
 0x45a   :  { %7582 = vrot.lane.b32.xlu1 %v7581_v59, %s8059_s12 }
 0x45b   :  { %v1487_v7 = vsel %vm960_vm4, %v7565_v63, %v7569_v62  ;;  %v1486_v12 = vsel %vm960_vm4, %v7564_v1, %v7565_v63  ;;  %v1485_v28 = vsel %vm960_vm4, %v7570_v20, %v7564_v1  ;;  %v1698_v1 = vld [vmem:[%s9470_s27 + $0x258] sm:$0xff] }
 0x45c   :  { %7577 = vrot.lane.b32.xlu0 %v8500_v15, %s8058_s2  ;;  %v1477_v17 = vpop.permute.xlu0 %1476  ;;  %v7586_v15 = vpack.i.bf16 %v8511_v26, %v8494_v11  ;;  %v8646_v18 = vmax.f32 %v8511_v26, %v1486_v12  ;;  %v8649_v19 = vmax.f32 %v8518_v31, %v1487_v7  ;;  %v1479_v22 = vpop.permute.xlu1 %1478  ;;  %v1484_v11 = vsel %vm960_vm4, %v8595_v48, %v8593_v47  ;;  %v1697_v7 = vld [vmem:[%s9470_s27 + $0x250] sm:$0xff] }
 0x45d   :  { %v1488_v26 = vsel %vm960_vm4, %v7569_v62, %v1477_v17  ;;  %v1489_v29 = vsel %vm960_vm4, %v1477_v17, %v1479_v22  ;;  %v8667_v31 = vmax.f32 %v8507_v23, %v1484_v11  ;;  %v8679_v35 = vmax.f32 %v8516_v30, %v1485_v28 }
 0x45e   :  { %1569 = vrot.lane.b32.xlu1 %v8490_v9, %s8058_s2  ;;  %v1671_v9 = vld [vmem:[%s9470_s27 + $0x180] sm:$0xff]  ;;  %v7596_v27 = vpack.i.bf16 %v8649_v19, %v8646_v18  ;;  %v8670_v33 = vmax.f32 %v8520_v32, %v1488_v26  ;;  %v8674_v34 = vmax.f32 %v8533_v37, %v1489_v29  ;;  %vm1540_vm4 = vcmask 1014784  }
 0x45f   :  { %6455 = vmatprep.subr.mxu0 %v1671_v9  ;;  %v1696_v9 = vld [vmem:[%s9470_s27 + $0x248] sm:$0xff]  ;;  %v1695_v26 = vld [vmem:[%s9470_s27 + $0x240] sm:$0xff] }
 0x460   :  { %1577 = vrot.lane.b32.xlu0 %v8507_v23, %s8058_s2  ;;  %6456 = vmatpush3.msra.mxu0 %v1655_v21  ;;  %v7601_v23 = vpack.i.bf16 %v8679_v35, %v8670_v33 }
 0x461   :  { %6816 = vmatprep.subr.mxu0 %v8047_v0 }
 0x462   :  { %7587 = vrot.lane.b32.xlu1 %v7586_v15, %s8058_s2 }
 0x464   :  { %7592 = vrot.lane.b32.xlu0 %v7591_v25, %s8058_s2 }
 0x466   :  { %7597 = vrot.lane.b32.xlu1 %v7596_v27, %s8059_s12 }
 0x468   :  { %1528 = vrot.lane.b32.xlu0 %v8667_v31, %s8059_s12 }
 0x46a   :  { %1538 = vrot.lane.b32.xlu1 %v8674_v34, %s8059_s12 }
 0x46c   :  { %7602 = vrot.lane.b32.xlu0 %v7601_v23, %s8059_s12 }
 0x46e   :  { %1589 = vrot.lane.b32.xlu1 %v8533_v37, %s8058_s2 }
 0x470   :  { %1581 = vrot.lane.b32.xlu0 %v8516_v30, %s8058_s2 }
 0x472   :  { %1579 = vrot.lane.b32.xlu1 %v8509_v24, %s8058_s2 }
 0x474   :  { %1591 = vrot.lane.b32.xlu0 %v8535_v38, %s8058_s2 }
 0x4ca   :  { %v7573_v32 = vpop.permute.xlu0 %7572 }
 0x4cb   :  { %v7575_v36 = vunpack.i.h.bf16 %v7573_v32  ;;  %v7574_v39 = vunpack.i.l.bf16 %v7573_v32  ;;  %v1694_v32 = vld [vmem:[%s9470_s27 + $0x238] sm:$0xff] }
 0x4cc   :  { %v7583_v40 = vpop.permute.xlu1 %7582 }
 0x4cd   :  { %v1542_v41 = vsel %vm1540_vm4, %v7574_v39, %v7575_v36  ;;  %v7584_v42 = vunpack.i.l.bf16 %v7583_v40 }
 0x4ce   :  { %v7578_v43 = vpop.permute.xlu0 %7577  ;;  %v1560_v38 = vmax.f32 %v8598_v49, %v1542_v41  ;;  %v1700_v49 = vld [vmem:[%s9470_s27 + $0x268] sm:$0xff] }
 0x4cf   :  { %v7580_v37 = vunpack.i.h.bf16 %v7578_v43  ;;  %v7579_v44 = vunpack.i.l.bf16 %v7578_v43  ;;  %v1541_v30 = vsel %vm1540_vm4, %v7584_v42, %v7574_v39 }
 0x4d0   :  { %v1570_v45 = vpop.permute.xlu1 %1569  ;;  %v1559_v24 = vmax.f32 %v8614_v10, %v1541_v30  ;;  %v7585_v10 = vunpack.i.h.bf16 %v7583_v40 }
 0x4d1   :  { %v1593_v46 = vsel %vm1005_vm3, %v1570_v45, %v7579_v44  ;;  %v1594_v47 = vsel %vm1005_vm3, %v7579_v44, %v7580_v37  ;;  %v1693_v44 = vld [vmem:[%s9470_s27 + $0x230] sm:$0xff] }
 0x4d2   :  { %v1613_v48 = vmax.f32 %v1559_v24, %v1593_v46  ;;  %v8700_v51 = vpop.permute.xlu0 %1577  ;;  %v1614_v52 = vmax.f32 %v1560_v38, %v1594_v47  ;;  %v1543_v2 = vsel %vm1540_vm4, %v7575_v36, %v7585_v10  ;;  %v1692_v24 = vld [vmem:[%s9470_s27 + $0x228] sm:$0xff]  ;;  %v1690_v38 = vld [vmem:[%s9470_s27 + $0x218] sm:$0xff]  ;;  %v1689_v46 = vld [vmem:[%s9470_s27 + $0x210] sm:$0xff] }
 0x4d3   :  { %v1561_v17 = vmax.f32 %v8601_v50, %v1543_v2 }
 0x4d4   :  { %1777 = vmatprep.mubr.f32.mxu1 %v1614_v52  ;;  %v8702_v53 = vpop.permute.xlu1 %7587  ;;  %v1687_v52 = vld [vmem:[%s9470_s27 + $0x200] sm:$0xff] }
 0x4d5   :  { %1778 = vmatmul.mubr.f32.vlgmr.msra.gmra.mxu1 %v1613_v48  ;;  %v7589_v59 = vunpack.i.l.bf16 %v8702_v53  ;;  %v1688_v48 = vld [vmem:[%s9470_s27 + $0x208] sm:$0xff] }
 0x4d6   :  { %6782 = vmatpush3.msk.msra.mxu1 %vm418_vm0, %v8617_v56  ;;  %v7593_v8 = vpop.permute.xlu0 %7592  ;;  %v7590_v56 = vunpack.i.h.bf16 %v8702_v53  ;;  %vm1703_vm0 = vcmask 990208  }
 0x4d7   :  { %6783 = vmatprep.subr.mxu1 %v1701_v54  ;;  %v7594_v60 = vunpack.i.l.bf16 %v7593_v8  ;;  %v1595_v13 = vsel %vm1005_vm3, %v7580_v37, %v7589_v59  ;;  %v1596_v16 = vsel %vm1005_vm3, %v7589_v59, %v8700_v51  ;;  %v7595_v21 = vunpack.i.h.bf16 %v7593_v8 }
 0x4d8   :  { %6784 = vmatpush3.msra.mxu1 %v1701_v54  ;;  %v7598_v57 = vpop.permute.xlu1 %7597 }
 0x4d9   :  { %v7600_v61 = vunpack.i.h.bf16 %v7598_v57  ;;  %v7599_v62 = vunpack.i.l.bf16 %v7598_v57  ;;  %6785 = vmatprep.subr.mxu1 %v1700_v49  ;;  %v1599_v14 = vsel %vm1005_vm3, %v7590_v56, %v7594_v60  ;;  %v1600_v42 = vsel %vm1005_vm3, %v7594_v60, %v7595_v21 }
 0x4da   :  { %6786 = vmatpush3.msra.mxu1 %v1700_v49  ;;  %v1529_v63 = vpop.permute.xlu0 %1528 }
 0x4db   :  { %v1546_v3 = vsel %vm1540_vm4, %v7599_v62, %v7600_v61  ;;  %v1544_v4 = vsel %vm1540_vm4, %v7585_v10, %v1529_v63  ;;  %6787 = vmatprep.subr.mxu1 %v1699_v58 }
 0x4dc   :  { %v1562_v5 = vmax.f32 %v8609_v55, %v1544_v4  ;;  %6788 = vmatpush3.msra.mxu1 %v1699_v58  ;;  %v8716_v6 = vpop.permute.xlu1 %1538  ;;  %v1565_v12 = vmax.f32 %v8646_v18, %v1546_v3  ;;  %v1615_v18 = vmax.f32 %v1561_v17, %v1595_v13  ;;  %v6149_v17 = vld [vmem:[%s9471_s7 + $0x40] sm:$0xff] }
 0x4dd   :  { %6789 = vmatprep.subr.mxu1 %v1698_v1  ;;  %v1568_v53 = vmax.f32 %v8674_v34, %v8716_v6 }
 0x4de   :  { %6790 = vmatpush3.msra.mxu1 %v1698_v1  ;;  %v7603_v15 = vpop.permute.xlu0 %7602  ;;  %v1619_v55 = vmax.f32 %v1565_v12, %v1599_v14  ;;  %v1616_v20 = vmax.f32 %v1562_v5, %v1596_v16  ;;  %v6146_v12 = vld [vmem:[%s9471_s7 + $0x28] sm:$0xff]  ;;  %v6147_v14 = vld [vmem:[%s9471_s7 + $0x30] sm:$0xff]  ;;  %v6148_v16 = vld [vmem:[%s9471_s7 + $0x38] sm:$0xff] }
 0x4df   :  { %v7605_v22 = vunpack.i.h.bf16 %v7603_v15  ;;  %v7604_v25 = vunpack.i.l.bf16 %v7603_v15  ;;  %6791 = vmatprep.subr.mxu1 %v1697_v7  ;;  %v6150_v15 = vld [vmem:[%s9471_s7 + $0x48] sm:$0xf] }
 0x4e0   :  { %6792 = vmatpush3.msra.mxu1 %v1697_v7  ;;  %v1590_v11 = vpop.permute.xlu1 %1589  ;;  %1782 = vmatprep.mubr.f32.mxu1 %v1619_v55  ;;  %v1938_v55 = vld [vmem:[%s9471_s7] sm:$0xff] }
 0x4e1   :  { %v1547_v27 = vsel %vm1540_vm4, %v7600_v61, %v7604_v25  ;;  %v1548_v50 = vsel %vm1540_vm4, %v7604_v25, %v8716_v6  ;;  %1852 = vmatprep.mubr.f32.mxu0 %v1616_v20  ;;  %6793 = vmatprep.subr.mxu1 %v1696_v9  ;;  %v1545_v23 = vsel %vm1540_vm4, %v7605_v22, %v7599_v62  ;;  %v1939_v20 = vld [vmem:[%s9471_s7 + $0x8] sm:$0xff]  ;;  %v1942_v22 = vld [vmem:[%s9471_s7 + $0x20] sm:$0xf]  ;;  %v2175_v25 = vld [vmem:[%s9472_s4 + $0x38] sm:$0xff] }
 0x4e2   :  { %v1567_v28 = vmax.f32 %v8670_v33, %v1548_v50  ;;  %1853 = vmatmul.mubr.f32.vlgmr.msra.gmra.mxu0 %v1615_v18  ;;  %6794 = vmatpush3.msra.mxu1 %v1696_v9  ;;  %v1582_v29 = vpop.permute.xlu0 %1581  ;;  %v1566_v36 = vmax.f32 %v8649_v19, %v1547_v27  ;;  %v1601_v39 = vsel %vm1005_vm3, %v7595_v21, %v1590_v11  ;;  %v1940_v9 = vld [vmem:[%s9471_s7 + $0x10] sm:$0xff]  ;;  %v1941_v21 = vld [vmem:[%s9471_s7 + $0x18] sm:$0xff] }
 0x4e3   :  { %v1564_v40 = vmax.f32 %v8679_v35, %v1545_v23  ;;  %v1598_v41 = vsel %vm1005_vm3, %v1582_v29, %v7590_v56  ;;  %6795 = vmatprep.subr.mxu1 %v1695_v26  ;;  %v1563_v33 = vmax.f32 %v8667_v31, %v1529_v63  ;;  %v1691_v31 = vld [vmem:[%s9470_s27 + $0x220] sm:$0xff]  ;;  %v2174_v18 = vld [vmem:[%s9472_s4 + $0x30] sm:$0xff]  ;;  %v2171_v27 = vld [vmem:[%s9472_s4 + $0x18] sm:$0xff] }
 0x4e4   :  { %v1621_v43 = vmax.f32 %v1567_v28, %v1601_v39  ;;  %6796 = vmatpush3.msra.mxu1 %v1695_v26  ;;  %v1580_v37 = vpop.permute.xlu1 %1579  ;;  %v1620_v30 = vmax.f32 %v1566_v36, %v1600_v42  ;;  %v2172_v26 = vld [vmem:[%s9472_s4 + $0x20] sm:$0xff]  ;;  %v2170_v50 = vld [vmem:[%s9472_s4 + $0x10] sm:$0xff]  ;;  %v2169_v28 = vld [vmem:[%s9472_s4 + $0x8] sm:$0xff] }
 0x4e5   :  { %v1618_v45 = vmax.f32 %v1564_v40, %v1598_v41  ;;  %v1597_v19 = vsel %vm1005_vm3, %v8700_v51, %v1580_v37  ;;  %6797 = vmatprep.subr.mxu1 %v1694_v32  ;;  %v6168_v29 = vld [vmem:[%s9472_s4 + $0x78] sm:$0xff]  ;;  %v2168_v23 = vld [vmem:[%s9472_s4] sm:$0xff]  ;;  %v6166_v36 = vld [vmem:[%s9472_s4 + $0x68] sm:$0xff] }
 0x4e6   :  { %v1617_v35 = vmax.f32 %v1563_v33, %v1597_v19  ;;  %6798 = vmatpush3.msra.mxu1 %v1694_v32  ;;  %1857 = vmatprep.mubr.f32.mxu0 %v1621_v43  ;;  %v1592_v47 = vpop.permute.xlu0 %1591  ;;  %v6167_v32 = vld [vmem:[%s9472_s4 + $0x70] sm:$0xff]  ;;  %v6165_v39 = vld [vmem:[%s9472_s4 + $0x60] sm:$0xff]  ;;  %v6164_v40 = vld [vmem:[%s9472_s4 + $0x58] sm:$0xff] }
 0x4e7   :  { %1783 = vmatmul.mubr.f32.gmra.mxu1 %v1618_v45  ;;  %6799 = vmatprep.subr.mxu1 %v1693_v44  ;;  %v1602_v51 = vsel %vm1005_vm3, %v1590_v11, %v1592_v47  ;;  %v2173_v11 = vld [vmem:[%s9472_s4 + $0x28] sm:$0xff]  ;;  %v6163_v41 = vld [vmem:[%s9472_s4 + $0x50] sm:$0xff]  ;;  %v6161_v33 = vld [vmem:[%s9472_s4 + $0x40] sm:$0xff]  ;;  %vm4768_vm3 = vcmask 48128  }
 0x4e8   :  { %1858 = vmatmul.mubr.f32.gmra.mxu0 %v1620_v30  ;;  %6800 = vmatpush3.msra.mxu1 %v1693_v44  ;;  %v1622_v54 = vmax.f32 %v1568_v53, %v1602_v51  ;;  %v6162_v42 = vld [vmem:[%s9472_s4 + $0x48] sm:$0xff]  ;;  %v6186_v43 = vld [vmem:[%s9472_s4 + $0xb8] sm:$0xff] }
 0x4e9   :  { %6801 = vmatprep.subr.mxu1 %v1692_v24  ;;  %6813 = vmatprep.mubr.msk.f32.mxu1 %vm1703_vm0, %v1617_v35 }
 0x4ea   :  { %6802 = vmatpush3.msra.mxu1 %v1692_v24  ;;  %6820 = vmatprep.mubr.msk.f32.mxu0 %vm8049_vm2, %v8047_v0 }
 0x4eb   :  { %6803 = vmatprep.subr.mxu1 %v1691_v31 }
 0x4ec   :  { %6804 = vmatpush3.msra.mxu1 %v1691_v31 }
 0x4ed   :  { %6805 = vmatprep.subr.mxu1 %v1690_v38 }
 0x4ee   :  { %6806 = vmatpush3.msra.mxu1 %v1690_v38 }
 0x4ef   :  { %6807 = vmatprep.subr.mxu1 %v1689_v46 }
 0x4f0   :  { %6808 = vmatpush3.msra.mxu1 %v1689_v46 }
 0x4f1   :  { %6809 = vmatprep.subr.mxu1 %v1688_v48 }
 0x4f2   :  { %6810 = vmatpush3.msra.mxu1 %v1688_v48 }
 0x4f3   :  { %6811 = vmatprep.subr.mxu1 %v1687_v52 }
 0x4f4   :  { %6812 = vmatpush3.msra.mxu1 %v1687_v52 }
 0x4f5   :  { %6814 = vmatmul.mubr.msk.f32.vlgmr.msra.gmra.mxu1 %vm1703_vm0, %v1622_v54  ;;  %2235 = vmatprep.subr.mxu1 %v6168_v29 }
 0x4f6   :  { %2275 = vmatprep.mubr.f32.mxu1 %v8047_v0  ;;  %2236 = vmatpush1.msra.mxu1 %v6167_v32 }
 0x4f7   :  { %2237 = vmatprep.subr.mxu1 %v6166_v36 }
 0x4f8   :  { %2238 = vmatpush1.msra.mxu1 %v6165_v39 }
 0x4f9   :  { %2239 = vmatprep.subr.mxu1 %v6164_v40 }
 0x4fa   :  { %2240 = vmatpush1.msra.mxu1 %v6163_v41 }
 0x4fb   :  { %2241 = vmatprep.subr.mxu1 %v6162_v42 }
 0x4fc   :  { %2242 = vmatpush1.msra.mxu1 %v6161_v33 }
 0x4fd   :  { %2464 = vmatprep.subr.mxu1 %v6186_v43 }
 0x595   :  { %v6419_v8 = vpop.f32.mrf.mxu1 }
 0x597   :  { %v6420_v10 = vpop.f32.mrf.mxu1 }
 0x598   :  { %v6421_v1 = vadd.f32 %v6420_v10, %v6419_v8 }
 0x5a2   :  { %v6457_v49 = vpop.f32.mrf.mxu0 }
 0x5a4   :  { %v6458_v57 = vpop.f32.mrf.mxu0 }
 0x5a5   :  { %v6459_v63 = vadd.f32 %v6458_v57, %v6457_v49 }
 0x5a7   :  { %v6422_v58 = vpop.f32.mrf.mxu1  ;;  %v1855_v4 = vadd.f32 %v6459_v63, %v6421_v1 }
 0x5a8   :  { %v6460_v59 = vpop.f32.mrf.mxu0 }
 0x5a9   :  { %v6423_v60 = vpop.f32.mrf.mxu1 }
 0x5aa   :  { %v6461_v61 = vpop.f32.mrf.mxu0  ;;  %v6424_v62 = vadd.f32 %v6423_v60, %v6422_v58 }
 0x5ab   :  { %v6462_v34 = vadd.f32 %v6461_v61, %v6460_v59  ;;  %v6185_v59 = vld [vmem:[%s9472_s4 + $0xb0] sm:$0xff]  ;;  %v6184_v61 = vld [vmem:[%s9472_s4 + $0xa8] sm:$0xff] }
 0x5ad   :  { %v1860_v2 = vadd.f32 %v6462_v34, %v6424_v62 }
 0x5b5   :  { %v6815_v56 = vpop.f32.mrf.mxu1 }
 0x5b6   :  { %v1935_v3 = vadd.f32 %v6815_v56, %v1860_v2  ;;  %v6183_v2 = vld [vmem:[%s9472_s4 + $0xa0] sm:$0xff] }
 0x5b7   :  { %v1929_v5 = vpop.f32.mrf.mxu1 }
 0x5b8   :  { %v1930_v6 = vadd.f32 %v1929_v5, %v1855_v4  ;;  %1953 = vrot.lane.b32.xlu1 %v1935_v3, %s8060_s20 }
 0x5ba   :  { %1951 = vrot.lane.b32.xlu0 %v1930_v6, %s8060_s20 }
 0x62a   :  { %v1954_v7 = vpop.permute.xlu1 %1953 }
 0x62b   :  { %6817 = vmatpush3.msra.mxu0 %v1954_v7 }
 0x62c   :  { %6818 = vmatprep.subr.mxu0 %v8047_v0  ;;  %v1952_v13 = vpop.permute.xlu0 %1951 }
 0x62d   :  { %6819 = vmatpush3.msra.mxu0 %v1952_v13 }
 0x62e   :  { %6821 = vmatmul.mubr.msk.f32.vlgmr.msra.gmra.mxu0 %vm1957_vm5, %v6146_v12  ;;  %6835 = vmatprep.subr.mxu0 %v8047_v0  ;;  %v6181_v12 = vld [vmem:[%s9472_s4 + $0x90] sm:$0xff] }
 0x62f   :  { %6836 = vmatpush3.msra.mxu0 %v1935_v3  ;;  %6823 = vmatprep.mubr.msk.f32.mxu0 %vm8049_vm2, %v8047_v0  ;;  %v6182_v3 = vld [vmem:[%s9472_s4 + $0x98] sm:$0xff] }
 0x630   :  { %6837 = vmatprep.subr.mxu0 %v8047_v0 }
 0x631   :  { %6838 = vmatpush3.msra.mxu0 %v1930_v6 }
 0x632   :  { %6824 = vmatmul.mubr.msk.f32.gmra.mxu0 %vm1957_vm5, %v6147_v14  ;;  %2340 = vmatprep.subr.mxu0 %v2175_v25  ;;  %v6180_v14 = vld [vmem:[%s9472_s4 + $0x88] sm:$0xff] }
 0x633   :  { %6826 = vmatprep.mubr.msk.f32.mxu0 %vm8049_vm2, %v8047_v0 }
 0x636   :  { %6827 = vmatmul.mubr.msk.f32.gmra.mxu0 %vm1957_vm5, %v6148_v16 }
 0x637   :  { %6829 = vmatprep.mubr.msk.f32.mxu0 %vm8049_vm2, %v8047_v0 }
 0x63a   :  { %6830 = vmatmul.mubr.msk.f32.gmra.mxu0 %vm1957_vm5, %v6149_v17  ;;  %v6179_v17 = vld [vmem:[%s9472_s4 + $0x80] sm:$0xff] }
 0x63b   :  { %6832 = vmatprep.mubr.msk.f32.mxu0 %vm8049_vm2, %v8047_v0 }
 0x63e   :  { %6833 = vmatmul.mubr.msk.f32.gmra.mxu0 %vm1957_vm5, %v6150_v15 }
 0x63f   :  { %6839 = vmatprep.mubr.msk.f32.mxu0 %vm8049_vm2, %v8047_v0 }
 0x642   :  { %6840 = vmatmul.mubr.msk.f32.vlgmr.msra.gmra.mxu0 %vm1957_vm5, %v1938_v55 }
 0x643   :  { %6842 = vmatprep.mubr.msk.f32.mxu0 %vm8049_vm2, %v8047_v0  ;;  %2341 = vmatpush1.msra.mxu0 %v2174_v18 }
 0x644   :  { %2342 = vmatprep.subr.mxu0 %v2173_v11 }
 0x645   :  { %2343 = vmatpush1.msra.mxu0 %v2172_v26 }
 0x646   :  { %6843 = vmatmul.mubr.msk.f32.gmra.mxu0 %vm1957_vm5, %v1939_v20  ;;  %2344 = vmatprep.subr.mxu0 %v2171_v27 }
 0x647   :  { %6845 = vmatprep.mubr.msk.f32.mxu0 %vm8049_vm2, %v8047_v0  ;;  %2345 = vmatpush1.msra.mxu0 %v2170_v50 }
 0x648   :  { %2346 = vmatprep.subr.mxu0 %v2169_v28 }
 0x649   :  { %2347 = vmatpush1.msra.mxu0 %v2168_v23 }
 0x64a   :  { %6846 = vmatmul.mubr.msk.f32.gmra.mxu0 %vm1957_vm5, %v1940_v9  ;;  %6854 = vmatprep.subr.mxu0 %v8047_v0 }
 0x64b   :  { %6848 = vmatprep.mubr.msk.f32.mxu0 %vm8049_vm2, %v8047_v0 }
 0x64e   :  { %6849 = vmatmul.mubr.msk.f32.gmra.mxu0 %vm1957_vm5, %v1941_v21 }
 0x64f   :  { %6851 = vmatprep.mubr.msk.f32.mxu0 %vm8049_vm2, %v8047_v0 }
 0x652   :  { %6852 = vmatmul.mubr.msk.f32.gmra.mxu0 %vm1957_vm5, %v1942_v22 }
 0x653   :  { %2380 = vmatprep.mubr.f32.mxu0 %v8047_v0 }
 0x6ee   :  { %v2039_v37 = vpop.f32.mrf.mxu0 }
 0x6f0   :  { %v6822_v44 = vpop.f32.mrf.mxu0 }
 0x6f2   :  { %v2044_v30 = vpop.f32.mrf.mxu0 }
 0x6f4   :  { %v6825_v45 = vpop.f32.mrf.mxu0 }
 0x6f6   :  { %v2049_v19 = vpop.f32.mrf.mxu0 }
 0x6f8   :  { %v6828_v35 = vpop.f32.mrf.mxu0 }
 0x6fa   :  { %v2054_v24 = vpop.f32.mrf.mxu0 }
 0x6fc   :  { %v6831_v31 = vpop.f32.mrf.mxu0 }
 0x6fe   :  { %v2059_v38 = vpop.f32.mrf.mxu0 }
 0x700   :  { %v6834_v46 = vpop.f32.mrf.mxu0 }
 0x702   :  { %v2144_v47 = vpop.f32.mrf.mxu0 }
 0x703   :  { %v8818_v48 = vadd.f32 %v2144_v47, %v2039_v37 }
 0x704   :  { %v6841_v51 = vpop.f32.mrf.mxu0 }
 0x705   :  { %6174 = vmatmul.mubr.msk.f32.vlgmr.msra.gmra.mxu0 %vm2200_vm8, %v8818_v48  ;;  %v2191_v8 = vrot.slane %v8818_v48, 1  ;;  %v2421_v20 = vrot.slane %v8818_v48, 2 }
 0x706   :  { %v2149_v52 = vpop.f32.mrf.mxu0  ;;  %2386 = vmatprep.mubr.f32.mxu0 %v8047_v0 }
 0x707   :  { %v8823_v53 = vadd.f32 %v2149_v52, %v2044_v30 }
 0x708   :  { %v6844_v54 = vpop.f32.mrf.mxu0 }
 0x709   :  { %v2192_v49 = vrot.slane %v8823_v53, 1  ;;  %6175 = vmatmul.mubr.msk.f32.gmra.mxu0 %vm2200_vm8, %v8823_v53  ;;  %v2422_v55 = vrot.slane %v8823_v53, 2 }
 0x70a   :  { %v2154_v10 = vpop.f32.mrf.mxu0  ;;  %2392 = vmatprep.mubr.f32.mxu0 %v8047_v0 }
 0x70b   :  { %v2155_v57 = vadd.f32 %v2154_v10, %v2049_v19  ;;  %v2193_v58 = vsel %vm2190_vm10, %v2191_v8, %v2192_v49  ;;  %v2423_v21 = vsel %vm2420_vm11, %v2421_v20, %v2422_v55  ;;  %v2545_v10 = vld [vmem:[#allocation8] sm:$0x3] }
 0x70c   :  { %v6847_v60 = vpop.f32.mrf.mxu0  ;;  %6169 = vmatmul.mubr.msk.f32.vlgmr.msra.gmra.mxu1 %vm2200_vm8, %v2193_v58 }
 0x70d   :  { %v2194_v62 = vrot.slane %v2155_v57, 1  ;;  %6176 = vmatmul.mubr.msk.f32.gmra.mxu0 %vm2200_vm8, %v2155_v57  ;;  %2281 = vmatprep.mubr.f32.mxu1 %v8047_v0  ;;  %v2424_v9 = vrot.slane %v2155_v57, 2 }
 0x70e   :  { %v2159_v34 = vpop.f32.mrf.mxu0  ;;  %2398 = vmatprep.mubr.f32.mxu0 %v8047_v0  ;;  %2465 = vmatpush1.msra.mxu1 %v6185_v59 }
 0x70f   :  { %v2160_v63 = vadd.f32 %v2159_v34, %v2054_v24  ;;  %v2195_v1 = vsel %vm2190_vm10, %v2192_v49, %v2194_v62  ;;  %2466 = vmatprep.subr.mxu1 %v6184_v61  ;;  %v2425_v25 = vsel %vm2420_vm11, %v2422_v55, %v2424_v9  ;;  %v2547_v24 = vlaneseq }
 0x710   :  { %v6850_v56 = vpop.f32.mrf.mxu0  ;;  %6170 = vmatmul.mubr.msk.f32.gmra.mxu1 %vm2200_vm8, %v2195_v1 }
 0x711   :  { %v2196_v4 = vrot.slane %v2160_v63, 1  ;;  %6177 = vmatmul.mubr.msk.f32.gmra.mxu0 %vm2200_vm8, %v2160_v63  ;;  %2287 = vmatprep.mubr.f32.mxu1 %v8047_v0  ;;  %v2426_v22 = vrot.slane %v2160_v63, 2  ;;  %v2548_v47 = vshrl.u32 %v2547_v24, 7  ;;  %v2582_v24 = vld [vmem:[#allocation9] sm:$0xff] }
 0x712   :  { %v2164_v5 = vpop.f32.mrf.mxu0  ;;  %2404 = vmatprep.mubr.f32.mxu0 %v8047_v0  ;;  %2467 = vmatpush1.msra.mxu1 %v6183_v2 }
 0x713   :  { %v2165_v6 = vadd.f32 %v2164_v5, %v2059_v38  ;;  %v2197_v7 = vsel %vm2190_vm10, %v2194_v62, %v2196_v4  ;;  %2468 = vmatprep.subr.mxu1 %v6182_v3  ;;  %v2427_v11 = vsel %vm2420_vm11, %v2424_v9, %v2426_v22  ;;  %v2549_v53 = vsub.s32 0, %v2548_v47 }
 0x714   :  { %v6853_v13 = vpop.f32.mrf.mxu0  ;;  %6171 = vmatmul.mubr.msk.f32.gmra.mxu1 %vm2200_vm8, %v2197_v7  ;;  %v2553_v54 = vsub.s32 1, %v2548_v47  ;;  %v2583_v47 = vld [vmem:[#allocation9 + $0x8] sm:$0xff] }
 0x715   :  { %v2198_v16 = vrot.slane %v2165_v6, 1  ;;  %6178 = vmatmul.mubr.msk.f32.gmra.mxu0 %vm2200_vm8, %v2165_v6  ;;  %2293 = vmatprep.mubr.f32.mxu1 %v8047_v0  ;;  %v2428_v18 = vrot.slane %v2165_v6, 2  ;;  %v2550_v1 = vrot.slane %v2545_v10, %v2549_v53  ;;  %v2584_v53 = vld [vmem:[#allocation9 + $0x10] sm:$0xf] }
 0x716   :  { %2469 = vmatpush1.msra.mxu1 %v6181_v12  ;;  %6864 = vmatprep.mubr.msk.f32.mxu0 %vm8049_vm2, %v8047_v0  ;;  %v2554_v2 = vrot.slane %v2545_v10, %v2553_v54  ;;  %v2681_v54 = vld [vmem:[#allocation11 + $0x10] sm:$0xf]  ;;  %v2786_v10 = vld [vmem:[%s9473_s17 + $0x60] sm:$0xff] }
 0x717   :  { %v2199_v15 = vsel %vm2190_vm10, %v2196_v4, %v2198_v16  ;;  %2470 = vmatprep.subr.mxu1 %v6180_v14  ;;  %v2429_v26 = vsel %vm2420_vm11, %v2426_v22, %v2428_v18 }
 0x718   :  { %6172 = vmatmul.mubr.msk.f32.gmra.mxu1 %vm2200_vm8, %v2199_v15 }
 0x719   :  { %2299 = vmatprep.mubr.f32.mxu1 %v8047_v0  ;;  %2471 = vmatpush1.msra.mxu1 %v6179_v17 }
 0x71a   :  { %6873 = vmatprep.subr.mxu1 %v8047_v0 }
 0x71c   :  { %6173 = vmatmul.mubr.msk.f32.gmra.mxu1 %vm2200_vm8, %v2198_v16 }
 0x71d   :  { %2504 = vmatprep.mubr.f32.mxu1 %v8047_v0 }
 0x720   :  { %6187 = vmatmul.mubr.msk.f32.vlgmr.msra.gmra.mxu1 %vm2200_vm8, %v2423_v21 }
 0x721   :  { %2510 = vmatprep.mubr.f32.mxu1 %v8047_v0 }
 0x724   :  { %6188 = vmatmul.mubr.msk.f32.gmra.mxu1 %vm2200_vm8, %v2425_v25 }
 0x725   :  { %2516 = vmatprep.mubr.f32.mxu1 %v8047_v0 }
 0x728   :  { %6189 = vmatmul.mubr.msk.f32.gmra.mxu1 %vm2200_vm8, %v2427_v11 }
 0x729   :  { %2522 = vmatprep.mubr.f32.mxu1 %v8047_v0 }
 0x72c   :  { %6190 = vmatmul.mubr.msk.f32.gmra.mxu1 %vm2200_vm8, %v2429_v26 }
 0x72d   :  { %2528 = vmatprep.mubr.f32.mxu1 %v8047_v0 }
 0x730   :  { %6191 = vmatmul.mubr.msk.f32.gmra.mxu1 %vm2200_vm8, %v2428_v18 }
 0x731   :  { %6883 = vmatprep.mubr.msk.f32.mxu1 %vm8049_vm2, %v8047_v0 }
 0x7c5   :  { %v2382_v27 = vpop.f32.mrf.mxu0 }
 0x7c7   :  { %v2384_v29 = vpop.f32.mrf.mxu0 }
 0x7c9   :  { %v2388_v36 = vpop.f32.mrf.mxu0 }
 0x7cb   :  { %v2390_v41 = vpop.f32.mrf.mxu0 }
 0x7cc   :  { %v2277_v50 = vpop.f32.mrf.mxu1 }
 0x7cd   :  { %v2394_v43 = vpop.f32.mrf.mxu0  ;;  %v2383_v20 = vadd.f32 %v2382_v27, %v2277_v50 }
 0x7ce   :  { %v2279_v28 = vpop.f32.mrf.mxu1 }
 0x7cf   :  { %v2396_v30 = vpop.f32.mrf.mxu0  ;;  %v2385_v7 = vadd.f32 %v2384_v29, %v2279_v28 }
 0x7d0   :  { %v2283_v23 = vpop.f32.mrf.mxu1 }
 0x7d1   :  { %v2400_v35 = vpop.f32.mrf.mxu0  ;;  %v2389_v12 = vadd.f32 %v2388_v36, %v2283_v23 }
 0x7d2   :  { %v2285_v32 = vpop.f32.mrf.mxu1 }
 0x7d3   :  { %v2402_v46 = vpop.f32.mrf.mxu0  ;;  %v2391_v62 = vadd.f32 %v2390_v41, %v2285_v32 }
 0x7d4   :  { %v2289_v39 = vpop.f32.mrf.mxu1 }
 0x7d5   :  { %v2406_v52 = vpop.f32.mrf.mxu0  ;;  %v2395_v34 = vadd.f32 %v2394_v43, %v2289_v39 }
 0x7d6   :  { %v2291_v40 = vpop.f32.mrf.mxu1 }
 0x7d7   :  { %v2397_v58 = vadd.f32 %v2396_v30, %v2291_v40  ;;  %v2408_v63 = vpop.f32.mrf.mxu0 }
 0x7d8   :  { %v2295_v42 = vpop.f32.mrf.mxu1 }
 0x7d9   :  { %v2401_v59 = vadd.f32 %v2400_v35, %v2295_v42 }
 0x7da   :  { %v2297_v33 = vpop.f32.mrf.mxu1 }
 0x7db   :  { %v2403_v49 = vadd.f32 %v2402_v46, %v2297_v33  ;;  %v6215_v46 = vld [vmem:[%s9473_s17 + $0xf8] sm:$0xff] }
 0x7dc   :  { %v2301_v37 = vpop.f32.mrf.mxu1 }
 0x7dd   :  { %v2407_v60 = vadd.f32 %v2406_v52, %v2301_v37  ;;  %v6214_v52 = vld [vmem:[%s9473_s17 + $0xf0] sm:$0xff] }
 0x7de   :  { %v2303_v44 = vpop.f32.mrf.mxu1 }
 0x7df   :  { %v2409_v3 = vadd.f32 %v2408_v63, %v2303_v44  ;;  %v2782_v63 = vld [vmem:[%s9473_s17 + $0x40] sm:$0xff] }
 0x7e0   :  { %v2506_v45 = vpop.f32.mrf.mxu1 }
 0x7e1   :  { %v2535_v11 = vadd.f32 %v2506_v45, %v2383_v20  ;;  %v6201_v20 = vld [vmem:[%s9473_s17 + $0x88] sm:$0xff] }
 0x7e2   :  { %v2508_v19 = vpop.f32.mrf.mxu1 }
 0x7e3   :  { %v2536_v9 = vadd.f32 %v2508_v19, %v2385_v7  ;;  %v2557_v33 = vadd.f32 %v2550_v1, %v2535_v11  ;;  %v2778_v7 = vld [vmem:[%s9473_s17 + $0x20] sm:$0xff] }
 0x7e4   :  { %v2512_v31 = vpop.f32.mrf.mxu1 }
 0x7e5   :  { %v2537_v21 = vadd.f32 %v2512_v31, %v2389_v12  ;;  %v2558_v28 = vadd.f32 %v2554_v2, %v2536_v9  ;;  %v2567_v45 = vmax.f32 %v2557_v33, 0.0  ;;  %v2679_v31 = vld [vmem:[#allocation11] sm:$0xff] }
 0x7e6   :  { %v2514_v38 = vpop.f32.mrf.mxu1  ;;  %v2777_v12 = vld [vmem:[%s9473_s17 + $0x18] sm:$0xff]  ;;  %v6200_v9 = vld [vmem:[%s9473_s17 + $0x80] sm:$0xff] }
 0x7e7   :  { %v2538_v13 = vadd.f32 %v2514_v38, %v2391_v62  ;;  %v2559_v29 = vadd.f32 %v2550_v1, %v2537_v21  ;;  %v2568_v37 = vmax.f32 %v2558_v28, 0.0  ;;  %v2789_v38 = vld [vmem:[%s9473_s17 + $0x78] sm:$0xff]  ;;  %v2783_v62 = vld [vmem:[%s9473_s17 + $0x48] sm:$0xff] }
 0x7e8   :  { %v2518_v48 = vpop.f32.mrf.mxu1 }
 0x7e9   :  { %v2539_v16 = vadd.f32 %v2518_v48, %v2395_v34  ;;  %v2560_v26 = vadd.f32 %v2554_v2, %v2538_v13  ;;  %v2569_v44 = vmax.f32 %v2559_v29, 0.0  ;;  %v2577_v35 = vmax.f32 %v2567_v45, %v2568_v37  ;;  %v2680_v48 = vld [vmem:[#allocation11 + $0x8] sm:$0xff]  ;;  %v2776_v13 = vld [vmem:[%s9473_s17 + $0x10] sm:$0xff] }
 0x7ea   :  { %v2520_v51 = vpop.f32.mrf.mxu1  ;;  %v6209_v34 = vld [vmem:[%s9473_s17 + $0xc8] sm:$0xff] }
 0x7eb   :  { %v2540_v4 = vadd.f32 %v2520_v51, %v2397_v58  ;;  %v2561_v32 = vadd.f32 %v2550_v1, %v2539_v16  ;;  %v2570_v43 = vmax.f32 %v2560_v26, 0.0  ;;  %v2788_v51 = vld [vmem:[%s9473_s17 + $0x70] sm:$0xff]  ;;  %v2785_v58 = vld [vmem:[%s9473_s17 + $0x58] sm:$0xff]  ;;  %v2775_v16 = vld [vmem:[%s9473_s17 + $0x8] sm:$0xff] }
 0x7ec   :  { %v2524_v8 = vpop.f32.mrf.mxu1 }
 0x7ed   :  { %v2541_v5 = vadd.f32 %v2524_v8, %v2401_v59  ;;  %v2562_v22 = vadd.f32 %v2554_v2, %v2540_v4  ;;  %v2571_v27 = vmax.f32 %v2561_v32, 0.0  ;;  %v2578_v19 = vmax.f32 %v2569_v44, %v2570_v43  ;;  %v2787_v8 = vld [vmem:[%s9473_s17 + $0x68] sm:$0xff]  ;;  %v6211_v59 = vld [vmem:[%s9473_s17 + $0xd8] sm:$0xff]  ;;  %v6206_v4 = vld [vmem:[%s9473_s17 + $0xb0] sm:$0xff] }
 0x7ee   :  { %v2526_v57 = vpop.f32.mrf.mxu1 }
 0x7ef   :  { %v2542_v61 = vadd.f32 %v2526_v57, %v2403_v49  ;;  %v2563_v25 = vadd.f32 %v2550_v1, %v2541_v5  ;;  %v2572_v23 = vmax.f32 %v2562_v22, 0.0  ;;  %v6213_v49 = vld [vmem:[%s9473_s17 + $0xe8] sm:$0xff]  ;;  %v6212_v57 = vld [vmem:[%s9473_s17 + $0xe0] sm:$0xff] }
 0x7f0   :  { %v2530_v56 = vpop.f32.mrf.mxu1  ;;  %v2779_v5 = vld [vmem:[%s9473_s17 + $0x28] sm:$0xff] }
 0x7f1   :  { %v2543_v6 = vadd.f32 %v2530_v56, %v2407_v60  ;;  %v2564_v17 = vadd.f32 %v2554_v2, %v2542_v61  ;;  %v2573_v36 = vmax.f32 %v2563_v25, 0.0  ;;  %v2579_v30 = vmax.f32 %v2571_v27, %v2572_v23  ;;  %v2784_v60 = vld [vmem:[%s9473_s17 + $0x50] sm:$0xff]  ;;  %v6207_v56 = vld [vmem:[%s9473_s17 + $0xb8] sm:$0xff] }
 0x7f2   :  { %v2532_v14 = vpop.f32.mrf.mxu1  ;;  %v6210_v61 = vld [vmem:[%s9473_s17 + $0xd0] sm:$0xff] }
 0x7f3   :  { %v2565_v15 = vadd.f32 %v2550_v1, %v2543_v6  ;;  %v2544_v55 = vadd.f32 %v2532_v14, %v2409_v3  ;;  %v2574_v39 = vmax.f32 %v2564_v17, 0.0  ;;  %v6208_v1 = vld [vmem:[%s9473_s17 + $0xc0] sm:$0xff]  ;;  %v2780_v3 = vld [vmem:[%s9473_s17 + $0x30] sm:$0xff]  ;;  %v6205_v6 = vld [vmem:[%s9473_s17 + $0xa8] sm:$0xff] }
 0x7f4   :  { %v6204_v14 = vld [vmem:[%s9473_s17 + $0xa0] sm:$0xff]  ;;  %v6203_v17 = vld [vmem:[%s9473_s17 + $0x98] sm:$0xff]  ;;  %v6230_v27 = vld [vmem:[%s9473_s17 + $0x170] sm:$0xff] }
 0x7f5   :  { %v2566_v18 = vadd.f32 %v2554_v2, %v2544_v55  ;;  %v2575_v40 = vmax.f32 %v2565_v15, 0.0  ;;  %v2580_v50 = vmax.f32 %v2573_v36, %v2574_v39  ;;  %v2781_v2 = vld [vmem:[%s9473_s17 + $0x38] sm:$0xff]  ;;  %v2774_v15 = vld [vmem:[%s9473_s17] sm:$0xff]  ;;  %v6202_v55 = vld [vmem:[%s9473_s17 + $0x90] sm:$0xff] }
 0x7f7   :  { %v2576_v41 = vmax.f32 %v2566_v18, 0.0 }
 0x7f9   :  { %v2581_v42 = vmax.f32 %v2575_v40, %v2576_v41 }
 0x7fb   :  { %6855 = vmatpush3.msk.msra.mxu0 %vm2595_vm12, %v2581_v42  ;;  %6874 = vmatpush3.msk.msra.mxu1 %vm2595_vm12, %v2581_v42  ;;  %v6231_v42 = vld [vmem:[%s9473_s17 + $0x178] sm:$0xff] }
 0x7fc   :  { %6856 = vmatprep.subr.mxu0 %v8047_v0  ;;  %6875 = vmatprep.subr.mxu1 %v8047_v0 }
 0x7fd   :  { %6857 = vmatpush3.msra.mxu0 %v2580_v50  ;;  %6876 = vmatpush3.msra.mxu1 %v2580_v50 }
 0x7fe   :  { %6858 = vmatprep.subr.mxu0 %v8047_v0  ;;  %6877 = vmatprep.subr.mxu1 %v8047_v0 }
 0x7ff   :  { %6859 = vmatpush3.msra.mxu0 %v2579_v30  ;;  %6878 = vmatpush3.msra.mxu1 %v2579_v30  ;;  %v6229_v30 = vld [vmem:[%s9473_s17 + $0x168] sm:$0xff] }
 0x800   :  { %6860 = vmatprep.subr.mxu0 %v8047_v0  ;;  %6879 = vmatprep.subr.mxu1 %v8047_v0 }
 0x801   :  { %6861 = vmatpush3.msra.mxu0 %v2578_v19  ;;  %6880 = vmatpush3.msra.mxu1 %v2578_v19  ;;  %v6228_v19 = vld [vmem:[%s9473_s17 + $0x160] sm:$0xff] }
 0x802   :  { %6862 = vmatprep.subr.mxu0 %v8047_v0  ;;  %6881 = vmatprep.subr.mxu1 %v8047_v0 }
 0x803   :  { %6863 = vmatpush3.msra.mxu0 %v2577_v35  ;;  %6882 = vmatpush3.msra.mxu1 %v2577_v35  ;;  %v6227_v35 = vld [vmem:[%s9473_s17 + $0x158] sm:$0xff] }
 0x804   :  { %6865 = vmatmul.mubr.msk.f32.vlgmr.msra.gmra.mxu0 %vm2585_vm13, %v2582_v24  ;;  %6884 = vmatmul.mubr.msk.f32.vlgmr.msra.gmra.mxu1 %vm2585_vm13, %v2679_v31  ;;  %v6226_v24 = vld [vmem:[%s9473_s17 + $0x150] sm:$0xff]  ;;  %v6225_v31 = vld [vmem:[%s9473_s17 + $0x148] sm:$0xff] }
 0x805   :  { %6867 = vmatprep.mubr.msk.f32.mxu0 %vm8049_vm2, %v8047_v0  ;;  %6886 = vmatprep.mubr.msk.f32.mxu1 %vm8049_vm2, %v8047_v0 }
 0x806   :  { %6933 = vmatprep.subr.mxu1 %v8047_v0  ;;  %6892 = vmatprep.subr.mxu0 %v8047_v0 }
 0x807   :  { %6934 = vmatpush3.msra.mxu1 %v2789_v38  ;;  %6893 = vmatpush3.msra.mxu0 %v6215_v46  ;;  %v6224_v38 = vld [vmem:[%s9473_s17 + $0x140] sm:$0xff]  ;;  %v6223_v46 = vld [vmem:[%s9473_s17 + $0x138] sm:$0xff] }
 0x808   :  { %6868 = vmatmul.mubr.msk.f32.gmra.mxu0 %vm2585_vm13, %v2583_v47  ;;  %6887 = vmatmul.mubr.msk.f32.gmra.mxu1 %vm2585_vm13, %v2680_v48  ;;  %v6222_v47 = vld [vmem:[%s9473_s17 + $0x130] sm:$0xff]  ;;  %v6221_v48 = vld [vmem:[%s9473_s17 + $0x128] sm:$0xff] }
 0x809   :  { %6870 = vmatprep.mubr.msk.f32.mxu0 %vm8049_vm2, %v8047_v0  ;;  %6889 = vmatprep.mubr.msk.f32.mxu1 %vm8049_vm2, %v8047_v0 }
 0x80a   :  { %6935 = vmatprep.subr.mxu1 %v8047_v0  ;;  %6894 = vmatprep.subr.mxu0 %v8047_v0 }
 0x80b   :  { %6936 = vmatpush3.msra.mxu1 %v2788_v51  ;;  %6895 = vmatpush3.msra.mxu0 %v6214_v52  ;;  %v6220_v51 = vld [vmem:[%s9473_s17 + $0x120] sm:$0xff]  ;;  %v6219_v52 = vld [vmem:[%s9473_s17 + $0x118] sm:$0xff] }
 0x80c   :  { %6871 = vmatmul.mubr.msk.f32.gmra.mxu0 %vm2585_vm13, %v2584_v53  ;;  %6890 = vmatmul.mubr.msk.f32.gmra.mxu1 %vm2585_vm13, %v2681_v54  ;;  %v6218_v53 = vld [vmem:[%s9473_s17 + $0x110] sm:$0xff]  ;;  %v6217_v54 = vld [vmem:[%s9473_s17 + $0x108] sm:$0xff] }
 0x80d   :  { %6937 = vmatprep.subr.mxu1 %v8047_v0  ;;  %6896 = vmatprep.subr.mxu0 %v8047_v0 }
 0x80e   :  { %6938 = vmatpush3.msra.mxu1 %v2787_v8  ;;  %6897 = vmatpush3.msra.mxu0 %v6213_v49  ;;  %v6216_v49 = vld [vmem:[%s9473_s17 + $0x100] sm:$0xff] }
 0x80f   :  { %6939 = vmatprep.subr.mxu1 %v8047_v0  ;;  %6898 = vmatprep.subr.mxu0 %v8047_v0 }
 0x810   :  { %6940 = vmatpush3.msra.mxu1 %v2786_v10  ;;  %6899 = vmatpush3.msra.mxu0 %v6212_v57 }
 0x811   :  { %6941 = vmatprep.subr.mxu1 %v8047_v0  ;;  %6900 = vmatprep.subr.mxu0 %v8047_v0 }
 0x812   :  { %6942 = vmatpush3.msra.mxu1 %v2785_v58  ;;  %6901 = vmatpush3.msra.mxu0 %v6211_v59 }
 0x813   :  { %6943 = vmatprep.subr.mxu1 %v8047_v0  ;;  %6902 = vmatprep.subr.mxu0 %v8047_v0 }
 0x814   :  { %6944 = vmatpush3.msra.mxu1 %v2784_v60  ;;  %6903 = vmatpush3.msra.mxu0 %v6210_v61  ;;  %v3210_v60 = vld [vmem:[%s9474_s10 + $0x78] sm:$0xff]  ;;  %v3209_v61 = vld [vmem:[%s9474_s10 + $0x70] sm:$0xff] }
 0x815   :  { %6945 = vmatprep.subr.mxu1 %v8047_v0  ;;  %6904 = vmatprep.subr.mxu0 %v8047_v0 }
 0x816   :  { %6946 = vmatpush3.msra.mxu1 %v2783_v62  ;;  %6905 = vmatpush3.msra.mxu0 %v6209_v34  ;;  %v3208_v62 = vld [vmem:[%s9474_s10 + $0x68] sm:$0xff]  ;;  %v3207_v34 = vld [vmem:[%s9474_s10 + $0x60] sm:$0xff] }
 0x817   :  { %6947 = vmatprep.subr.mxu1 %v8047_v0  ;;  %6906 = vmatprep.subr.mxu0 %v8047_v0 }
 0x818   :  { %6948 = vmatpush3.msra.mxu1 %v2782_v63  ;;  %6907 = vmatpush3.msra.mxu0 %v6208_v1  ;;  %v3206_v63 = vld [vmem:[%s9474_s10 + $0x58] sm:$0xff]  ;;  %v3205_v1 = vld [vmem:[%s9474_s10 + $0x50] sm:$0xff] }
 0x819   :  { %6949 = vmatprep.subr.mxu1 %v8047_v0  ;;  %6908 = vmatprep.subr.mxu0 %v8047_v0 }
 0x81a   :  { %6950 = vmatpush3.msra.mxu1 %v2781_v2  ;;  %6909 = vmatpush3.msra.mxu0 %v6207_v56  ;;  %v3204_v2 = vld [vmem:[%s9474_s10 + $0x48] sm:$0xff]  ;;  %v3203_v56 = vld [vmem:[%s9474_s10 + $0x40] sm:$0xff] }
 0x81b   :  { %6951 = vmatprep.subr.mxu1 %v8047_v0  ;;  %6910 = vmatprep.subr.mxu0 %v8047_v0 }
 0x81c   :  { %6952 = vmatpush3.msra.mxu1 %v2780_v3  ;;  %6911 = vmatpush3.msra.mxu0 %v6206_v4  ;;  %v3202_v3 = vld [vmem:[%s9474_s10 + $0x38] sm:$0xff]  ;;  %v3201_v4 = vld [vmem:[%s9474_s10 + $0x30] sm:$0xff] }
 0x81d   :  { %6953 = vmatprep.subr.mxu1 %v8047_v0  ;;  %6912 = vmatprep.subr.mxu0 %v8047_v0 }
 0x81e   :  { %6954 = vmatpush3.msra.mxu1 %v2779_v5  ;;  %6913 = vmatpush3.msra.mxu0 %v6205_v6  ;;  %v3200_v5 = vld [vmem:[%s9474_s10 + $0x28] sm:$0xff]  ;;  %v3199_v6 = vld [vmem:[%s9474_s10 + $0x20] sm:$0xff] }
 0x81f   :  { %6955 = vmatprep.subr.mxu1 %v8047_v0  ;;  %6914 = vmatprep.subr.mxu0 %v8047_v0 }
 0x820   :  { %6956 = vmatpush3.msra.mxu1 %v2778_v7  ;;  %6965 = vmatprep.mubr.msk.f32.mxu1 %vm8049_vm2, %v8047_v0  ;;  %v3198_v7 = vld [vmem:[%s9474_s10 + $0x18] sm:$0xff] }
 0x821   :  { %6957 = vmatprep.subr.mxu1 %v8047_v0  ;;  %6924 = vmatprep.mubr.msk.f32.mxu0 %vm8049_vm2, %v8047_v0 }
 0x822   :  { %6958 = vmatpush3.msra.mxu1 %v2777_v12  ;;  %6915 = vmatpush3.msra.mxu0 %v6204_v14  ;;  %v3197_v12 = vld [vmem:[%s9474_s10 + $0x10] sm:$0xff] }
 0x823   :  { %6959 = vmatprep.subr.mxu1 %v8047_v0  ;;  %6916 = vmatprep.subr.mxu0 %v8047_v0 }
 0x824   :  { %6960 = vmatpush3.msra.mxu1 %v2776_v13  ;;  %6917 = vmatpush3.msra.mxu0 %v6203_v17 }
 0x825   :  { %6961 = vmatprep.subr.mxu1 %v8047_v0  ;;  %6918 = vmatprep.subr.mxu0 %v8047_v0 }
 0x826   :  { %6962 = vmatpush3.msra.mxu1 %v2775_v16  ;;  %6919 = vmatpush3.msra.mxu0 %v6202_v55 }
 0x827   :  { %6963 = vmatprep.subr.mxu1 %v8047_v0  ;;  %6920 = vmatprep.subr.mxu0 %v8047_v0 }
 0x828   :  { %6964 = vmatpush3.msra.mxu1 %v2774_v15  ;;  %6921 = vmatpush3.msra.mxu0 %v6201_v20 }
 0x829   :  { %7015 = vmatprep.subr.mxu1 %v8047_v0  ;;  %6922 = vmatprep.subr.mxu0 %v8047_v0 }
 0x82a   :  { %6923 = vmatpush3.msra.mxu0 %v6200_v9 }
 0x82b   :  { %6974 = vmatprep.subr.mxu0 %v8047_v0 }
 0x8c4   :  { %v2665_v21 = vpop.f32.mrf.mxu0  ;;  %v2757_v22 = vpop.f32.mrf.mxu1 }
 0x8c5   :  { %v8970_v25 = vmax.f32 %v2665_v21, %v2757_v22 }
 0x8c6   :  { %v6866_v18 = vpop.f32.mrf.mxu0  ;;  %v6885_v11 = vpop.f32.mrf.mxu1 }
 0x8c7   :  { %6966 = vmatmul.mubr.f32.vlgmr.msra.gmra.mxu1 %v8970_v25  ;;  %v2810_v28 = vrot.slane %v8970_v25, 1  ;;  %v2995_v10 = vrot.slane %v8970_v25, 2 }
 0x8c8   :  { %v2670_v26 = vpop.f32.mrf.mxu0  ;;  %v2762_v32 = vpop.f32.mrf.mxu1  ;;  %6968 = vmatprep.mubr.msk.f32.mxu1 %vm8049_vm2, %v8047_v0 }
 0x8c9   :  { %v8975_v39 = vmax.f32 %v2670_v26, %v2762_v32 }
 0x8ca   :  { %v6869_v40 = vpop.f32.mrf.mxu0  ;;  %v6888_v41 = vpop.f32.mrf.mxu1 }
 0x8cb   :  { %v2811_v29 = vrot.slane %v8975_v39, 1  ;;  %6969 = vmatmul.mubr.f32.gmra.mxu1 %v8975_v39  ;;  %v2996_v8 = vrot.slane %v8975_v39, 2 }
 0x8cc   :  { %v2675_v23 = vpop.f32.mrf.mxu0  ;;  %v2767_v36 = vpop.f32.mrf.mxu1  ;;  %6971 = vmatprep.mubr.msk.f32.mxu1 %vm8049_vm2, %v8047_v0 }
 0x8cd   :  { %v8983_v33 = vmax.f32 %v2675_v23, %v2767_v36  ;;  %v2812_v43 = vsel %vm2190_vm10, %v2810_v28, %v2811_v29  ;;  %v2997_v58 = vsel %vm2420_vm11, %v2995_v10, %v2996_v8  ;;  %v6241_v10 = vld [vmem:[%s9474_s10 + $0xa0] sm:$0xff] }
 0x8ce   :  { %6925 = vmatmul.mubr.f32.vlgmr.msra.gmra.mxu0 %v2812_v43  ;;  %v6872_v50 = vpop.f32.mrf.mxu0  ;;  %v6891_v37 = vpop.f32.mrf.mxu1 }
 0x8cf   :  { %v2813_v44 = vrot.slane %v8983_v33, 1  ;;  %6975 = vmatpush3.msra.mxu0 %v6231_v42  ;;  %6927 = vmatprep.mubr.msk.f32.mxu0 %vm8049_vm2, %v8047_v0  ;;  %v2998_v57 = vrot.slane %v8983_v33, 2 }
 0x8d0   :  { %6976 = vmatprep.subr.mxu0 %v8047_v0  ;;  %6972 = vmatmul.mubr.f32.gmra.mxu1 %v8983_v33  ;;  %v6232_v33 = vld [vmem:[%s9475_s11] ss:$0 sm:$0xff] }
 0x8d1   :  { %6977 = vmatpush3.msra.mxu0 %v6230_v27  ;;  %v2814_v45 = vsel %vm2190_vm10, %v2811_v29, %v2813_v44  ;;  %7021 = vmatprep.mubr.msk.f32.mxu1 %vm8049_vm2, %v8047_v0  ;;  %v2999_v59 = vsel %vm2420_vm11, %v2996_v8, %v2998_v57  ;;  %v6243_v8 = vld [vmem:[%s9474_s10 + $0xb0] sm:$0xff] }
 0x8d2   :  { %6978 = vmatprep.subr.mxu0 %v8047_v0  ;;  %6928 = vmatmul.mubr.f32.gmra.mxu0 %v2814_v45 }
 0x8d3   :  { %6979 = vmatpush3.msra.mxu0 %v6229_v30  ;;  %6930 = vmatprep.mubr.msk.f32.mxu0 %vm8049_vm2, %v8047_v0 }
 0x8d4   :  { %6980 = vmatprep.subr.mxu0 %v8047_v0 }
 0x8d5   :  { %6981 = vmatpush3.msra.mxu0 %v6228_v19  ;;  %v3099_v19 = vld [vmem:[#allocation12] sm:$0xff] }
 0x8d6   :  { %6982 = vmatprep.subr.mxu0 %v8047_v0  ;;  %6931 = vmatmul.mubr.f32.gmra.mxu0 %v2813_v44 }
 0x8d7   :  { %6983 = vmatpush3.msra.mxu0 %v6227_v35  ;;  %7006 = vmatprep.mubr.msk.f32.mxu0 %vm8049_vm2, %v8047_v0  ;;  %v6252_v35 = vld [vmem:[%s9474_s10 + $0xf8] sm:$0xff] }
 0x8d8   :  { %6984 = vmatprep.subr.mxu0 %v8047_v0 }
 0x8d9   :  { %6985 = vmatpush3.msra.mxu0 %v6226_v24  ;;  %v6251_v24 = vld [vmem:[%s9474_s10 + $0xf0] sm:$0xff] }
 0x8da   :  { %6986 = vmatprep.subr.mxu0 %v8047_v0 }
 0x8db   :  { %6987 = vmatpush3.msra.mxu0 %v6225_v31  ;;  %v3100_v31 = vld [vmem:[#allocation12 + $0x8] sm:$0xff] }
 0x8dc   :  { %6988 = vmatprep.subr.mxu0 %v8047_v0 }
 0x8dd   :  { %6989 = vmatpush3.msra.mxu0 %v6224_v38  ;;  %v6250_v38 = vld [vmem:[%s9474_s10 + $0xe8] sm:$0xff] }
 0x8de   :  { %6990 = vmatprep.subr.mxu0 %v8047_v0 }
 0x8df   :  { %6991 = vmatpush3.msra.mxu0 %v6223_v46  ;;  %v6249_v46 = vld [vmem:[%s9474_s10 + $0xe0] sm:$0xff] }
 0x8e0   :  { %6992 = vmatprep.subr.mxu0 %v8047_v0 }
 0x8e1   :  { %6993 = vmatpush3.msra.mxu0 %v6222_v47  ;;  %v3101_v47 = vld [vmem:[#allocation12 + $0x10] sm:$0xf] }
 0x8e2   :  { %6994 = vmatprep.subr.mxu0 %v8047_v0 }
 0x8e3   :  { %6995 = vmatpush3.msra.mxu0 %v6221_v48  ;;  %v6248_v48 = vld [vmem:[%s9474_s10 + $0xd8] sm:$0xff] }
 0x8e4   :  { %6996 = vmatprep.subr.mxu0 %v8047_v0 }
 0x8e5   :  { %6997 = vmatpush3.msra.mxu0 %v6220_v51  ;;  %v6247_v51 = vld [vmem:[%s9474_s10 + $0xd0] sm:$0xff] }
 0x8e6   :  { %6998 = vmatprep.subr.mxu0 %v8047_v0 }
 0x8e7   :  { %6999 = vmatpush3.msra.mxu0 %v6219_v52  ;;  %v6246_v52 = vld [vmem:[%s9474_s10 + $0xc8] sm:$0xff] }
 0x8e8   :  { %7000 = vmatprep.subr.mxu0 %v8047_v0 }
 0x8e9   :  { %7001 = vmatpush3.msra.mxu0 %v6218_v53  ;;  %v6245_v53 = vld [vmem:[%s9474_s10 + $0xc0] sm:$0xff] }
 0x8ea   :  { %7002 = vmatprep.subr.mxu0 %v8047_v0 }
 0x8eb   :  { %7003 = vmatpush3.msra.mxu0 %v6217_v54  ;;  %v6244_v54 = vld [vmem:[%s9474_s10 + $0xb8] sm:$0xff] }
 0x8ec   :  { %7004 = vmatprep.subr.mxu0 %v8047_v0 }
 0x8ed   :  { %7005 = vmatpush3.msra.mxu0 %v6216_v49  ;;  %v6242_v49 = vld [vmem:[%s9474_s10 + $0xa8] sm:$0xff] }
 0x8ee   :  { %7007 = vmatmul.mubr.f32.vlgmr.msra.gmra.mxu0 %v2997_v58  ;;  %7071 = vmatprep.subr.mxu0 %v8047_v0  ;;  %v6240_v58 = vld [vmem:[%s9474_s10 + $0x98] sm:$0xff] }
 0x8ef   :  { %7009 = vmatprep.mubr.msk.f32.mxu0 %vm8049_vm2, %v8047_v0  ;;  %7072 = vmatpush3.msra.mxu0 %v3210_v60  ;;  %v6239_v60 = vld [vmem:[%s9474_s10 + $0x90] sm:$0xff] }
 0x8f0   :  { %7073 = vmatprep.subr.mxu0 %v8047_v0 }
 0x8f1   :  { %7074 = vmatpush3.msra.mxu0 %v3209_v61  ;;  %v6238_v61 = vld [vmem:[%s9474_s10 + $0x88] sm:$0xff] }
 0x8f2   :  { %7010 = vmatmul.mubr.f32.gmra.mxu0 %v2999_v59  ;;  %7075 = vmatprep.subr.mxu0 %v8047_v0  ;;  %v3195_v59 = vld [vmem:[%s9474_s10] sm:$0xff] }
 0x8f3   :  { %7012 = vmatprep.mubr.msk.f32.mxu0 %vm8049_vm2, %v8047_v0  ;;  %7076 = vmatpush3.msra.mxu0 %v3208_v62  ;;  %v6237_v62 = vld [vmem:[%s9474_s10 + $0x80] sm:$0xff] }
 0x8f4   :  { %7077 = vmatprep.subr.mxu0 %v8047_v0 }
 0x8f5   :  { %7078 = vmatpush3.msra.mxu0 %v3207_v34 }
 0x8f6   :  { %7013 = vmatmul.mubr.f32.gmra.mxu0 %v2998_v57  ;;  %7079 = vmatprep.subr.mxu0 %v8047_v0  ;;  %v3196_v57 = vld [vmem:[%s9474_s10 + $0x8] sm:$0xff] }
 0x8f7   :  { %7103 = vmatprep.mubr.msk.f32.mxu0 %vm8049_vm2, %v8047_v0  ;;  %7080 = vmatpush3.msra.mxu0 %v3206_v63 }
 0x8f8   :  { %7081 = vmatprep.subr.mxu0 %v8047_v0 }
 0x8f9   :  { %7082 = vmatpush3.msra.mxu0 %v3205_v1 }
 0x8fa   :  { %7083 = vmatprep.subr.mxu0 %v8047_v0 }
 0x8fb   :  { %7084 = vmatpush3.msra.mxu0 %v3204_v2 }
 0x8fc   :  { %7085 = vmatprep.subr.mxu0 %v8047_v0 }
 0x8fd   :  { %7086 = vmatpush3.msra.mxu0 %v3203_v56 }
 0x8fe   :  { %7087 = vmatprep.subr.mxu0 %v8047_v0 }
 0x8ff   :  { %7088 = vmatpush3.msra.mxu0 %v3202_v3 }
 0x900   :  { %7089 = vmatprep.subr.mxu0 %v8047_v0 }
 0x901   :  { %7090 = vmatpush3.msra.mxu0 %v3201_v4  ;;  %v6268_v4 = vld [vmem:[%s9474_s10 + $0x178] sm:$0xff] }
 0x902   :  { %7091 = vmatprep.subr.mxu0 %v8047_v0 }
 0x903   :  { %7092 = vmatpush3.msra.mxu0 %v3200_v5 }
 0x904   :  { %7093 = vmatprep.subr.mxu0 %v8047_v0 }
 0x905   :  { %7094 = vmatpush3.msra.mxu0 %v3199_v6 }
 0x906   :  { %7095 = vmatprep.subr.mxu0 %v8047_v0 }
 0x907   :  { %7096 = vmatpush3.msra.mxu0 %v3198_v7  ;;  %v6267_v7 = vld [vmem:[%s9474_s10 + $0x170] sm:$0xff] }
 0x908   :  { %7097 = vmatprep.subr.mxu0 %v8047_v0 }
 0x909   :  { %7098 = vmatpush3.msra.mxu0 %v3197_v12 }
 0x90a   :  { %7099 = vmatprep.subr.mxu0 %v8047_v0 }
 0x90b   :  { %7100 = vmatpush3.msra.mxu0 %v3196_v57 }
 0x90c   :  { %7101 = vmatprep.subr.mxu0 %v8047_v0 }
 0x90d   :  { %7102 = vmatpush3.msra.mxu0 %v3195_v59 }
 0x987   :  { %v2964_v13 = vpop.f32.mrf.mxu1 }
 0x989   :  { %v6967_v14 = vpop.f32.mrf.mxu1 }
 0x98b   :  { %v2969_v16 = vpop.f32.mrf.mxu1 }
 0x98d   :  { %v6970_v17 = vpop.f32.mrf.mxu1 }
 0x98e   :  { %v2884_v15 = vpop.f32.mrf.mxu0  ;;  %v6265_v17 = vld [vmem:[%s9474_s10 + $0x160] sm:$0xff] }
 0x98f   :  { %v2965_v41 = vadd.f32 %v2964_v13, %v2884_v15  ;;  %v6266_v13 = vld [vmem:[%s9474_s10 + $0x168] sm:$0xff]  ;;  %v6264_v15 = vld [vmem:[%s9474_s10 + $0x158] sm:$0xff] }
 0x990   :  { %v6926_v55 = vpop.f32.mrf.mxu0  ;;  %v2974_v20 = vpop.f32.mrf.mxu1 }
 0x991   :  { %v6263_v55 = vld [vmem:[%s9474_s10 + $0x150] sm:$0xff] }
 0x992   :  { %v2889_v9 = vpop.f32.mrf.mxu0  ;;  %v6973_v21 = vpop.f32.mrf.mxu1 }
 0x993   :  { %v2970_v39 = vadd.f32 %v2969_v16, %v2889_v9  ;;  %v6261_v9 = vld [vmem:[%s9474_s10 + $0x140] sm:$0xff]  ;;  %v6260_v21 = vld [vmem:[%s9474_s10 + $0x138] sm:$0xff] }
 0x994   :  { %v6929_v22 = vpop.f32.mrf.mxu0 }
 0x995   :  { %v6259_v22 = vld [vmem:[%s9474_s10 + $0x130] sm:$0xff] }
 0x996   :  { %v2894_v25 = vpop.f32.mrf.mxu0 }
 0x997   :  { %v2975_v28 = vadd.f32 %v2974_v20, %v2894_v25  ;;  %v6262_v20 = vld [vmem:[%s9474_s10 + $0x148] sm:$0xff] }
 0x998   :  { %v6932_v18 = vpop.f32.mrf.mxu0  ;;  %v6258_v25 = vld [vmem:[%s9474_s10 + $0x128] sm:$0xff] }
 0x999   :  { %v6257_v18 = vld [vmem:[%s9474_s10 + $0x120] sm:$0xff] }
 0x9ae   :  { %v3069_v11 = vpop.f32.mrf.mxu0 }
 0x9af   :  { %v3083_v36 = vadd.f32 %v3069_v11, %v2965_v41  ;;  %v6256_v11 = vld [vmem:[%s9474_s10 + $0x118] sm:$0xff] }
 0x9b0   :  { %v7008_v26 = vpop.f32.mrf.mxu0 }
 0x9b1   :  { %v3093_v37 = vadd.f32 %v6232_v33, %v3083_v36  ;;  %v6255_v26 = vld [vmem:[%s9474_s10 + $0x110] sm:$0xff] }
 0x9b2   :  { %v3074_v32 = vpop.f32.mrf.mxu0 }
 0x9b3   :  { %v3084_v29 = vadd.f32 %v3074_v32, %v2970_v39  ;;  %v3096_v45 = vmax.f32 %v3093_v37, 0.0  ;;  %v6254_v32 = vld [vmem:[%s9474_s10 + $0x108] sm:$0xff] }
 0x9b4   :  { %v7011_v40 = vpop.f32.mrf.mxu0 }
 0x9b5   :  { %v3094_v27 = vadd.f32 %v6232_v33, %v3084_v29  ;;  %v6253_v40 = vld [vmem:[%s9474_s10 + $0x100] sm:$0xff] }
 0x9b6   :  { %v3079_v23 = vpop.f32.mrf.mxu0 }
 0x9b7   :  { %v3085_v42 = vadd.f32 %v3079_v23, %v2975_v28  ;;  %v3097_v30 = vmax.f32 %v3094_v27, 0.0 }
 0x9b8   :  { %v7014_v43 = vpop.f32.mrf.mxu0 }
 0x9b9   :  { %v3095_v50 = vadd.f32 %v6232_v33, %v3085_v42 }
 0x9bb   :  { %v3098_v44 = vmax.f32 %v3095_v50, 0.0 }
 0x9bd   :  { %7016 = vmatpush3.msk.msra.mxu1 %vm2595_vm12, %v3098_v44 }
 0x9be   :  { %7017 = vmatprep.subr.mxu1 %v8047_v0 }
 0x9bf   :  { %7018 = vmatpush3.msra.mxu1 %v3097_v30 }
 0x9c0   :  { %7019 = vmatprep.subr.mxu1 %v8047_v0 }
 0x9c1   :  { %7020 = vmatpush3.msra.mxu1 %v3096_v45 }
 0x9c2   :  { %7022 = vmatmul.mubr.msk.f32.vlgmr.msra.gmra.mxu1 %vm3102_vm14, %v3099_v19  ;;  %7030 = vmatprep.subr.mxu1 %v8047_v0 }
 0x9c3   :  { %7024 = vmatprep.mubr.msk.f32.mxu1 %vm8049_vm2, %v8047_v0  ;;  %7031 = vmatpush3.msra.mxu1 %v6252_v35 }
 0x9c4   :  { %7032 = vmatprep.subr.mxu1 %v8047_v0 }
 0x9c5   :  { %7033 = vmatpush3.msra.mxu1 %v6251_v24 }
 0x9c6   :  { %7025 = vmatmul.mubr.msk.f32.gmra.mxu1 %vm3102_vm14, %v3100_v31  ;;  %7034 = vmatprep.subr.mxu1 %v8047_v0 }
 0x9c7   :  { %7027 = vmatprep.mubr.msk.f32.mxu1 %vm8049_vm2, %v8047_v0  ;;  %7035 = vmatpush3.msra.mxu1 %v6250_v38 }
 0x9c8   :  { %7036 = vmatprep.subr.mxu1 %v8047_v0 }
 0x9c9   :  { %7037 = vmatpush3.msra.mxu1 %v6249_v46 }
 0x9ca   :  { %7028 = vmatmul.mubr.msk.f32.gmra.mxu1 %vm3102_vm14, %v3101_v47  ;;  %7038 = vmatprep.subr.mxu1 %v8047_v0 }
 0x9cb   :  { %7039 = vmatpush3.msra.mxu1 %v6248_v48  ;;  %7062 = vmatprep.mubr.msk.f32.mxu1 %vm8049_vm2, %v8047_v0  ;;  %v6269_v48 = vld [vmem:[#allocation14] ss:$0 sm:$0xff] }
 0x9cc   :  { %7040 = vmatprep.subr.mxu1 %v8047_v0 }
 0x9cd   :  { %7041 = vmatpush3.msra.mxu1 %v6247_v51 }
 0x9ce   :  { %7042 = vmatprep.subr.mxu1 %v8047_v0 }
 0x9cf   :  { %7043 = vmatpush3.msra.mxu1 %v6246_v52 }
 0x9d0   :  { %7044 = vmatprep.subr.mxu1 %v8047_v0 }
 0x9d1   :  { %7045 = vmatpush3.msra.mxu1 %v6245_v53 }
 0x9d2   :  { %7046 = vmatprep.subr.mxu1 %v8047_v0 }
 0x9d3   :  { %7047 = vmatpush3.msra.mxu1 %v6244_v54 }
 0x9d4   :  { %7048 = vmatprep.subr.mxu1 %v8047_v0 }
 0x9d5   :  { %7049 = vmatpush3.msra.mxu1 %v6243_v8 }
 0x9d6   :  { %7050 = vmatprep.subr.mxu1 %v8047_v0 }
 0x9d7   :  { %7051 = vmatpush3.msra.mxu1 %v6242_v49 }
 0x9d8   :  { %7052 = vmatprep.subr.mxu1 %v8047_v0 }
 0x9d9   :  { %7053 = vmatpush3.msra.mxu1 %v6241_v10 }
 0x9da   :  { %7054 = vmatprep.subr.mxu1 %v8047_v0 }
 0x9db   :  { %7055 = vmatpush3.msra.mxu1 %v6240_v58  ;;  %v3535_v58 = vld [vmem:[#allocation15] sm:$0xff] }
 0x9dc   :  { %7056 = vmatprep.subr.mxu1 %v8047_v0 }
 0x9dd   :  { %7057 = vmatpush3.msra.mxu1 %v6239_v60 }
 0x9de   :  { %7058 = vmatprep.subr.mxu1 %v8047_v0 }
 0x9df   :  { %7059 = vmatpush3.msra.mxu1 %v6238_v61 }
 0x9e0   :  { %7060 = vmatprep.subr.mxu1 %v8047_v0 }
 0x9e1   :  { %7061 = vmatpush3.msra.mxu1 %v6237_v62 }
 0x9e2   :  { %7112 = vmatprep.subr.mxu1 %v8047_v0 }
 0xa82   :  { %v9116_v34 = vpop.f32.mrf.mxu1 }
 0xa83   :  { %7104 = vmatmul.mubr.f32.vlgmr.msra.gmra.mxu0 %v9116_v34  ;;  %v3231_v2 = vrot.slane %v9116_v34, 1  ;;  %v3416_v41 = vrot.slane %v9116_v34, 2 }
 0xa84   :  { %v7023_v63 = vpop.f32.mrf.mxu1  ;;  %7106 = vmatprep.mubr.msk.f32.mxu0 %vm8049_vm2, %v8047_v0 }
 0xa85   :  { %v6283_v63 = vld [vmem:[%s9476_s30 + $0x78] sm:$0xff] }
 0xa86   :  { %v9121_v1 = vpop.f32.mrf.mxu1 }
 0xa87   :  { %v3232_v56 = vrot.slane %v9121_v1, 1  ;;  %7107 = vmatmul.mubr.f32.gmra.mxu0 %v9121_v1  ;;  %v3417_v39 = vrot.slane %v9121_v1, 2  ;;  %v6282_v1 = vld [vmem:[%s9476_s30 + $0x70] sm:$0xff] }
 0xa88   :  { %v7026_v3 = vpop.f32.mrf.mxu1  ;;  %7109 = vmatprep.mubr.msk.f32.mxu0 %vm8049_vm2, %v8047_v0 }
 0xa89   :  { %v3233_v5 = vsel %vm2190_vm10, %v3231_v2, %v3232_v56  ;;  %v3418_v29 = vsel %vm2420_vm11, %v3416_v41, %v3417_v39 }
 0xa8a   :  { %v9130_v6 = vpop.f32.mrf.mxu1  ;;  %7063 = vmatmul.mubr.f32.vlgmr.msra.gmra.mxu1 %v3233_v5 }
 0xa8b   :  { %v3234_v12 = vrot.slane %v9130_v6, 1  ;;  %7113 = vmatpush3.msra.mxu1 %v6268_v4  ;;  %7065 = vmatprep.mubr.msk.f32.mxu1 %vm8049_vm2, %v8047_v0  ;;  %v3419_v28 = vrot.slane %v9130_v6, 2 }
 0xa8c   :  { %7114 = vmatprep.subr.mxu1 %v8047_v0  ;;  %7110 = vmatmul.mubr.f32.gmra.mxu0 %v9130_v6  ;;  %v7029_v14 = vpop.f32.mrf.mxu1 }
 0xa8d   :  { %7115 = vmatpush3.msra.mxu1 %v6267_v7  ;;  %v3235_v16 = vsel %vm2190_vm10, %v3232_v56, %v3234_v12  ;;  %v3420_v23 = vsel %vm2420_vm11, %v3417_v39, %v3419_v28  ;;  %7159 = vmatprep.mubr.msk.f32.mxu0 %vm3102_vm14, %v3535_v58  ;;  %v3536_v7 = vld [vmem:[#allocation15 + $0x8] sm:$0xf]  ;;  %v6298_v58 = vld [vmem:[#allocation18] ss:$0 sm:$0xff] }
 0xa8e   :  { %7116 = vmatprep.subr.mxu1 %v8047_v0  ;;  %7066 = vmatmul.mubr.f32.gmra.mxu1 %v3235_v16  ;;  %v3713_v14 = vld [vmem:[%s9476_s30 + $0x38] sm:$0xff]  ;;  %v3712_v16 = vld [vmem:[%s9476_s30 + $0x30] sm:$0xff] }
 0xa8f   :  { %7117 = vmatpush3.msra.mxu1 %v6266_v13  ;;  %7068 = vmatprep.mubr.msk.f32.mxu1 %vm8049_vm2, %v8047_v0  ;;  %v3622_v13 = vld [vmem:[#allocation17 + $0x8] sm:$0xf]  ;;  %v6295_v39 = vld [vmem:[%s9476_s30 + $0xb8] sm:$0xff] }
 0xa90   :  { %7118 = vmatprep.subr.mxu1 %v8047_v0 }
 0xa91   :  { %7119 = vmatpush3.msra.mxu1 %v6265_v17  ;;  %v3711_v17 = vld [vmem:[%s9476_s30 + $0x28] sm:$0xff] }
 0xa92   :  { %7120 = vmatprep.subr.mxu1 %v8047_v0  ;;  %7069 = vmatmul.mubr.f32.gmra.mxu1 %v3234_v12  ;;  %v3621_v12 = vld [vmem:[#allocation17] sm:$0xff] }
 0xa93   :  { %7121 = vmatpush3.msra.mxu1 %v6264_v15  ;;  %7144 = vmatprep.mubr.msk.f32.mxu1 %vm8049_vm2, %v8047_v0  ;;  %v6281_v15 = vld [vmem:[%s9476_s30 + $0x68] sm:$0xff] }
 0xa94   :  { %7122 = vmatprep.subr.mxu1 %v8047_v0 }
 0xa95   :  { %7123 = vmatpush3.msra.mxu1 %v6263_v55  ;;  %v3710_v55 = vld [vmem:[%s9476_s30 + $0x20] sm:$0xff] }
 0xa96   :  { %7124 = vmatprep.subr.mxu1 %v8047_v0 }
 0xa97   :  { %7125 = vmatpush3.msra.mxu1 %v6262_v20  ;;  %v6280_v20 = vld [vmem:[%s9476_s30 + $0x60] sm:$0xff] }
 0xa98   :  { %7126 = vmatprep.subr.mxu1 %v8047_v0 }
 0xa99   :  { %7127 = vmatpush3.msra.mxu1 %v6261_v9  ;;  %v3709_v9 = vld [vmem:[%s9476_s30 + $0x18] sm:$0xff] }
 0xa9a   :  { %7128 = vmatprep.subr.mxu1 %v8047_v0 }
 0xa9b   :  { %7129 = vmatpush3.msra.mxu1 %v6260_v21  ;;  %v6279_v21 = vld [vmem:[%s9476_s30 + $0x58] sm:$0xff] }
 0xa9c   :  { %7130 = vmatprep.subr.mxu1 %v8047_v0 }
 0xa9d   :  { %7131 = vmatpush3.msra.mxu1 %v6259_v22  ;;  %v3708_v22 = vld [vmem:[%s9476_s30 + $0x10] sm:$0xff] }
 0xa9e   :  { %7132 = vmatprep.subr.mxu1 %v8047_v0 }
 0xa9f   :  { %7133 = vmatpush3.msra.mxu1 %v6258_v25  ;;  %v6278_v25 = vld [vmem:[%s9476_s30 + $0x50] sm:$0xff] }
 0xaa0   :  { %7134 = vmatprep.subr.mxu1 %v8047_v0 }
 0xaa1   :  { %7135 = vmatpush3.msra.mxu1 %v6257_v18  ;;  %v3707_v18 = vld [vmem:[%s9476_s30 + $0x8] sm:$0xff] }
 0xaa2   :  { %7136 = vmatprep.subr.mxu1 %v8047_v0 }
 0xaa3   :  { %7137 = vmatpush3.msra.mxu1 %v6256_v11  ;;  %v6277_v11 = vld [vmem:[%s9476_s30 + $0x48] sm:$0xff] }
 0xaa4   :  { %7138 = vmatprep.subr.mxu1 %v8047_v0 }
 0xaa5   :  { %7139 = vmatpush3.msra.mxu1 %v6255_v26  ;;  %v3706_v26 = vld [vmem:[%s9476_s30] sm:$0xff] }
 0xaa6   :  { %7140 = vmatprep.subr.mxu1 %v8047_v0 }
 0xaa7   :  { %7141 = vmatpush3.msra.mxu1 %v6254_v32  ;;  %v6276_v32 = vld [vmem:[%s9476_s30 + $0x40] sm:$0xff] }
 0xaa8   :  { %7142 = vmatprep.subr.mxu1 %v8047_v0 }
 0xaa9   :  { %7143 = vmatpush3.msra.mxu1 %v6253_v40 }
 0xaaa   :  { %7145 = vmatmul.mubr.f32.vlgmr.msra.gmra.mxu1 %v3418_v29  ;;  %7171 = vmatprep.subr.mxu1 %v6283_v63 }
 0xaab   :  { %7147 = vmatprep.mubr.msk.f32.mxu1 %vm8049_vm2, %v8047_v0  ;;  %7172 = vmatpush3.msra.mxu1 %v6283_v63 }
 0xaac   :  { %7173 = vmatprep.subr.mxu1 %v6282_v1 }
 0xaad   :  { %7174 = vmatpush3.msra.mxu1 %v6282_v1 }
 0xaae   :  { %7148 = vmatmul.mubr.f32.gmra.mxu1 %v3420_v23  ;;  %7175 = vmatprep.subr.mxu1 %v6281_v15 }
 0xaaf   :  { %7150 = vmatprep.mubr.msk.f32.mxu1 %vm8049_vm2, %v8047_v0  ;;  %7176 = vmatpush3.msra.mxu1 %v6281_v15  ;;  %v6302_v15 = vld [vmem:[%s9477_s15 + $0x40] sm:$0xff] }
 0xab0   :  { %7177 = vmatprep.subr.mxu1 %v6280_v20 }
 0xab1   :  { %7178 = vmatpush3.msra.mxu1 %v6280_v20 }
 0xab2   :  { %7151 = vmatmul.mubr.f32.gmra.mxu1 %v3419_v28  ;;  %7179 = vmatprep.subr.mxu1 %v6279_v21 }
 0xab3   :  { %7180 = vmatpush3.msra.mxu1 %v6279_v21 }
 0xab4   :  { %7181 = vmatprep.subr.mxu1 %v6278_v25 }
 0xab5   :  { %7182 = vmatpush3.msra.mxu1 %v6278_v25 }
 0xab6   :  { %7183 = vmatprep.subr.mxu1 %v6277_v11 }
 0xab7   :  { %7184 = vmatpush3.msra.mxu1 %v6277_v11 }
 0xab8   :  { %7185 = vmatprep.subr.mxu1 %v6276_v32 }
 0xab9   :  { %7186 = vmatpush3.msra.mxu1 %v6276_v32 }
 0xaba   :  { %7209 = vmatprep.subr.mxu1 %v6295_v39 }
 0xb43   :  { %v3385_v36 = vpop.f32.mrf.mxu0 }
 0xb45   :  { %v7105_v42 = vpop.f32.mrf.mxu0 }
 0xb47   :  { %v3390_v33 = vpop.f32.mrf.mxu0 }
 0xb49   :  { %v7108_v43 = vpop.f32.mrf.mxu0 }
 0xb4a   :  { %v3305_v27 = vpop.f32.mrf.mxu1 }
 0xb4b   :  { %v3386_v52 = vadd.f32 %v3385_v36, %v3305_v27 }
 0xb4c   :  { %v7064_v50 = vpop.f32.mrf.mxu1  ;;  %v3395_v37 = vpop.f32.mrf.mxu0 }
 0xb4e   :  { %v3310_v44 = vpop.f32.mrf.mxu1  ;;  %v7111_v30 = vpop.f32.mrf.mxu0 }
 0xb4f   :  { %v3391_v38 = vadd.f32 %v3390_v33, %v3310_v44  ;;  %v6293_v30 = vld [vmem:[%s9476_s30 + $0xa8] sm:$0xff] }
 0xb50   :  { %v7067_v45 = vpop.f32.mrf.mxu1 }
 0xb51   :  { %v6292_v45 = vld [vmem:[%s9476_s30 + $0xa0] sm:$0xff] }
 0xb52   :  { %v3315_v19 = vpop.f32.mrf.mxu1 }
 0xb53   :  { %v3396_v53 = vadd.f32 %v3395_v37, %v3315_v19  ;;  %v6294_v37 = vld [vmem:[%s9476_s30 + $0xb0] sm:$0xff]  ;;  %v6291_v19 = vld [vmem:[%s9476_s30 + $0x98] sm:$0xff] }
 0xb54   :  { %v7070_v35 = vpop.f32.mrf.mxu1 }
 0xb55   :  { %v6290_v35 = vld [vmem:[%s9476_s30 + $0x90] sm:$0xff] }
 0xb6a   :  { %v3490_v24 = vpop.f32.mrf.mxu1 }
 0xb6b   :  { %v3504_v49 = vadd.f32 %v3490_v24, %v3386_v52  ;;  %v6289_v24 = vld [vmem:[%s9476_s30 + $0x88] sm:$0xff]  ;;  %v4081_v52 = vld [vmem:[%s9477_s15 + $0x18] sm:$0xff] }
 0xb6c   :  { %v7146_v31 = vpop.f32.mrf.mxu1 }
 0xb6d   :  { %v3514_v61 = vadd.f32 %v6269_v48, %v3504_v49  ;;  %v6288_v31 = vld [vmem:[%s9476_s30 + $0x80] sm:$0xff] }
 0xb6e   :  { %v3495_v46 = vpop.f32.mrf.mxu1 }
 0xb6f   :  { %v3505_v47 = vadd.f32 %v3495_v46, %v3391_v38  ;;  %v3517_v34 = vmax.f32 %v3514_v61, 0.0  ;;  %v3991_v38 = vld [vmem:[#allocation20] sm:$0xff] }
 0xb70   :  { %v7149_v51 = vpop.f32.mrf.mxu1  ;;  %v4085_v46 = vld [vmem:[%s9477_s15 + $0x38] sm:$0xff] }
 0xb71   :  { %v3515_v54 = vadd.f32 %v6269_v48, %v3505_v47  ;;  %v4084_v47 = vld [vmem:[%s9477_s15 + $0x30] sm:$0xff]  ;;  %v4082_v51 = vld [vmem:[%s9477_s15 + $0x20] sm:$0xff] }
 0xb72   :  { %v3500_v8 = vpop.f32.mrf.mxu1 }
 0xb73   :  { %v3518_v10 = vmax.f32 %v3515_v54, 0.0  ;;  %v3506_v57 = vadd.f32 %v3500_v8, %v3396_v53 }
 0xb74   :  { %v7152_v59 = vpop.f32.mrf.mxu1 }
 0xb75   :  { %v3516_v60 = vadd.f32 %v6269_v48, %v3506_v57  ;;  %3525 = vrot.lane.b32.xlu0 %v3518_v10, %s8061_s29  ;;  %v4083_v48 = vld [vmem:[%s9477_s15 + $0x28] sm:$0xff] }
 0xb77   :  { %v3519_v62 = vmax.f32 %v3516_v60, 0.0 }
 0xb79   :  { %3527 = vrot.lane.b32.xlu1 %v3519_v62, %s8061_s29 }
 0xb7d   :  { %3523 = vrot.lane.b32.xlu1 %v3517_v34, %s8061_s29 }
 0xbe7   :  { %v3526_v2 = vpop.permute.xlu0 %3525 }
 0xbe8   :  { %v3533_v4 = vmax.f32 %v3518_v10, %v3526_v2 }
 0xbeb   :  { %v3528_v56 = vpop.permute.xlu1 %3527 }
 0xbec   :  { %v3534_v3 = vmax.f32 %v3519_v62, %v3528_v56  ;;  %v3992_v56 = vld [vmem:[#allocation20 + $0x8] sm:$0xf] }
 0xbee   :  { %7153 = vmatprep.subr.msk.mxu0 %vm2595_vm12, %v3534_v3 }
 0xbef   :  { %7154 = vmatpush3.msk.msra.mxu0 %vm2595_vm12, %v3534_v3  ;;  %v3524_v5 = vpop.permute.xlu1 %3523 }
 0xbf0   :  { %v3532_v6 = vmax.f32 %v3517_v34, %v3524_v5  ;;  %7155 = vmatprep.subr.mxu0 %v3533_v4  ;;  %v6307_v5 = vld [vmem:[%s9477_s15 + $0x68] sm:$0xff] }
 0xbf1   :  { %7156 = vmatpush3.msra.mxu0 %v3533_v4 }
 0xbf2   :  { %7157 = vmatprep.subr.mxu0 %v3532_v6 }
 0xbf3   :  { %7158 = vmatpush3.msra.mxu0 %v3532_v6 }
 0xbf4   :  { %7162 = vmatprep.subr.msk.mxu0 %vm2595_vm12, %v3534_v3  ;;  %7160 = vmatmul.mubr.msk.f32.vlgmr.msra.gmra.mxu0 %vm3102_vm14, %v3536_v7  ;;  %v6305_v7 = vld [vmem:[%s9477_s15 + $0x58] sm:$0xff] }
 0xbf5   :  { %7163 = vmatpush3.msk.msra.mxu0 %vm2595_vm12, %v3534_v3  ;;  %7168 = vmatprep.mubr.msk.f32.mxu0 %vm3102_vm14, %v3621_v12  ;;  %v6309_v3 = vld [vmem:[%s9477_s15 + $0x78] sm:$0xff]  ;;  %v4080_v12 = vld [vmem:[%s9477_s15 + $0x10] sm:$0xff] }
 0xbf6   :  { %7164 = vmatprep.subr.mxu0 %v3533_v4 }
 0xbf7   :  { %7165 = vmatpush3.msra.mxu0 %v3533_v4  ;;  %v6308_v4 = vld [vmem:[%s9477_s15 + $0x70] sm:$0xff] }
 0xbf8   :  { %7166 = vmatprep.subr.mxu0 %v3532_v6 }
 0xbf9   :  { %7167 = vmatpush3.msra.mxu0 %v3532_v6  ;;  %v6306_v6 = vld [vmem:[%s9477_s15 + $0x60] sm:$0xff] }
 0xbfa   :  { %7169 = vmatmul.mubr.msk.f32.vlgmr.msra.gmra.mxu0 %vm3102_vm14, %v3622_v13  ;;  %7190 = vmatprep.subr.mxu0 %v3713_v14  ;;  %v6304_v13 = vld [vmem:[%s9477_s15 + $0x50] sm:$0xff] }
 0xbfb   :  { %7191 = vmatpush3.msra.mxu0 %v3713_v14  ;;  %v4079_v14 = vld [vmem:[%s9477_s15 + $0x8] sm:$0xff] }
 0xbfc   :  { %7192 = vmatprep.subr.mxu0 %v3712_v16 }
 0xbfd   :  { %7193 = vmatpush3.msra.mxu0 %v3712_v16  ;;  %v6303_v16 = vld [vmem:[%s9477_s15 + $0x48] sm:$0xff] }
 0xbfe   :  { %7194 = vmatprep.subr.mxu0 %v3711_v17 }
 0xbff   :  { %7195 = vmatpush3.msra.mxu0 %v3711_v17  ;;  %v4078_v17 = vld [vmem:[%s9477_s15] sm:$0xff] }
 0xc00   :  { %7196 = vmatprep.subr.mxu0 %v3710_v55 }
 0xc01   :  { %7197 = vmatpush3.msra.mxu0 %v3710_v55  ;;  %v6321_v55 = vld [vmem:[%s9477_s15 + $0xb8] sm:$0xff] }
 0xc02   :  { %7198 = vmatprep.subr.mxu0 %v3709_v9 }
 0xc03   :  { %7199 = vmatpush3.msra.mxu0 %v3709_v9 }
 0xc04   :  { %7200 = vmatprep.subr.mxu0 %v3708_v22 }
 0xc05   :  { %7201 = vmatpush3.msra.mxu0 %v3708_v22 }
 0xc06   :  { %7202 = vmatprep.subr.mxu0 %v3707_v18 }
 0xc07   :  { %7203 = vmatpush3.msra.mxu0 %v3707_v18 }
 0xc08   :  { %7204 = vmatprep.subr.mxu0 %v3706_v26 }
 0xc09   :  { %7205 = vmatpush3.msra.mxu0 %v3706_v26  ;;  %v6320_v26 = vld [vmem:[%s9477_s15 + $0xb0] sm:$0xff] }
 0xcb4   :  { %v7161_v40 = vpop.f32.mrf.mxu0 }
 0xcb6   :  { %v3612_v41 = vpop.f32.mrf.mxu0 }
 0xcba   :  { %v7170_v28 = vpop.f32.mrf.mxu0 }
 0xcbb   :  { %v3705_v29 = vmax.f32 %v7161_v40, %v7170_v28  ;;  %v6318_v40 = vld [vmem:[%s9477_s15 + $0xa0] sm:$0xff]  ;;  %v6316_v28 = vld [vmem:[%s9477_s15 + $0x90] sm:$0xff] }
 0xcbc   :  { %v3695_v23 = vpop.f32.mrf.mxu0 }
 0xcbd   :  { %v3704_v36 = vmax.f32 %v3612_v41, %v3695_v23  ;;  %v3726_v42 = vrot.slane %v3705_v29, 1  ;;  %v3897_v27 = vrot.slane %v3705_v29, 2  ;;  %v6317_v41 = vld [vmem:[%s9477_s15 + $0x98] sm:$0xff]  ;;  %v6314_v23 = vld [vmem:[%s9477_s15 + $0x80] sm:$0xff] }
 0xcbf   :  { %v3725_v33 = vrot.slane %v3704_v36, 1  ;;  %v3896_v43 = vrot.slane %v3704_v36, 2  ;;  %7206 = vmatprep.mubr.msk.f32.mxu0 %vm3728_vm15, %v3704_v36 }
 0xcc0   :  { %7207 = vmatmul.mubr.msk.f32.vlgmr.msra.gmra.mxu0 %vm3728_vm15, %v3705_v29  ;;  %v6315_v29 = vld [vmem:[%s9477_s15 + $0x88] sm:$0xff] }
 0xcc1   :  { %v3727_v50 = vsel %vm2190_vm10, %v3725_v33, %v3726_v42  ;;  %v3898_v44 = vsel %vm2420_vm11, %v3896_v43, %v3897_v27  ;;  %7232 = vmatprep.mubr.msk.f32.mxu0 %vm3993_vm1, %v3991_v38 }
 0xcc2   :  { %7187 = vmatprep.mubr.msk.f32.mxu1 %vm3728_vm15, %v3727_v50 }
 0xcc3   :  { %7188 = vmatmul.mubr.msk.f32.vlgmr.msra.gmra.mxu1 %vm3728_vm15, %v3726_v42 }
 0xcc4   :  { %7210 = vmatpush3.msra.mxu1 %v6295_v39  ;;  %7225 = vmatprep.mubr.msk.f32.mxu1 %vm3728_vm15, %v3898_v44  ;;  %v6319_v39 = vld [vmem:[%s9477_s15 + $0xa8] sm:$0xff] }
 0xcc5   :  { %7211 = vmatprep.subr.mxu1 %v6294_v37 }
 0xcc6   :  { %7212 = vmatpush3.msra.mxu1 %v6294_v37  ;;  %v6324_v37 = vld [vmem:[#allocation21] ss:$0 sm:$0xff] }
 0xcc7   :  { %7213 = vmatprep.subr.mxu1 %v6293_v30 }
 0xcc8   :  { %7214 = vmatpush3.msra.mxu1 %v6293_v30 }
 0xcc9   :  { %7215 = vmatprep.subr.mxu1 %v6292_v45 }
 0xcca   :  { %7216 = vmatpush3.msra.mxu1 %v6292_v45 }
 0xccb   :  { %7217 = vmatprep.subr.mxu1 %v6291_v19 }
 0xccc   :  { %7218 = vmatpush3.msra.mxu1 %v6291_v19 }
 0xccd   :  { %7219 = vmatprep.subr.mxu1 %v6290_v35 }
 0xcce   :  { %7220 = vmatpush3.msra.mxu1 %v6290_v35 }
 0xccf   :  { %7221 = vmatprep.subr.mxu1 %v6289_v24 }
 0xcd0   :  { %7222 = vmatpush3.msra.mxu1 %v6289_v24 }
 0xcd1   :  { %7223 = vmatprep.subr.mxu1 %v6288_v31 }
 0xcd2   :  { %7224 = vmatpush3.msra.mxu1 %v6288_v31 }
 0xcd3   :  { %7226 = vmatmul.mubr.msk.f32.vlgmr.msra.gmra.mxu1 %vm3728_vm15, %v3897_v27  ;;  %7254 = vmatprep.subr.mxu1 %v4085_v46 }
 0xcd4   :  { %7255 = vmatpush3.msra.mxu1 %v4085_v46 }
 0xcd5   :  { %7256 = vmatprep.subr.mxu1 %v4084_v47 }
 0xcd6   :  { %7257 = vmatpush3.msra.mxu1 %v4084_v47 }
 0xcd7   :  { %7258 = vmatprep.subr.mxu1 %v4083_v48 }
 0xcd8   :  { %7259 = vmatpush3.msra.mxu1 %v4083_v48 }
 0xcd9   :  { %7260 = vmatprep.subr.mxu1 %v4082_v51 }
 0xcda   :  { %7261 = vmatpush3.msra.mxu1 %v4082_v51 }
 0xcdb   :  { %7262 = vmatprep.subr.mxu1 %v4081_v52 }
 0xcdc   :  { %7263 = vmatpush3.msra.mxu1 %v4081_v52  ;;  %v4372_v52 = vld [vmem:[%s9478_s16] sm:$0xff] }
 0xcdd   :  { %7264 = vmatprep.subr.mxu1 %v4080_v12 }
 0xcde   :  { %7265 = vmatpush3.msra.mxu1 %v4080_v12 }
 0xcdf   :  { %7266 = vmatprep.subr.mxu1 %v4079_v14 }
 0xce0   :  { %7267 = vmatpush3.msra.mxu1 %v4079_v14 }
 0xce1   :  { %7268 = vmatprep.subr.mxu1 %v4078_v17 }
 0xce2   :  { %7269 = vmatpush3.msra.mxu1 %v4078_v17 }
 0xce3   :  { %7292 = vmatprep.subr.mxu1 %v8047_v0 }
 0xd80   :  { %v7208_v54 = vpop.f32.mrf.mxu0 }
 0xd82   :  { %v3878_v10 = vpop.f32.mrf.mxu0 }
 0xd83   :  { %v7189_v53 = vpop.f32.mrf.mxu1 }
 0xd84   :  { %v3884_v49 = vadd.f32 %v7208_v54, %v7189_v53  ;;  %v4449_v53 = vld [vmem:[%s9479_s24] sm:$0xff]  ;;  %v4527_v54 = vld [vmem:[%s9480_s0 + $0x18] sm:$0xff] }
 0xd85   :  { %v3799_v8 = vpop.f32.mrf.mxu1 }
 0xd86   :  { %v3879_v59 = vadd.f32 %v3878_v10, %v3799_v8  ;;  %v6332_v8 = vld [vmem:[%s9480_s0 + $0x38] sm:$0xff]  ;;  %v6331_v10 = vld [vmem:[%s9480_s0 + $0x30] sm:$0xff] }
 0xd93   :  { %v7227_v57 = vpop.f32.mrf.mxu1 }
 0xd94   :  { %v3979_v60 = vadd.f32 %v7227_v57, %v3884_v49  ;;  %v4526_v49 = vld [vmem:[%s9480_s0 + $0x10] sm:$0xff]  ;;  %v4525_v57 = vld [vmem:[%s9480_s0 + $0x8] sm:$0xff] }
 0xd95   :  { %v3969_v61 = vpop.f32.mrf.mxu1 }
 0xd96   :  { %v3988_v62 = vadd.f32 %v6298_v58, %v3979_v60  ;;  %v3978_v34 = vadd.f32 %v3969_v61, %v3879_v59  ;;  %v4524_v59 = vld [vmem:[%s9480_s0] sm:$0xff] }
 0xd97   :  { %v6329_v60 = vld [vmem:[%s9480_s0 + $0x20] sm:$0xff] }
 0xd98   :  { %v3990_v63 = vmax.f32 %v3988_v62, 0.0  ;;  %v3987_v1 = vadd.f32 %v6298_v58, %v3978_v34  ;;  %v6330_v58 = vld [vmem:[%s9480_s0 + $0x28] sm:$0xff] }
 0xd9a   :  { %v3989_v2 = vmax.f32 %v3987_v1, 0.0  ;;  %7228 = vmatprep.subr.msk.mxu0 %vm2595_vm12, %v3990_v63 }
 0xd9b   :  { %7229 = vmatpush3.msk.msra.mxu0 %vm2595_vm12, %v3990_v63 }
 0xd9c   :  { %7230 = vmatprep.subr.mxu0 %v3989_v2 }
 0xd9d   :  { %7231 = vmatpush3.msra.mxu0 %v3989_v2 }
 0xd9e   :  { %7233 = vmatmul.mubr.msk.f32.vlgmr.msra.gmra.mxu0 %vm3993_vm1, %v3992_v56  ;;  %7235 = vmatprep.subr.mxu0 %v6309_v3  ;;  %v6338_v56 = vld [vmem:[%s9480_s0 + $0x58] sm:$0xff] }
 0xd9f   :  { %7236 = vmatpush3.msra.mxu0 %v6309_v3  ;;  %v6337_v3 = vld [vmem:[%s9480_s0 + $0x50] sm:$0xff] }
 0xda0   :  { %7237 = vmatprep.subr.mxu0 %v6308_v4 }
 0xda1   :  { %7238 = vmatpush3.msra.mxu0 %v6308_v4  ;;  %v6336_v4 = vld [vmem:[%s9480_s0 + $0x48] sm:$0xff] }
 0xda2   :  { %7239 = vmatprep.subr.mxu0 %v6307_v5 }
 0xda3   :  { %7240 = vmatpush3.msra.mxu0 %v6307_v5  ;;  %v6335_v5 = vld [vmem:[%s9480_s0 + $0x40] sm:$0xff] }
 0xda4   :  { %7241 = vmatprep.subr.mxu0 %v6306_v6 }
 0xda5   :  { %7242 = vmatpush3.msra.mxu0 %v6306_v6 }
 0xda6   :  { %7243 = vmatprep.subr.mxu0 %v6305_v7 }
 0xda7   :  { %7244 = vmatpush3.msra.mxu0 %v6305_v7 }
 0xda8   :  { %7245 = vmatprep.subr.mxu0 %v6304_v13 }
 0xda9   :  { %7246 = vmatpush3.msra.mxu0 %v6304_v13 }
 0xdaa   :  { %7247 = vmatprep.subr.mxu0 %v6303_v16 }
 0xdab   :  { %7248 = vmatpush3.msra.mxu0 %v6303_v16 }
 0xdac   :  { %7249 = vmatprep.subr.mxu0 %v6302_v15 }
 0xdad   :  { %7250 = vmatpush3.msra.mxu0 %v6302_v15  ;;  %v6340_v15 = vld [vmem:[#allocation23] ss:$0 sm:$0xff] }
 0xdae   :  { %7273 = vmatprep.subr.mxu0 %v6321_v55 }
 0xe5e   :  { %v7234_v20 = vpop.f32.mrf.mxu0 }
 0xe5f   :  { %v4098_v21 = vrot.slane %v7234_v20, 1  ;;  %v4268_v18 = vrot.slane %v7234_v20, 2 }
 0xe60   :  { %v4069_v9 = vpop.f32.mrf.mxu0 }
 0xe61   :  { %v4097_v22 = vrot.slane %v4069_v9, 1  ;;  %v4267_v25 = vrot.slane %v4069_v9, 2  ;;  %7270 = vmatprep.mubr.msk.f32.mxu1 %vm3728_vm15, %v4069_v9 }
 0xe62   :  { %7271 = vmatmul.mubr.msk.f32.vlgmr.msra.gmra.mxu1 %vm3728_vm15, %v7234_v20 }
 0xe63   :  { %v4099_v11 = vsel %vm2190_vm10, %v4097_v22, %v4098_v21  ;;  %7296 = vmatprep.mubr.msk.f32.mxu1 %vm8049_vm2, %v8047_v0  ;;  %v4269_v32 = vsel %vm2420_vm11, %v4267_v25, %v4268_v18  ;;  %v4767_v22 = vld [vmem:[#allocation24] sm:$0xff]  ;;  %v6346_v25 = vld [vmem:[%s9481_s22 + $0x38] sm:$0xff] }
 0xe64   :  { %7251 = vmatprep.mubr.msk.f32.mxu0 %vm3728_vm15, %v4099_v11  ;;  %v6344_v11 = vld [vmem:[%s9481_s22 + $0x28] sm:$0xff] }
 0xe65   :  { %7252 = vmatmul.mubr.msk.f32.vlgmr.msra.gmra.mxu0 %vm3728_vm15, %v4098_v21 }
 0xe66   :  { %7274 = vmatpush3.msra.mxu0 %v6321_v55  ;;  %7289 = vmatprep.mubr.msk.f32.mxu0 %vm3728_vm15, %v4269_v32  ;;  %v4847_v32 = vld [vmem:[%s9481_s22 + $0x10] sm:$0xff] }
 0xe67   :  { %7275 = vmatprep.subr.mxu0 %v6320_v26 }
 0xe68   :  { %7276 = vmatpush3.msra.mxu0 %v6320_v26  ;;  %v4848_v26 = vld [vmem:[%s9481_s22 + $0x18] sm:$0xff] }
 0xe69   :  { %7277 = vmatprep.subr.mxu0 %v6319_v39 }
 0xe6a   :  { %7278 = vmatpush3.msra.mxu0 %v6319_v39  ;;  %v4846_v39 = vld [vmem:[%s9481_s22 + $0x8] sm:$0xff] }
 0xe6b   :  { %7279 = vmatprep.subr.mxu0 %v6318_v40 }
 0xe6c   :  { %7280 = vmatpush3.msra.mxu0 %v6318_v40  ;;  %v6343_v40 = vld [vmem:[%s9481_s22 + $0x20] sm:$0xff] }
 0xe6d   :  { %7281 = vmatprep.subr.mxu0 %v6317_v41 }
 0xe6e   :  { %7282 = vmatpush3.msra.mxu0 %v6317_v41  ;;  %v4845_v41 = vld [vmem:[%s9481_s22] sm:$0xff] }
 0xe6f   :  { %7283 = vmatprep.subr.mxu0 %v6316_v28 }
 0xe70   :  { %7284 = vmatpush3.msra.mxu0 %v6316_v28 }
 0xe71   :  { %7285 = vmatprep.subr.mxu0 %v6315_v29 }
 0xe72   :  { %7286 = vmatpush3.msra.mxu0 %v6315_v29 }
 0xe73   :  { %7287 = vmatprep.subr.mxu0 %v6314_v23 }
 0xe74   :  { %7288 = vmatpush3.msra.mxu0 %v6314_v23  ;;  %v6352_v23 = vld [vmem:[%s9481_s22 + $0x58] sm:$0xff] }
 0xe75   :  { %7290 = vmatmul.mubr.msk.f32.vlgmr.msra.gmra.mxu0 %vm3728_vm15, %v4268_v18  ;;  %7306 = vmatprep.subr.mxu0 %v8047_v0  ;;  %v6345_v18 = vld [vmem:[%s9481_s22 + $0x30] sm:$0xff] }
 0xe76   :  { %7314 = vmatprep.mubr.msk.f32.mxu0 %vm8049_vm2, %v8047_v0  ;;  %7307 = vmatpush3.msra.mxu0 %v6332_v8  ;;  %v5245_v8 = vld [vmem:[%s9482_s14] sm:$0xff] }
 0xe77   :  { %7308 = vmatprep.subr.mxu0 %v8047_v0 }
 0xe78   :  { %7309 = vmatpush3.msra.mxu0 %v6331_v10 }
 0xe79   :  { %7310 = vmatprep.subr.mxu0 %v8047_v0 }
 0xe7a   :  { %7311 = vmatpush3.msra.mxu0 %v6330_v58 }
 0xe7b   :  { %7312 = vmatprep.subr.mxu0 %v8047_v0 }
 0xe7c   :  { %7313 = vmatpush3.msra.mxu0 %v6329_v60 }
 0xe7d   :  { %7328 = vmatprep.subr.mxu0 %v8047_v0 }
 0xf22   :  { %v7272_v42 = vpop.f32.mrf.mxu1 }
 0xf24   :  { %v4249_v27 = vpop.f32.mrf.mxu1 }
 0xf25   :  { %v7253_v36 = vpop.f32.mrf.mxu0 }
 0xf26   :  { %v4255_v43 = vadd.f32 %v7272_v42, %v7253_v36  ;;  %v6351_v42 = vld [vmem:[%s9481_s22 + $0x50] sm:$0xff] }
 0xf27   :  { %v4170_v33 = vpop.f32.mrf.mxu0 }
 0xf28   :  { %v4250_v44 = vadd.f32 %v4249_v27, %v4170_v33  ;;  %v6350_v33 = vld [vmem:[%s9481_s22 + $0x48] sm:$0xff] }
 0xf35   :  { %v7291_v50 = vpop.f32.mrf.mxu0 }
 0xf36   :  { %v4350_v30 = vadd.f32 %v7291_v50, %v4255_v43  ;;  %v6349_v43 = vld [vmem:[%s9481_s22 + $0x40] sm:$0xff] }
 0xf37   :  { %v4340_v45 = vpop.f32.mrf.mxu0 }
 0xf38   :  { %v4359_v19 = vadd.f32 %v6324_v37, %v4350_v30  ;;  %v4349_v35 = vadd.f32 %v4340_v45, %v4250_v44 }
 0xf3a   :  { %v4361_v24 = vmax.f32 %v4359_v19, 0.0  ;;  %v4358_v31 = vadd.f32 %v6324_v37, %v4349_v35  ;;  %v6354_v35 = vld [vmem:[#allocation26] ss:$0 sm:$0xff] }
 0xf3c   :  { %v4360_v38 = vmax.f32 %v4358_v31, 0.0  ;;  %4366 = vrot.lane.b32.xlu0 %v4361_v24, %s8060_s20 }
 0xf3e   :  { %4364 = vrot.lane.b32.xlu1 %v4360_v38, %s8060_s20 }
 0xfae   :  { %v4367_v46 = vpop.permute.xlu0 %4366 }
 0xfaf   :  { %v4371_v47 = vmax.f32 %v4361_v24, %v4367_v46 }
 0xfb0   :  { %v4365_v48 = vpop.permute.xlu1 %4364 }
 0xfb1   :  { %v4370_v51 = vmax.f32 %v4360_v38, %v4365_v48  ;;  %7293 = vmatpush3.msk.msra.mxu1 %vm2595_vm12, %v4371_v47 }
 0xfb2   :  { %7294 = vmatprep.subr.mxu1 %v8047_v0 }
 0xfb3   :  { %7295 = vmatpush3.msra.mxu1 %v4370_v51 }
 0xfb4   :  { %7297 = vmatmul.mubr.msk.f32.vlgmr.msra.gmra.mxu1 %vm3993_vm1, %v4372_v52  ;;  %7299 = vmatprep.subr.mxu1 %v8047_v0  ;;  %v5170_v52 = vld [vmem:[#allocation29] sm:$0x3f] }
 0xfb5   :  { %7300 = vmatpush3.msk.msra.mxu1 %vm2595_vm12, %v4371_v47  ;;  %7303 = vmatprep.mubr.msk.f32.mxu1 %vm8049_vm2, %v8047_v0 }
 0xfb6   :  { %7301 = vmatprep.subr.mxu1 %v8047_v0 }
 0xfb7   :  { %7302 = vmatpush3.msra.mxu1 %v4370_v51  ;;  %v5093_v51 = vld [vmem:[#allocation27] sm:$0x3f] }
 0xfb8   :  { %7304 = vmatmul.mubr.msk.f32.vlgmr.msra.gmra.mxu1 %vm3993_vm1, %v4449_v53  ;;  %7317 = vmatprep.subr.mxu1 %v8047_v0  ;;  %v5246_v53 = vld [vmem:[%s9482_s14 + $0x8] sm:$0xff] }
 0xfb9   :  { %7325 = vmatprep.mubr.msk.f32.mxu1 %vm8049_vm2, %v8047_v0  ;;  %7318 = vmatpush3.msra.mxu1 %v4527_v54  ;;  %v6360_v54 = vld [vmem:[%s9482_s14 + $0x18] sm:$0xff] }
 0xfba   :  { %7319 = vmatprep.subr.mxu1 %v8047_v0 }
 0xfbb   :  { %7320 = vmatpush3.msra.mxu1 %v4526_v49  ;;  %v6359_v49 = vld [vmem:[%s9482_s14 + $0x10] sm:$0xff] }
 0xfbc   :  { %7321 = vmatprep.subr.mxu1 %v8047_v0 }
 0xfbd   :  { %7322 = vmatpush3.msra.mxu1 %v4525_v57 }
 0xfbe   :  { %7323 = vmatprep.subr.mxu1 %v8047_v0 }
 0xfbf   :  { %7324 = vmatpush3.msra.mxu1 %v4524_v59 }
 0xfc0   :  { %7339 = vmatprep.subr.mxu1 %v8047_v0 }
0x1074   :  { %v4445_v61 = vpop.f32.mrf.mxu1 }
0x1076   :  { %v7298_v62 = vpop.f32.mrf.mxu1 }
0x1077   :  { %v6364_v62 = vld [vmem:[%s9482_s14 + $0x28] sm:$0xff] }
0x1078   :  { %v4519_v34 = vpop.f32.mrf.mxu1 }
0x1079   :  { %v4523_v63 = vmax.f32 %v4445_v61, %v4519_v34  ;;  %v6363_v34 = vld [vmem:[%s9482_s14 + $0x20] sm:$0xff] }
0x107a   :  { %v7305_v1 = vpop.f32.mrf.mxu1 }
0x107b   :  { %v4534_v2 = vrot.slane %v4523_v63, 1  ;;  %7326 = vmatmul.mubr.msk.f32.vlgmr.msra.gmra.mxu1 %vm2200_vm8, %v4523_v63  ;;  %v4684_v6 = vrot.slane %v4523_v63, 2 }
0x107c   :  { %7341 = vmatprep.mubr.msk.f32.mxu1 %vm8049_vm2, %v8047_v0 }
0x107d   :  { %7315 = vmatmul.mubr.msk.f32.vlgmr.msra.gmra.mxu0 %vm2200_vm8, %v4534_v2 }
0x107e   :  { %7329 = vmatpush3.msra.mxu0 %v6338_v56  ;;  %7336 = vmatprep.mubr.msk.f32.mxu0 %vm8049_vm2, %v8047_v0 }
0x107f   :  { %7330 = vmatprep.subr.mxu0 %v8047_v0 }
0x1080   :  { %7331 = vmatpush3.msra.mxu0 %v6337_v3 }
0x1081   :  { %7332 = vmatprep.subr.mxu0 %v8047_v0 }
0x1082   :  { %7333 = vmatpush3.msra.mxu0 %v6336_v4 }
0x1083   :  { %7334 = vmatprep.subr.mxu0 %v8047_v0 }
0x1084   :  { %7335 = vmatpush3.msra.mxu0 %v6335_v5 }
0x1085   :  { %7337 = vmatmul.mubr.msk.f32.vlgmr.msra.gmra.mxu0 %vm2200_vm8, %v4684_v6  ;;  %7355 = vmatprep.subr.mxu0 %v8047_v0  ;;  %v6366_v6 = vld [vmem:[%s9483_s13] ss:$0 sm:$0xff] }
0x1086   :  { %7363 = vmatprep.mubr.msk.f32.mxu0 %vm8049_vm2, %v8047_v0  ;;  %7356 = vmatpush3.msra.mxu0 %v4848_v26 }
0x1087   :  { %7357 = vmatprep.subr.mxu0 %v8047_v0 }
0x1088   :  { %7358 = vmatpush3.msra.mxu0 %v4847_v32 }
0x1089   :  { %7359 = vmatprep.subr.mxu0 %v8047_v0 }
0x108a   :  { %7360 = vmatpush3.msra.mxu0 %v4846_v39 }
0x108b   :  { %7361 = vmatprep.subr.mxu0 %v8047_v0 }
0x108c   :  { %7362 = vmatpush3.msra.mxu0 %v4845_v41 }
0x108d   :  { %7377 = vmatprep.subr.mxu0 %v8047_v0 }
0x113b   :  { %v4675_v7 = vpop.f32.mrf.mxu1 }
0x113d   :  { %v4603_v12 = vpop.f32.mrf.mxu0  ;;  %v7327_v13 = vpop.f32.mrf.mxu1 }
0x113e   :  { %v4676_v16 = vadd.f32 %v4675_v7, %v4603_v12 }
0x113f   :  { %v7316_v14 = vpop.f32.mrf.mxu0 }
0x1145   :  { %v4753_v17 = vpop.f32.mrf.mxu0 }
0x1146   :  { %v4757_v55 = vadd.f32 %v4753_v17, %v4676_v16  ;;  %v5482_v16 = vld [vmem:[%s9484_s9] sm:$0x3f]  ;;  %v5561_v17 = vld [vmem:[%s9485_s18 + $0x8] sm:$0xff] }
0x1147   :  { %v7338_v20 = vpop.f32.mrf.mxu0 }
0x1148   :  { %v4765_v9 = vadd.f32 %v6340_v15, %v4757_v55  ;;  %v6370_v15 = vld [vmem:[%s9485_s18 + $0x18] sm:$0xff]  ;;  %v5560_v55 = vld [vmem:[%s9485_s18] sm:$0xff]  ;;  %v6369_v20 = vld [vmem:[%s9485_s18 + $0x10] sm:$0xff] }
0x114a   :  { %v4766_v21 = vmax.f32 %v4765_v9, 0.0 }
0x114c   :  { %7340 = vmatpush3.msk.msra.mxu1 %vm2420_vm11, %v4766_v21 }
0x114d   :  { %7342 = vmatmul.mubr.msk.f32.vlgmr.msra.gmra.mxu1 %vm4768_vm3, %v4767_v22  ;;  %7344 = vmatprep.subr.mxu1 %v8047_v0  ;;  %v6374_v22 = vld [vmem:[%s9485_s18 + $0x28] sm:$0xff] }
0x114e   :  { %7345 = vmatpush3.msra.mxu1 %v6346_v25  ;;  %7352 = vmatprep.mubr.msk.f32.mxu1 %vm8049_vm2, %v8047_v0 }
0x114f   :  { %7346 = vmatprep.subr.mxu1 %v8047_v0 }
0x1150   :  { %7347 = vmatpush3.msra.mxu1 %v6345_v18  ;;  %v6373_v18 = vld [vmem:[%s9485_s18 + $0x20] sm:$0xff] }
0x1151   :  { %7348 = vmatprep.subr.mxu1 %v8047_v0 }
0x1152   :  { %7349 = vmatpush3.msra.mxu1 %v6344_v11 }
0x1153   :  { %7350 = vmatprep.subr.mxu1 %v8047_v0 }
0x1154   :  { %7351 = vmatpush3.msra.mxu1 %v6343_v40  ;;  %v5879_v40 = vld [vmem:[%s9486_s23] sm:$0xff] }
0x1155   :  { %7366 = vmatprep.subr.mxu1 %v8047_v0 }
0x120d   :  { %v4841_v28 = vpop.f32.mrf.mxu1 }
0x120e   :  { %v4855_v29 = vrot.slane %v4841_v28, 1  ;;  %7364 = vmatmul.mubr.msk.f32.vlgmr.msra.gmra.mxu0 %vm2200_vm8, %v4841_v28  ;;  %v5005_v27 = vrot.slane %v4841_v28, 2 }
0x120f   :  { %v7343_v36 = vpop.f32.mrf.mxu1  ;;  %7379 = vmatprep.mubr.msk.f32.mxu0 %vm8049_vm2, %v8047_v0 }
0x1210   :  { %7353 = vmatmul.mubr.msk.f32.vlgmr.msra.gmra.mxu1 %vm2200_vm8, %v4855_v29 }
0x1211   :  { %7367 = vmatpush3.msra.mxu1 %v6352_v23  ;;  %7374 = vmatprep.mubr.msk.f32.mxu1 %vm8049_vm2, %v8047_v0  ;;  %v6376_v23 = vld [vmem:[%s9487_s26] ss:$0 sm:$0xff] }
0x1212   :  { %7368 = vmatprep.subr.mxu1 %v8047_v0 }
0x1213   :  { %7369 = vmatpush3.msra.mxu1 %v6351_v42 }
0x1214   :  { %7370 = vmatprep.subr.mxu1 %v8047_v0 }
0x1215   :  { %7371 = vmatpush3.msra.mxu1 %v6350_v33 }
0x1216   :  { %7372 = vmatprep.subr.mxu1 %v8047_v0 }
0x1217   :  { %7373 = vmatpush3.msra.mxu1 %v6349_v43 }
0x1218   :  { %7375 = vmatmul.mubr.msk.f32.vlgmr.msra.gmra.mxu1 %vm2200_vm8, %v5005_v27  ;;  %7387 = vmatprep.subr.mxu1 %v8047_v0 }
0x1219   :  { %7391 = vmatprep.mubr.msk.f32.mxu1 %vm8049_vm2, %v8047_v0  ;;  %7388 = vmatpush3.msra.mxu1 %v6360_v54 }
0x121a   :  { %7389 = vmatprep.subr.mxu1 %v8047_v0 }
0x121b   :  { %7390 = vmatpush3.msra.mxu1 %v6359_v49 }
0x121c   :  { %7401 = vmatprep.subr.mxu1 %v8047_v0 }
0x12ce   :  { %v4996_v50 = vpop.f32.mrf.mxu0 }
0x12d0   :  { %v4924_v37 = vpop.f32.mrf.mxu1  ;;  %v7365_v44 = vpop.f32.mrf.mxu0 }
0x12d1   :  { %v4997_v45 = vadd.f32 %v4996_v50, %v4924_v37  ;;  %v5802_v37 = vld [vmem:[%s9488_s28] sm:$0x3] }
0x12d2   :  { %v7354_v30 = vpop.f32.mrf.mxu1 }
0x12d8   :  { %v5074_v19 = vpop.f32.mrf.mxu1 }
0x12d9   :  { %v5078_v24 = vadd.f32 %v5074_v19, %v4997_v45  ;;  %v5963_v45 = vld [vmem:[%s8272_s25 + $0x8] sm:$0x3]  ;;  %v5962_v19 = vld [vmem:[%s8272_s25] sm:$0xff] }
0x12da   :  { %v7376_v31 = vpop.f32.mrf.mxu1 }
0x12db   :  { %v5086_v38 = vadd.f32 %v6354_v35, %v5078_v24  ;;  %v6379_v35 = vld [vmem:[%s8267_s5] ss:$0 sm:$0xff] }
0x12dd   :  { %v5087_v46 = vmax.f32 %v5086_v38, 0.0 }
0x12df   :  { %5089 = vrot.lane.b32.xlu0 %v5087_v46, %s8062_s6 }
0x1351   :  { %v5090_v47 = vpop.permute.xlu0 %5089 }
0x1352   :  { %v5092_v48 = vmax.f32 %v5087_v46, %v5090_v47  ;;  %v6381_v47 = vld [vmem:[%s8277_s3] ss:$0 sm:$0xff] }
0x1354   :  { %7378 = vmatpush3.msk.msra.mxu0 %vm2420_vm11, %v5092_v48 }
0x1355   :  { %7380 = vmatmul.mubr.msk.f32.vlgmr.msra.gmra.mxu0 %vm4768_vm3, %v5093_v51  ;;  %7382 = vmatprep.subr.mxu0 %v8047_v0 }
0x1356   :  { %7383 = vmatpush3.msk.msra.mxu0 %vm2420_vm11, %v5092_v48  ;;  %7384 = vmatprep.mubr.msk.f32.mxu0 %vm8049_vm2, %v8047_v0 }
0x1357   :  { %7394 = vmatprep.subr.mxu0 %v8047_v0 }
0x1359   :  { %7385 = vmatmul.mubr.msk.f32.vlgmr.msra.gmra.mxu0 %vm4768_vm3, %v5170_v52 }
0x135a   :  { %7398 = vmatprep.mubr.msk.f32.mxu0 %vm8049_vm2, %v8047_v0  ;;  %7395 = vmatpush3.msra.mxu0 %v5246_v53 }
0x135b   :  { %7396 = vmatprep.subr.mxu0 %v8047_v0 }
0x135c   :  { %7397 = vmatpush3.msra.mxu0 %v5245_v8 }
0x135d   :  { %7408 = vmatprep.subr.mxu0 %v8047_v0 }
0x1415   :  { %v5166_v10 = vpop.f32.mrf.mxu0 }
0x1417   :  { %v7381_v57 = vpop.f32.mrf.mxu0 }
0x1419   :  { %v5240_v58 = vpop.f32.mrf.mxu0 }
0x141a   :  { %v5244_v59 = vmax.f32 %v5166_v10, %v5240_v58 }
0x141b   :  { %v7386_v60 = vpop.f32.mrf.mxu0 }
0x141c   :  { %v5251_v61 = vrot.slane %v5244_v59, 1  ;;  %7399 = vmatmul.mubr.msk.f32.vlgmr.msra.gmra.mxu0 %vm1957_vm5, %v5244_v59  ;;  %v5399_v63 = vrot.slane %v5244_v59, 2 }
0x141d   :  { %7410 = vmatprep.mubr.msk.f32.mxu0 %vm8049_vm2, %v8047_v0 }
0x141e   :  { %7392 = vmatmul.mubr.msk.f32.vlgmr.msra.gmra.mxu1 %vm1957_vm5, %v5251_v61 }
0x141f   :  { %7402 = vmatpush3.msra.mxu1 %v6364_v62  ;;  %7405 = vmatprep.mubr.msk.f32.mxu1 %vm8049_vm2, %v8047_v0 }
0x1420   :  { %7403 = vmatprep.subr.mxu1 %v8047_v0 }
0x1421   :  { %7404 = vmatpush3.msra.mxu1 %v6363_v34 }
0x1422   :  { %7406 = vmatmul.mubr.msk.f32.vlgmr.msra.gmra.mxu1 %vm1957_vm5, %v5399_v63  ;;  %7413 = vmatprep.subr.mxu1 %v8047_v0 }
0x1423   :  { %7417 = vmatprep.mubr.msk.f32.mxu1 %vm8049_vm2, %v8047_v0  ;;  %7414 = vmatpush3.msra.mxu1 %v6370_v15 }
0x1424   :  { %7415 = vmatprep.subr.mxu1 %v8047_v0 }
0x1425   :  { %7416 = vmatpush3.msra.mxu1 %v6369_v20 }
0x1426   :  { %7427 = vmatprep.subr.mxu1 %v8047_v0 }
0x14dc   :  { %v5392_v1 = vpop.f32.mrf.mxu0 }
0x14de   :  { %v5320_v2 = vpop.f32.mrf.mxu1  ;;  %v7400_v56 = vpop.f32.mrf.mxu0 }
0x14df   :  { %v5393_v4 = vadd.f32 %v5392_v1, %v5320_v2 }
0x14e0   :  { %v7393_v3 = vpop.f32.mrf.mxu1 }
0x14e2   :  { %v5468_v5 = vpop.f32.mrf.mxu1 }
0x14e3   :  { %v5472_v7 = vadd.f32 %v5468_v5, %v5393_v4 }
0x14e4   :  { %v7407_v12 = vpop.f32.mrf.mxu1 }
0x14e5   :  { %v5480_v13 = vadd.f32 %v6366_v6, %v5472_v7 }
0x14e7   :  { %v5481_v14 = vmax.f32 %v5480_v13, 0.0 }
0x14e9   :  { %7409 = vmatpush3.msk.msra.mxu0 %vm1112_vm6, %v5481_v14 }
0x14ea   :  { %7411 = vmatmul.mubr.msk.f32.vlgmr.msra.gmra.mxu0 %vm5483_vm9, %v5482_v16  ;;  %7420 = vmatprep.subr.mxu0 %v8047_v0 }
0x14eb   :  { %7424 = vmatprep.mubr.msk.f32.mxu0 %vm8049_vm2, %v8047_v0  ;;  %7421 = vmatpush3.msra.mxu0 %v5561_v17 }
0x14ec   :  { %7422 = vmatprep.subr.mxu0 %v8047_v0 }
0x14ed   :  { %7423 = vmatpush3.msra.mxu0 %v5560_v55 }
0x14ee   :  { %7434 = vmatprep.subr.mxu0 %v8047_v0 }
0x15aa   :  { %v5556_v9 = vpop.f32.mrf.mxu0 }
0x15ab   :  { %v5566_v21 = vrot.slane %v5556_v9, 1  ;;  %7425 = vmatmul.mubr.msk.f32.vlgmr.msra.gmra.mxu0 %vm1957_vm5, %v5556_v9  ;;  %v5714_v11 = vrot.slane %v5556_v9, 2 }
0x15ac   :  { %v7412_v25 = vpop.f32.mrf.mxu0  ;;  %7436 = vmatprep.mubr.msk.f32.mxu0 %vm8049_vm2, %v8047_v0 }
0x15ad   :  { %7418 = vmatmul.mubr.msk.f32.vlgmr.msra.gmra.mxu1 %vm1957_vm5, %v5566_v21 }
0x15ae   :  { %7428 = vmatpush3.msra.mxu1 %v6374_v22  ;;  %7431 = vmatprep.mubr.msk.f32.mxu1 %vm8049_vm2, %v8047_v0 }
0x15af   :  { %7429 = vmatprep.subr.mxu1 %v8047_v0 }
0x15b0   :  { %7430 = vmatpush3.msra.mxu1 %v6373_v18 }
0x15b1   :  { %7432 = vmatmul.mubr.msk.f32.vlgmr.msra.gmra.mxu1 %vm1957_vm5, %v5714_v11  ;;  %7439 = vmatprep.subr.mxu1 %v8047_v0 }
0x15b2   :  { %7441 = vmatprep.mubr.msk.f32.mxu1 %vm8049_vm2, %v8047_v0  ;;  %7440 = vmatpush3.msra.mxu1 %v5879_v40 }
0x166b   :  { %v5707_v26 = vpop.f32.mrf.mxu0 }
0x166d   :  { %v5635_v32 = vpop.f32.mrf.mxu1  ;;  %v7426_v39 = vpop.f32.mrf.mxu0 }
0x166e   :  { %v5708_v28 = vadd.f32 %v5707_v26, %v5635_v32 }
0x166f   :  { %v7419_v41 = vpop.f32.mrf.mxu1 }
0x1671   :  { %v5783_v29 = vpop.f32.mrf.mxu1 }
0x1672   :  { %v5787_v36 = vadd.f32 %v5783_v29, %v5708_v28 }
0x1673   :  { %v7433_v42 = vpop.f32.mrf.mxu1 }
0x1674   :  { %v5795_v33 = vadd.f32 %v6376_v23, %v5787_v36 }
0x1676   :  { %v5796_v43 = vmax.f32 %v5795_v33, 0.0 }
0x1678   :  { %5798 = vrot.lane.b32.xlu1 %v5796_v43, %s8058_s2 }
0x16ea   :  { %v5799_v27 = vpop.permute.xlu1 %5798 }
0x16eb   :  { %v5801_v50 = vmax.f32 %v5796_v43, %v5799_v27 }
0x16ed   :  { %7435 = vmatpush3.msk.msra.mxu0 %vm1112_vm6, %v5801_v50 }
0x16ee   :  { %7437 = vmatmul.mubr.msk.f32.vlgmr.msra.gmra.mxu0 %vm5483_vm9, %v5802_v37  ;;  %7444 = vmatprep.subr.mxu0 %v8047_v0 }
0x16ef   :  { %7448 = vmatprep.mubr.msk.f32.mxu0 %vm8049_vm2, %v8047_v0  ;;  %7445 = vmatpush3.msk.msra.mxu0 %vm2595_vm12, %v5963_v45  ;;  %vm6047_vm2 = vcmask 74752  }
0x16f0   :  { %7446 = vmatprep.subr.mxu0 %v8047_v0 }
0x16f1   :  { %7447 = vmatpush3.msra.mxu0 %v5962_v19 }
0x17ae   :  { %v5875_v44 = vpop.f32.mrf.mxu0 }
0x17af   :  { %7442 = vmatmul.mubr.msk.f32.vlgmr.msra.gmra.mxu1 %vm5887_vm7, %v5875_v44 }
0x17b0   :  { %v7438_v30 = vpop.f32.mrf.mxu0 }
0x186f   :  { %v5957_v24 = vpop.f32.mrf.mxu1 }
0x1870   :  { %v5958_v31 = vadd.f32 %v6379_v35, %v5957_v24 }
0x1871   :  { %v7443_v38 = vpop.f32.mrf.mxu1 }
0x1872   :  { %v5961_v46 = vmax.f32 %v5958_v31, 0.0 }
0x1874   :  { %7449 = vmatmul.mubr.msk.f32.vlgmr.msra.gmra.mxu0 %vm3993_vm1, %v5961_v46 }
0x1934   :  { %v6043_v48 = vpop.f32.mrf.mxu0 }
0x1935   :  { %v6044_v51 = vadd.f32 %v6381_v47, %v6043_v48 }
0x1936   :  { %v7450_v52 = vpop.f32.mrf.mxu0 }
0x1937   :  { %6048 = vst.msk [vmem:[#allocation30] sm:$0x3] %vm6047_vm2, %v6044_v51 }
0x1938   :  { %7957 = shalt.err (!%p7954_p5)
}
0x1939   :  { %6058 = dma.vmem_to_hbm [thread:$0]  %s6056_s1, 32, %s8282_s21, [#allocation5]  }
0x193a   :  { %7984 = dma.done.wait [#allocation5], 32  }
0x193b   :  { %7985 = vsyncadd [#allocation5], 4294967264 }
0x193c   :  { %6062 = vsyncpa [#allocation4], 1 }
0x193d   :  { %6063 = vsyncpa [#allocation7], 1 }
0x193e   :  { %6064 = vsyncpa [#allocation10], 1 }
0x193f   :  { %6065 = vsyncpa [#allocation13], 1 }
0x1940   :  { %6066 = vsyncpa [#allocation16], 1 }
0x1941   :  { %6067 = vsyncpa [#allocation19], 1 }
0x1942   :  { %6068 = vsyncpa [#allocation22], 1 }
0x1943   :  { %6069 = vsyncpa [#allocation25], 1 }
0x1944   :  { %6070 = vsyncpa [#allocation28], 1 }
0x1945   :  { %6071 = vsyncpa [#allocation5], 1 }

</bundles_post_ra>
